<compile_context>
chip_gen: v7x
topology: tpu7x:2x2x1
jax: 0.10.0
libtpu: 0.0.40
codegen_flags: <defaults>
</compile_context>

<pallas_src>
import math

import jax
import jax.numpy as jnp
from jax.experimental import pallas as pl
from jax.experimental.pallas import tpu as pltpu

EMOTION_CLASSES = ['neutral', 'calm', 'happy', 'sad', 'angry', 'fear',
                   'disgust', 'surprise']
NUM_CLASSES = len(EMOTION_CLASSES)

# ---------------- small deterministic wav2vec2-base-shaped config ----------------
CONV_DIM = 32
CONV_KERNELS = (10, 3, 3, 3, 3, 2, 2)
CONV_STRIDES = (5, 2, 2, 2, 2, 2, 2)
HIDDEN = 32
NUM_HEADS = 2
NUM_LAYERS = 2
FFN_DIM = 128
POS_CONV_KERNEL = 4      # even kernel -> SamePad trim, like the real 128
POS_CONV_GROUPS = 2
PROJ_DIM = 32            # classifier_proj_size -> "actual_input_size" of the head
EPS = 1e-5

MXU_DTYPE = jnp.bfloat16  # MXU operand dtype; accumulation is always f32


# ------------------------------ in-kernel helpers ------------------------------

def _mxu_dot(a, b):
    """a @ b on the MXU, bf16 operands, f32 accumulation."""
    return jnp.dot(a.astype(MXU_DTYPE), b.astype(MXU_DTYPE),
                   preferred_element_type=jnp.float32)


def _mxu_dot_nt(a, b):
    """a @ b.T (contract the last axis of both) on the MXU, no materialized transpose."""
    return jax.lax.dot_general(a.astype(MXU_DTYPE), b.astype(MXU_DTYPE),
                               (((1,), (1,)), ((), ())),
                               preferred_element_type=jnp.float32)


def _gelu(x):
    # TODO(synk): HF wav2vec2 uses exact (erf) GELU; tanh approximation used here.
    return jax.nn.gelu(x, approximate=True)


def _layer_norm(x, g, b):
    mu = jnp.mean(x, axis=-1, keepdims=True)
    var = jnp.mean(jnp.square(x - mu), axis=-1, keepdims=True)
    return (x - mu) * jax.lax.rsqrt(var + EPS) * g + b


# ---------------------- feature-extractor conv kernels -------------------------

def _conv_gelu_kernel(xcol_ref, w_ref, o_ref):
    """One fused feature-extractor layer: GELU(W @ Xcol), time on lanes."""
    y = _mxu_dot(w_ref[...], xcol_ref[0])                 # (C_out, T_out) f32
    o_ref[0] = _gelu(y)


def _conv_gn_gelu_kernel(xcol_ref, w_ref, g_ref, b_ref, o_ref):
    """Layer 0: conv + per-channel GroupNorm (over time) + GELU, fully fused."""
    y = _mxu_dot(w_ref[...], xcol_ref[0])                 # (C_out, T_out) f32
    mu = jnp.mean(y, axis=-1, keepdims=True)
    var = jnp.mean(jnp.square(y - mu), axis=-1, keepdims=True)
    y = (y - mu) * jax.lax.rsqrt(var + EPS) * g_ref[...] + b_ref[...]
    o_ref[0] = _gelu(y)


def _strided_cols(x, kernel, stride):
    """x: (B, C, T) -> (B, C*K, T_out); row ci*K+k holds x[:, ci, k::stride][:T_out].

    Built from K strided slices + one stack (no gather, no transpose, no pad)."""
    B, C, T = x.shape
    T_out = (T - kernel) // stride + 1
    cols = [jax.lax.slice(x, (0, 0, k),
                          (B, C, k + (T_out - 1) * stride + 1),
                          (1, 1, stride)) for k in range(kernel)]
    return jnp.stack(cols, axis=2).reshape(B, C * kernel, T_out), T_out


def conv_layer(x, w, stride, gn=None):
    """Fused feature-extractor layer.  x: (B, C_in, T) NCW; w: (C_out, C_in, K) torch
    layout (bias-free).  gn=(gamma, beta) enables the fused GroupNorm of layer 0."""
    B, C_in, _ = x.shape
    C_out, _, K = w.shape
    xcol, T_out = _strided_cols(x, K, stride)
    w2 = w.reshape(C_out, C_in * K).astype(MXU_DTYPE)

    args = [xcol, w2]
    in_specs = [pl.BlockSpec((1, C_in * K, T_out), lambda b: (b, 0, 0)),
                pl.BlockSpec((C_out, C_in * K), lambda b: (0, 0))]
    if gn is None:
        kernel = _conv_gelu_kernel
    else:
        gamma, beta = gn
        args += [gamma.reshape(C_out, 1), beta.reshape(C_out, 1)]
        in_specs += [pl.BlockSpec((C_out, 1), lambda b: (0, 0)),
                     pl.BlockSpec((C_out, 1), lambda b: (0, 0))]
        kernel = _conv_gn_gelu_kernel

    return pl.pallas_call(
        kernel,
        out_shape=jax.ShapeDtypeStruct((B, C_out, T_out), jnp.float32),
        grid=(B,),
        in_specs=in_specs,
        out_specs=pl.BlockSpec((1, C_out, T_out), lambda b: (b, 0, 0)),
        compiler_params=pltpu.CompilerParams(dimension_semantics=("parallel",)),
    )(*args)


# ------------------- fused encoder + classification-head kernel ----------------

def _encoder_head_kernel(feat_ref,
                         fp_ln_g, fp_ln_b, fp_w, fp_b,
                         pos_w, pos_b, enc_ln_g, enc_ln_b,
                         qkv_w, qkv_b, o_w, o_b,
                         ln1_g, ln1_b, ff1_w, ff1_b, ff2_w, ff2_b,
                         ln2_g, ln2_b,
                         proj_w, proj_b,
                         c1_w, c1_b, bn1_s, bn1_t,
                         c2_w, c2_b, bn2_s, bn2_t,
                         c3_w, c3_b,
                         logits_ref):
    """Everything after the conv feature extractor, fused, for one batch element.

    TODO(synk): at real wav2vec2 sequence lengths the attention below should be
    tiled flash-style (grid over q/kv blocks with online softmax); at this
    scaled-down config the full sequence fits trivially in VMEM.
    """
    H = HIDDEN
    feat = feat_ref[0]                                    # (T, C)
    T = feat.shape[0]

    # ---- feature projection: LayerNorm + Linear (dropout = identity) ----
    x = _layer_norm(feat, fp_ln_g[...], fp_ln_b[...])
    h = _mxu_dot(x, fp_w[...]) + fp_b[...]                # (T, H)

    # ---- positional conv embedding: grouped conv folded to block-diagonal
    #      dense weights -> K shifted matmuls; SamePad trim; GELU ----
    pad = POS_CONV_KERNEL // 2
    zrow = jnp.zeros((pad, H), jnp.float32)
    hp = jnp.concatenate([zrow, h, zrow], axis=0)         # (T + 2*pad, H)
    pos = jnp.zeros((T, H), jnp.float32)
    for k in range(POS_CONV_KERNEL):
        pos = pos + _mxu_dot(hp[k:k + T, :], pos_w[k])
    h = h + _gelu(pos + pos_b[...])
    h = _layer_norm(h, enc_ln_g[...], enc_ln_b[...])

    # ---- transformer layers (post-LN, fused QKV, fused FFN) ----
    d = H // NUM_HEADS
    scale = 1.0 / math.sqrt(d)
    for l in range(NUM_LAYERS):
        residual = h
        qkv = _mxu_dot(h, qkv_w[l]) + qkv_b[l]            # (T, 3H)
        q = qkv[:, 0:H] * scale
        kk = qkv[:, H:2 * H]
        v = qkv[:, 2 * H:3 * H]
        heads = []
        for hd in range(NUM_HEADS):
            lo, hi = hd * d, (hd + 1) * d
            s = _mxu_dot_nt(q[:, lo:hi], kk[:, lo:hi])    # (T, T)
            s = s - jnp.max(s, axis=-1, keepdims=True)
            p = jnp.exp(s)
            p = p * pl.reciprocal(jnp.sum(p, axis=-1, keepdims=True), approx=True)
            heads.append(_mxu_dot(p, v[:, lo:hi]))
        a = jnp.concatenate(heads, axis=-1)               # (T, H)
        a = _mxu_dot(a, o_w[l]) + o_b[l]
        h = _layer_norm(residual + a, ln1_g[l], ln1_b[l])
        ff = _gelu(_mxu_dot(h, ff1_w[l]) + ff1_b[l])
        ff = _mxu_dot(ff, ff2_w[l]) + ff2_b[l]
        h = _layer_norm(h + ff, ln2_g[l], ln2_b[l])

    # ---- projector + mean-pool over time (attention_mask is None) ----
    proj = _mxu_dot(h, proj_w[...]) + proj_b[...]         # (T, P)
    pooled = jnp.sum(proj, axis=0, keepdims=True) * (1.0 / T)

    # ---- classifier head: (Linear->ReLU->BN)x2 -> Linear; BN folded (eval) ----
    z = jnp.maximum(_mxu_dot(pooled, c1_w[...]) + c1_b[...], 0.0)
    z = z * bn1_s[...] + bn1_t[...]
    z = jnp.maximum(_mxu_dot(z, c2_w[...]) + c2_b[...], 0.0)
    z = z * bn2_s[...] + bn2_t[...]
    logits_ref[0] = _mxu_dot(z, c3_w[...]) + c3_b[...]    # (1, NUM_CLASSES)


# ----------------------------------- glue --------------------------------------

def _expand_grouped_pos_w(w):
    """(H, H//G, K) grouped conv weight -> (K, H_in, H_out) block-diagonal dense.

    TODO(synk): weight_norm parametrization folded into a single dense weight."""
    H, cg, K = w.shape
    dense = jnp.zeros((K, H, H), jnp.float32)
    for g in range(POS_CONV_GROUPS):
        blk = w[g * cg:(g + 1) * cg]                      # (Cg_out, Cg_in, K)
        blk = jnp.transpose(blk, (2, 1, 0))               # (K, Cg_in, Cg_out)
        dense = dense.at[:, g * cg:(g + 1) * cg, g * cg:(g + 1) * cg].set(blk)
    return dense


# ---------------------------------- forward -------------------------------------

def wav2vec2_emotion_forward(p, input_values):
    B = input_values.shape[0]
    H, F, P, L = HIDDEN, FFN_DIM, PROJ_DIM, NUM_LAYERS
    mx = MXU_DTYPE

    # ---- feature extractor: 7 fused conv(+GroupNorm)+GELU kernels, NCW ----
    x = input_values[:, None, :]                          # (B, 1, L)
    x = conv_layer(x, p["fe_convs"][0], CONV_STRIDES[0],
                   gn=(p["fe_gn_g"], p["fe_gn_b"]))
    for w, s in zip(p["fe_convs"][1:], CONV_STRIDES[1:]):
        x = conv_layer(x, w, s)
    feat = jnp.transpose(x, (0, 2, 1))                    # (B, T, C)
    _, T, C = feat.shape

    # ---- fold / stack params for the single fused encoder + head kernel ----
    def stack(key):
        return jnp.stack([lp[key] for lp in p["layers"]], axis=0)

    qkv_w = jnp.concatenate([stack("q_w"), stack("k_w"), stack("v_w")],
                            axis=-1).astype(mx)           # (L, H, 3H)
    qkv_b = jnp.concatenate([stack("q_b"), stack("k_b"), stack("v_b")],
                            axis=-1).reshape(L, 1, 3 * H)
    bn1_s = p["bn1_g"] * jax.lax.rsqrt(p["bn1_v"] + EPS)
    bn1_t = p["bn1_b"] - p["bn1_m"] * bn1_s
    bn2_s = p["bn2_g"] * jax.lax.rsqrt(p["bn2_v"] + EPS)
    bn2_t = p["bn2_b"] - p["bn2_m"] * bn2_s

    weights = [
        p["fp_ln_g"].reshape(1, C), p["fp_ln_b"].reshape(1, C),
        p["fp_w"].astype(mx), p["fp_b"].reshape(1, H),
        _expand_grouped_pos_w(p["pos_w"]).astype(mx), p["pos_b"].reshape(1, H),
        p["enc_ln_g"].reshape(1, H), p["enc_ln_b"].reshape(1, H),
        qkv_w, qkv_b,
        stack("o_w").astype(mx), stack("o_b").reshape(L, 1, H),
        stack("ln1_g").reshape(L, 1, H), stack("ln1_b").reshape(L, 1, H),
        stack("ff1_w").astype(mx), stack("ff1_b").reshape(L, 1, F),
        stack("ff2_w").astype(mx), stack("ff2_b").reshape(L, 1, H),
        stack("ln2_g").reshape(L, 1, H), stack("ln2_b").reshape(L, 1, H),
        p["proj_w"].astype(mx), p["proj_b"].reshape(1, P),
        p["c1_w"].astype(mx), p["c1_b"].reshape(1, 512),
        bn1_s.reshape(1, 512), bn1_t.reshape(1, 512),
        p["c2_w"].astype(mx), p["c2_b"].reshape(1, 256),
        bn2_s.reshape(1, 256), bn2_t.reshape(1, 256),
        p["c3_w"].astype(mx), p["c3_b"].reshape(1, NUM_CLASSES),
    ]

    def bcast_spec(a):
        return pl.BlockSpec(a.shape, lambda b, _z=(0,) * a.ndim: _z)

    logits = pl.pallas_call(
        _encoder_head_kernel,
        out_shape=jax.ShapeDtypeStruct((B, 1, NUM_CLASSES), jnp.float32),
        grid=(B,),
        in_specs=[pl.BlockSpec((1, T, C), lambda b: (b, 0, 0))]
                 + [bcast_spec(a) for a in weights],
        out_specs=pl.BlockSpec((1, 1, NUM_CLASSES), lambda b: (b, 0, 0)),
        compiler_params=pltpu.CompilerParams(dimension_semantics=("parallel",)),
    )(feat, *weights)
    return logits.reshape(B, NUM_CLASSES)


# ------------------------------ deterministic params ----------------------------

def init_params(key):
    keys = iter(jax.random.split(key, 256))

    def nrm(shape, scale=0.02):
        return scale * jax.random.normal(next(keys), shape, jnp.float32)

    p = {}
    convs = []
    c_in = 1
    for k in CONV_KERNELS:
        convs.append(nrm((CONV_DIM, c_in, k)))
        c_in = CONV_DIM
    p["fe_convs"] = convs
    p["fe_gn_g"] = 1.0 + nrm((CONV_DIM,), 0.1)
    p["fe_gn_b"] = nrm((CONV_DIM,), 0.1)

    p["fp_ln_g"] = 1.0 + nrm((CONV_DIM,), 0.1)
    p["fp_ln_b"] = nrm((CONV_DIM,), 0.1)
    p["fp_w"] = nrm((CONV_DIM, HIDDEN))
    p["fp_b"] = nrm((HIDDEN,))

    p["pos_w"] = nrm((HIDDEN, HIDDEN // POS_CONV_GROUPS, POS_CONV_KERNEL))
    p["pos_b"] = nrm((HIDDEN,))
    p["enc_ln_g"] = 1.0 + nrm((HIDDEN,), 0.1)
    p["enc_ln_b"] = nrm((HIDDEN,), 0.1)

    layers = []
    for _ in range(NUM_LAYERS):
        layers.append({
            "q_w": nrm((HIDDEN, HIDDEN)), "q_b": nrm((HIDDEN,)),
            "k_w": nrm((HIDDEN, HIDDEN)), "k_b": nrm((HIDDEN,)),
            "v_w": nrm((HIDDEN, HIDDEN)), "v_b": nrm((HIDDEN,)),
            "o_w": nrm((HIDDEN, HIDDEN)), "o_b": nrm((HIDDEN,)),
            "ln1_g": 1.0 + nrm((HIDDEN,), 0.1), "ln1_b": nrm((HIDDEN,), 0.1),
            "ff1_w": nrm((HIDDEN, FFN_DIM)), "ff1_b": nrm((FFN_DIM,)),
            "ff2_w": nrm((FFN_DIM, HIDDEN)), "ff2_b": nrm((HIDDEN,)),
            "ln2_g": 1.0 + nrm((HIDDEN,), 0.1), "ln2_b": nrm((HIDDEN,), 0.1),
        })
    p["layers"] = layers

    p["proj_w"] = nrm((HIDDEN, PROJ_DIM))
    p["proj_b"] = nrm((PROJ_DIM,))

    # custom head: Dropout->Linear(P,512)->ReLU->BN->Dropout->Linear(512,256)
    #              ->ReLU->BN->Dropout->Linear(256,NUM_CLASSES)
    p["c1_w"] = nrm((PROJ_DIM, 512)); p["c1_b"] = nrm((512,))
    p["bn1_g"] = 1.0 + nrm((512,), 0.1); p["bn1_b"] = nrm((512,), 0.1)
    p["bn1_m"] = nrm((512,), 0.1)
    p["bn1_v"] = 1.0 + 0.1 * jnp.abs(jax.random.normal(next(keys), (512,), jnp.float32))
    p["c2_w"] = nrm((512, 256)); p["c2_b"] = nrm((256,))
    p["bn2_g"] = 1.0 + nrm((256,), 0.1); p["bn2_b"] = nrm((256,), 0.1)
    p["bn2_m"] = nrm((256,), 0.1)
    p["bn2_v"] = 1.0 + 0.1 * jnp.abs(jax.random.normal(next(keys), (256,), jnp.float32))
    p["c3_w"] = nrm((256, NUM_CLASSES)); p["c3_b"] = nrm((NUM_CLASSES,))
    return p


if __name__ == "__main__":
    key = jax.random.PRNGKey(0)
    input_values = jax.random.normal(key, (2, 3200), jnp.float32)  # (batch, raw audio)
    params = init_params(jax.random.PRNGKey(42))

    logits = jax.jit(wav2vec2_emotion_forward)(params, input_values)
    logits = jax.block_until_ready(logits)

    assert logits.shape == (2, NUM_CLASSES), logits.shape
    assert bool(jnp.all(jnp.isfinite(logits)))
    print("KERNEL_OK")
</pallas_src>

<mosaic_0001>
module attributes {stable_mosaic.version = 11 : i64} {
  func.func @_conv_gn_gelu_kernel(%arg0: i32, %arg1: memref<1x10x639xf32, #tpu.memory_space<vmem>>, %arg2: memref<32x10xbf16, #tpu.memory_space<vmem>>, %arg3: memref<32x1xf32, #tpu.memory_space<vmem>>, %arg4: memref<32x1xf32, #tpu.memory_space<vmem>>, %arg5: memref<1x32x639xf32, #tpu.memory_space<vmem>>) attributes {dimension_semantics = [#tpu.dimension_semantics<parallel>], iteration_bounds = array<i64: 2>, scalar_prefetch = 0 : i64, scratch_operands = 0 : i64, tpu.core_type = #tpu.core_type<tc>, window_params = [{transform_indices = @transform_0, window_bounds = array<i64: 1, 10, 639>}, {pipeline_mode = #tpu.pipeline_mode<synchronous>, transform_indices = @transform_1, window_bounds = array<i64: 32, 10>}, {pipeline_mode = #tpu.pipeline_mode<synchronous>, transform_indices = @transform_2, window_bounds = array<i64: 32, 1>}, {pipeline_mode = #tpu.pipeline_mode<synchronous>, transform_indices = @transform_3, window_bounds = array<i64: 32, 1>}, {transform_indices = @transform_4, window_bounds = array<i64: 1, 32, 639>}]} {
    %c0 = arith.constant 0 : index
    %c0_0 = arith.constant 0 : index
    %0 = vector.load %arg2[%c0, %c0_0] : memref<32x10xbf16, #tpu.memory_space<vmem>>, vector<32x10xbf16>
    %c0_1 = arith.constant 0 : index
    %c0_2 = arith.constant 0 : index
    %c0_3 = arith.constant 0 : index
    %1 = vector.load %arg1[%c0_1, %c0_2, %c0_3] : memref<1x10x639xf32, #tpu.memory_space<vmem>>, vector<1x10x639xf32>
    %2 = vector.shape_cast %1 : vector<1x10x639xf32> to vector<10x639xf32>
    %3 = arith.truncf %2 : vector<10x639xf32> to vector<10x639xbf16>
    %cst = arith.constant dense<0.000000e+00> : vector<32x639xf32>
    %4 = tpu.matmul %0, %3, %cst {dimension_numbers = #tpu.dot_dimension_numbers<[1], [0], [0], [1], [0, 0, 1, 1], [], []>} : vector<32x10xbf16>, vector<10x639xbf16>, vector<32x639xf32> -> vector<32x639xf32>
    %cst_4 = arith.constant dense<0.000000e+00> : vector<32xf32>
    %5 = vector.multi_reduction <add>, %4, %cst_4 [1] : vector<32x639xf32> to vector<32xf32>
    %6 = vector.shape_cast %5 : vector<32xf32> to vector<32x1xf32>
    %cst_5 = arith.constant 6.390000e+02 : f32
    %7 = vector.broadcast %cst_5 : f32 to vector<32x1xf32>
    %8 = arith.divf %6, %7 : vector<32x1xf32>
    %9 = vector.broadcast %8 : vector<32x1xf32> to vector<32x639xf32>
    %10 = arith.subf %4, %9 : vector<32x639xf32>
    %11 = arith.mulf %10, %10 : vector<32x639xf32>
    %cst_6 = arith.constant dense<0.000000e+00> : vector<32xf32>
    %12 = vector.multi_reduction <add>, %11, %cst_6 [1] : vector<32x639xf32> to vector<32xf32>
    %13 = vector.shape_cast %12 : vector<32xf32> to vector<32x1xf32>
    %cst_7 = arith.constant 6.390000e+02 : f32
    %14 = vector.broadcast %cst_7 : f32 to vector<32x1xf32>
    %15 = arith.divf %13, %14 : vector<32x1xf32>
    %16 = vector.broadcast %8 : vector<32x1xf32> to vector<32x639xf32>
    %17 = arith.subf %4, %16 : vector<32x639xf32>
    %cst_8 = arith.constant 9.99999974E-6 : f32
    %18 = vector.broadcast %cst_8 : f32 to vector<32x1xf32>
    %19 = arith.addf %15, %18 : vector<32x1xf32>
    %20 = math.rsqrt %19 : vector<32x1xf32>
    %21 = vector.broadcast %20 : vector<32x1xf32> to vector<32x639xf32>
    %22 = arith.mulf %17, %21 : vector<32x639xf32>
    %c0_9 = arith.constant 0 : index
    %c0_10 = arith.constant 0 : index
    %23 = vector.load %arg3[%c0_9, %c0_10] : memref<32x1xf32, #tpu.memory_space<vmem>>, vector<32x1xf32>
    %24 = vector.broadcast %23 : vector<32x1xf32> to vector<32x639xf32>
    %25 = arith.mulf %22, %24 : vector<32x639xf32>
    %c0_11 = arith.constant 0 : index
    %c0_12 = arith.constant 0 : index
    %26 = vector.load %arg4[%c0_11, %c0_12] : memref<32x1xf32, #tpu.memory_space<vmem>>, vector<32x1xf32>
    %27 = vector.broadcast %26 : vector<32x1xf32> to vector<32x639xf32>
    %28 = arith.addf %25, %27 : vector<32x639xf32>
    %29 = arith.mulf %28, %28 : vector<32x639xf32>
    %30 = arith.mulf %28, %29 : vector<32x639xf32>
    %cst_13 = arith.constant 4.471500e-02 : f32
    %31 = vector.broadcast %cst_13 : f32 to vector<32x639xf32>
    %32 = arith.mulf %31, %30 : vector<32x639xf32>
    %33 = arith.addf %28, %32 : vector<32x639xf32>
    %cst_14 = arith.constant 0.797884583 : f32
    %34 = vector.broadcast %cst_14 : f32 to vector<32x639xf32>
    %35 = arith.mulf %34, %33 : vector<32x639xf32>
    %36 = math.tanh %35 : vector<32x639xf32>
    %cst_15 = arith.constant 1.000000e+00 : f32
    %37 = vector.broadcast %cst_15 : f32 to vector<32x639xf32>
    %38 = arith.addf %37, %36 : vector<32x639xf32>
    %cst_16 = arith.constant 5.000000e-01 : f32
    %39 = vector.broadcast %cst_16 : f32 to vector<32x639xf32>
    %40 = arith.mulf %39, %38 : vector<32x639xf32>
    %41 = arith.mulf %28, %40 : vector<32x639xf32>
    %c0_17 = arith.constant 0 : index
    %c0_18 = arith.constant 0 : index
    %c0_19 = arith.constant 0 : index
    %42 = vector.load %arg5[%c0_17, %c0_18, %c0_19] : memref<1x32x639xf32, #tpu.memory_space<vmem>>, vector<1x32x639xf32>
    %43 = vector.shape_cast %42 : vector<1x32x639xf32> to vector<32x639xf32>
    %44 = vector.shape_cast %41 : vector<32x639xf32> to vector<1x32x639xf32>
    tpu.vector_store %arg5[%c0_17, %c0_18, %c0_19], %44 {strides = array<i32>} : memref<1x32x639xf32, #tpu.memory_space<vmem>>, vector<1x32x639xf32>,
    return
  }
  func.func @transform_0(%arg0: i32) -> (i32, i32, i32) {
    %c0_i32 = arith.constant 0 : i32
    %c0_i32_0 = arith.constant 0 : i32
    %c0_i32_1 = arith.constant 0 : i32
    return %arg0, %c0_i32, %c0_i32_0 : i32, i32, i32
  }
  func.func @transform_1(%arg0: i32) -> (i32, i32) {
    %c0_i32 = arith.constant 0 : i32
    %c0_i32_0 = arith.constant 0 : i32
    %c0_i32_1 = arith.constant 0 : i32
    return %c0_i32, %c0_i32_0 : i32, i32
  }
  func.func @transform_2(%arg0: i32) -> (i32, i32) {
    %c0_i32 = arith.constant 0 : i32
    %c0_i32_0 = arith.constant 0 : i32
    %c0_i32_1 = arith.constant 0 : i32
    return %c0_i32, %c0_i32_0 : i32, i32
  }
  func.func @transform_3(%arg0: i32) -> (i32, i32) {
    %c0_i32 = arith.constant 0 : i32
    %c0_i32_0 = arith.constant 0 : i32
    %c0_i32_1 = arith.constant 0 : i32
    return %c0_i32, %c0_i32_0 : i32, i32
  }
  func.func @transform_4(%arg0: i32) -> (i32, i32, i32) {
    %c0_i32 = arith.constant 0 : i32
    %c0_i32_0 = arith.constant 0 : i32
    %c0_i32_1 = arith.constant 0 : i32
    return %arg0, %c0_i32, %c0_i32_0 : i32, i32, i32
  }
}

module attributes {stable_mosaic.version = 11 : i64} {
  func.func @_conv_gelu_kernel(%arg0: i32, %arg1: memref<1x96x319xf32, #tpu.memory_space<vmem>>, %arg2: memref<32x96xbf16, #tpu.memory_space<vmem>>, %arg3: memref<1x32x319xf32, #tpu.memory_space<vmem>>) attributes {dimension_semantics = [#tpu.dimension_semantics<parallel>], iteration_bounds = array<i64: 2>, scalar_prefetch = 0 : i64, scratch_operands = 0 : i64, tpu.core_type = #tpu.core_type<tc>, window_params = [{transform_indices = @transform_0, window_bounds = array<i64: 1, 96, 319>}, {pipeline_mode = #tpu.pipeline_mode<synchronous>, transform_indices = @transform_1, window_bounds = array<i64: 32, 96>}, {transform_indices = @transform_2, window_bounds = array<i64: 1, 32, 319>}]} {
    %c0 = arith.constant 0 : index
    %c0_0 = arith.constant 0 : index
    %0 = vector.load %arg2[%c0, %c0_0] : memref<32x96xbf16, #tpu.memory_space<vmem>>, vector<32x96xbf16>
    %c0_1 = arith.constant 0 : index
    %c0_2 = arith.constant 0 : index
    %c0_3 = arith.constant 0 : index
    %1 = vector.load %arg1[%c0_1, %c0_2, %c0_3] : memref<1x96x319xf32, #tpu.memory_space<vmem>>, vector<1x96x319xf32>
    %2 = vector.shape_cast %1 : vector<1x96x319xf32> to vector<96x319xf32>
    %3 = arith.truncf %2 : vector<96x319xf32> to vector<96x319xbf16>
    %cst = arith.constant dense<0.000000e+00> : vector<32x319xf32>
    %4 = tpu.matmul %0, %3, %cst {dimension_numbers = #tpu.dot_dimension_numbers<[1], [0], [0], [1], [0, 0, 1, 1], [], []>} : vector<32x96xbf16>, vector<96x319xbf16>, vector<32x319xf32> -> vector<32x319xf32>
    %5 = arith.mulf %4, %4 : vector<32x319xf32>
    %6 = arith.mulf %4, %5 : vector<32x319xf32>
    %cst_4 = arith.constant 4.471500e-02 : f32
    %7 = vector.broadcast %cst_4 : f32 to vector<32x319xf32>
    %8 = arith.mulf %7, %6 : vector<32x319xf32>
    %9 = arith.addf %4, %8 : vector<32x319xf32>
    %cst_5 = arith.constant 0.797884583 : f32
    %10 = vector.broadcast %cst_5 : f32 to vector<32x319xf32>
    %11 = arith.mulf %10, %9 : vector<32x319xf32>
    %12 = math.tanh %11 : vector<32x319xf32>
    %cst_6 = arith.constant 1.000000e+00 : f32
    %13 = vector.broadcast %cst_6 : f32 to vector<32x319xf32>
    %14 = arith.addf %13, %12 : vector<32x319xf32>
    %cst_7 = arith.constant 5.000000e-01 : f32
    %15 = vector.broadcast %cst_7 : f32 to vector<32x319xf32>
    %16 = arith.mulf %15, %14 : vector<32x319xf32>
    %17 = arith.mulf %4, %16 : vector<32x319xf32>
    %c0_8 = arith.constant 0 : index
    %c0_9 = arith.constant 0 : index
    %c0_10 = arith.constant 0 : index
    %18 = vector.load %arg3[%c0_8, %c0_9, %c0_10] : memref<1x32x319xf32, #tpu.memory_space<vmem>>, vector<1x32x319xf32>
    %19 = vector.shape_cast %18 : vector<1x32x319xf32> to vector<32x319xf32>
    %20 = vector.shape_cast %17 : vector<32x319xf32> to vector<1x32x319xf32>
    tpu.vector_store %arg3[%c0_8, %c0_9, %c0_10], %20 {strides = array<i32>} : memref<1x32x319xf32, #tpu.memory_space<vmem>>, vector<1x32x319xf32>,
    return
  }
  func.func @transform_0(%arg0: i32) -> (i32, i32, i32) {
    %c0_i32 = arith.constant 0 : i32
    %c0_i32_0 = arith.constant 0 : i32
    %c0_i32_1 = arith.constant 0 : i32
    return %arg0, %c0_i32, %c0_i32_0 : i32, i32, i32
  }
  func.func @transform_1(%arg0: i32) -> (i32, i32) {
    %c0_i32 = arith.constant 0 : i32
    %c0_i32_0 = arith.constant 0 : i32
    %c0_i32_1 = arith.constant 0 : i32
    return %c0_i32, %c0_i32_0 : i32, i32
  }
  func.func @transform_2(%arg0: i32) -> (i32, i32, i32) {
    %c0_i32 = arith.constant 0 : i32
    %c0_i32_0 = arith.constant 0 : i32
    %c0_i32_1 = arith.constant 0 : i32
    return %arg0, %c0_i32, %c0_i32_0 : i32, i32, i32
  }
}

module attributes {stable_mosaic.version = 11 : i64} {
  func.func @_conv_gelu_kernel(%arg0: i32, %arg1: memref<1x96x159xf32, #tpu.memory_space<vmem>>, %arg2: memref<32x96xbf16, #tpu.memory_space<vmem>>, %arg3: memref<1x32x159xf32, #tpu.memory_space<vmem>>) attributes {dimension_semantics = [#tpu.dimension_semantics<parallel>], iteration_bounds = array<i64: 2>, scalar_prefetch = 0 : i64, scratch_operands = 0 : i64, tpu.core_type = #tpu.core_type<tc>, window_params = [{transform_indices = @transform_0, window_bounds = array<i64: 1, 96, 159>}, {pipeline_mode = #tpu.pipeline_mode<synchronous>, transform_indices = @transform_1, window_bounds = array<i64: 32, 96>}, {transform_indices = @transform_2, window_bounds = array<i64: 1, 32, 159>}]} {
    %c0 = arith.constant 0 : index
    %c0_0 = arith.constant 0 : index
    %0 = vector.load %arg2[%c0, %c0_0] : memref<32x96xbf16, #tpu.memory_space<vmem>>, vector<32x96xbf16>
    %c0_1 = arith.constant 0 : index
    %c0_2 = arith.constant 0 : index
    %c0_3 = arith.constant 0 : index
    %1 = vector.load %arg1[%c0_1, %c0_2, %c0_3] : memref<1x96x159xf32, #tpu.memory_space<vmem>>, vector<1x96x159xf32>
    %2 = vector.shape_cast %1 : vector<1x96x159xf32> to vector<96x159xf32>
    %3 = arith.truncf %2 : vector<96x159xf32> to vector<96x159xbf16>
    %cst = arith.constant dense<0.000000e+00> : vector<32x159xf32>
    %4 = tpu.matmul %0, %3, %cst {dimension_numbers = #tpu.dot_dimension_numbers<[1], [0], [0], [1], [0, 0, 1, 1], [], []>} : vector<32x96xbf16>, vector<96x159xbf16>, vector<32x159xf32> -> vector<32x159xf32>
    %5 = arith.mulf %4, %4 : vector<32x159xf32>
    %6 = arith.mulf %4, %5 : vector<32x159xf32>
    %cst_4 = arith.constant 4.471500e-02 : f32
    %7 = vector.broadcast %cst_4 : f32 to vector<32x159xf32>
    %8 = arith.mulf %7, %6 : vector<32x159xf32>
    %9 = arith.addf %4, %8 : vector<32x159xf32>
    %cst_5 = arith.constant 0.797884583 : f32
    %10 = vector.broadcast %cst_5 : f32 to vector<32x159xf32>
    %11 = arith.mulf %10, %9 : vector<32x159xf32>
    %12 = math.tanh %11 : vector<32x159xf32>
    %cst_6 = arith.constant 1.000000e+00 : f32
    %13 = vector.broadcast %cst_6 : f32 to vector<32x159xf32>
    %14 = arith.addf %13, %12 : vector<32x159xf32>
    %cst_7 = arith.constant 5.000000e-01 : f32
    %15 = vector.broadcast %cst_7 : f32 to vector<32x159xf32>
    %16 = arith.mulf %15, %14 : vector<32x159xf32>
    %17 = arith.mulf %4, %16 : vector<32x159xf32>
    %c0_8 = arith.constant 0 : index
    %c0_9 = arith.constant 0 : index
    %c0_10 = arith.constant 0 : index
    %18 = vector.load %arg3[%c0_8, %c0_9, %c0_10] : memref<1x32x159xf32, #tpu.memory_space<vmem>>, vector<1x32x159xf32>
    %19 = vector.shape_cast %18 : vector<1x32x159xf32> to vector<32x159xf32>
    %20 = vector.shape_cast %17 : vector<32x159xf32> to vector<1x32x159xf32>
    tpu.vector_store %arg3[%c0_8, %c0_9, %c0_10], %20 {strides = array<i32>} : memref<1x32x159xf32, #tpu.memory_space<vmem>>, vector<1x32x159xf32>,
    return
  }
  func.func @transform_0(%arg0: i32) -> (i32, i32, i32) {
    %c0_i32 = arith.constant 0 : i32
    %c0_i32_0 = arith.constant 0 : i32
    %c0_i32_1 = arith.constant 0 : i32
    return %arg0, %c0_i32, %c0_i32_0 : i32, i32, i32
  }
  func.func @transform_1(%arg0: i32) -> (i32, i32) {
    %c0_i32 = arith.constant 0 : i32
    %c0_i32_0 = arith.constant 0 : i32
    %c0_i32_1 = arith.constant 0 : i32
    return %c0_i32, %c0_i32_0 : i32, i32
  }
  func.func @transform_2(%arg0: i32) -> (i32, i32, i32) {
    %c0_i32 = arith.constant 0 : i32
    %c0_i32_0 = arith.constant 0 : i32
    %c0_i32_1 = arith.constant 0 : i32
    return %arg0, %c0_i32, %c0_i32_0 : i32, i32, i32
  }
}

module attributes {stable_mosaic.version = 11 : i64} {
  func.func @_conv_gelu_kernel(%arg0: i32, %arg1: memref<1x96x79xf32, #tpu.memory_space<vmem>>, %arg2: memref<32x96xbf16, #tpu.memory_space<vmem>>, %arg3: memref<1x32x79xf32, #tpu.memory_space<vmem>>) attributes {dimension_semantics = [#tpu.dimension_semantics<parallel>], iteration_bounds = array<i64: 2>, scalar_prefetch = 0 : i64, scratch_operands = 0 : i64, tpu.core_type = #tpu.core_type<tc>, window_params = [{transform_indices = @transform_0, window_bounds = array<i64: 1, 96, 79>}, {pipeline_mode = #tpu.pipeline_mode<synchronous>, transform_indices = @transform_1, window_bounds = array<i64: 32, 96>}, {transform_indices = @transform_2, window_bounds = array<i64: 1, 32, 79>}]} {
    %c0 = arith.constant 0 : index
    %c0_0 = arith.constant 0 : index
    %0 = vector.load %arg2[%c0, %c0_0] : memref<32x96xbf16, #tpu.memory_space<vmem>>, vector<32x96xbf16>
    %c0_1 = arith.constant 0 : index
    %c0_2 = arith.constant 0 : index
    %c0_3 = arith.constant 0 : index
    %1 = vector.load %arg1[%c0_1, %c0_2, %c0_3] : memref<1x96x79xf32, #tpu.memory_space<vmem>>, vector<1x96x79xf32>
    %2 = vector.shape_cast %1 : vector<1x96x79xf32> to vector<96x79xf32>
    %3 = arith.truncf %2 : vector<96x79xf32> to vector<96x79xbf16>
    %cst = arith.constant dense<0.000000e+00> : vector<32x79xf32>
    %4 = tpu.matmul %0, %3, %cst {dimension_numbers = #tpu.dot_dimension_numbers<[1], [0], [0], [1], [0, 0, 1, 1], [], []>} : vector<32x96xbf16>, vector<96x79xbf16>, vector<32x79xf32> -> vector<32x79xf32>
    %5 = arith.mulf %4, %4 : vector<32x79xf32>
    %6 = arith.mulf %4, %5 : vector<32x79xf32>
    %cst_4 = arith.constant 4.471500e-02 : f32
    %7 = vector.broadcast %cst_4 : f32 to vector<32x79xf32>
    %8 = arith.mulf %7, %6 : vector<32x79xf32>
    %9 = arith.addf %4, %8 : vector<32x79xf32>
    %cst_5 = arith.constant 0.797884583 : f32
    %10 = vector.broadcast %cst_5 : f32 to vector<32x79xf32>
    %11 = arith.mulf %10, %9 : vector<32x79xf32>
    %12 = math.tanh %11 : vector<32x79xf32>
    %cst_6 = arith.constant 1.000000e+00 : f32
    %13 = vector.broadcast %cst_6 : f32 to vector<32x79xf32>
    %14 = arith.addf %13, %12 : vector<32x79xf32>
    %cst_7 = arith.constant 5.000000e-01 : f32
    %15 = vector.broadcast %cst_7 : f32 to vector<32x79xf32>
    %16 = arith.mulf %15, %14 : vector<32x79xf32>
    %17 = arith.mulf %4, %16 : vector<32x79xf32>
    %c0_8 = arith.constant 0 : index
    %c0_9 = arith.constant 0 : index
    %c0_10 = arith.constant 0 : index
    %18 = vector.load %arg3[%c0_8, %c0_9, %c0_10] : memref<1x32x79xf32, #tpu.memory_space<vmem>>, vector<1x32x79xf32>
    %19 = vector.shape_cast %18 : vector<1x32x79xf32> to vector<32x79xf32>
    %20 = vector.shape_cast %17 : vector<32x79xf32> to vector<1x32x79xf32>
    tpu.vector_store %arg3[%c0_8, %c0_9, %c0_10], %20 {strides = array<i32>} : memref<1x32x79xf32, #tpu.memory_space<vmem>>, vector<1x32x79xf32>,
    return
  }
  func.func @transform_0(%arg0: i32) -> (i32, i32, i32) {
    %c0_i32 = arith.constant 0 : i32
    %c0_i32_0 = arith.constant 0 : i32
    %c0_i32_1 = arith.constant 0 : i32
    return %arg0, %c0_i32, %c0_i32_0 : i32, i32, i32
  }
  func.func @transform_1(%arg0: i32) -> (i32, i32) {
    %c0_i32 = arith.constant 0 : i32
    %c0_i32_0 = arith.constant 0 : i32
    %c0_i32_1 = arith.constant 0 : i32
    return %c0_i32, %c0_i32_0 : i32, i32
  }
  func.func @transform_2(%arg0: i32) -> (i32, i32, i32) {
    %c0_i32 = arith.constant 0 : i32
    %c0_i32_0 = arith.constant 0 : i32
    %c0_i32_1 = arith.constant 0 : i32
    return %arg0, %c0_i32, %c0_i32_0 : i32, i32, i32
  }
}

module attributes {stable_mosaic.version = 11 : i64} {
  func.func @_conv_gelu_kernel(%arg0: i32, %arg1: memref<1x96x39xf32, #tpu.memory_space<vmem>>, %arg2: memref<32x96xbf16, #tpu.memory_space<vmem>>, %arg3: memref<1x32x39xf32, #tpu.memory_space<vmem>>) attributes {dimension_semantics = [#tpu.dimension_semantics<parallel>], iteration_bounds = array<i64: 2>, scalar_prefetch = 0 : i64, scratch_operands = 0 : i64, tpu.core_type = #tpu.core_type<tc>, window_params = [{transform_indices = @transform_0, window_bounds = array<i64: 1, 96, 39>}, {pipeline_mode = #tpu.pipeline_mode<synchronous>, transform_indices = @transform_1, window_bounds = array<i64: 32, 96>}, {transform_indices = @transform_2, window_bounds = array<i64: 1, 32, 39>}]} {
    %c0 = arith.constant 0 : index
    %c0_0 = arith.constant 0 : index
    %0 = vector.load %arg2[%c0, %c0_0] : memref<32x96xbf16, #tpu.memory_space<vmem>>, vector<32x96xbf16>
    %c0_1 = arith.constant 0 : index
    %c0_2 = arith.constant 0 : index
    %c0_3 = arith.constant 0 : index
    %1 = vector.load %arg1[%c0_1, %c0_2, %c0_3] : memref<1x96x39xf32, #tpu.memory_space<vmem>>, vector<1x96x39xf32>
    %2 = vector.shape_cast %1 : vector<1x96x39xf32> to vector<96x39xf32>
    %3 = arith.truncf %2 : vector<96x39xf32> to vector<96x39xbf16>
    %cst = arith.constant dense<0.000000e+00> : vector<32x39xf32>
    %4 = tpu.matmul %0, %3, %cst {dimension_numbers = #tpu.dot_dimension_numbers<[1], [0], [0], [1], [0, 0, 1, 1], [], []>} : vector<32x96xbf16>, vector<96x39xbf16>, vector<32x39xf32> -> vector<32x39xf32>
    %5 = arith.mulf %4, %4 : vector<32x39xf32>
    %6 = arith.mulf %4, %5 : vector<32x39xf32>
    %cst_4 = arith.constant 4.471500e-02 : f32
    %7 = vector.broadcast %cst_4 : f32 to vector<32x39xf32>
    %8 = arith.mulf %7, %6 : vector<32x39xf32>
    %9 = arith.addf %4, %8 : vector<32x39xf32>
    %cst_5 = arith.constant 0.797884583 : f32
    %10 = vector.broadcast %cst_5 : f32 to vector<32x39xf32>
    %11 = arith.mulf %10, %9 : vector<32x39xf32>
    %12 = math.tanh %11 : vector<32x39xf32>
    %cst_6 = arith.constant 1.000000e+00 : f32
    %13 = vector.broadcast %cst_6 : f32 to vector<32x39xf32>
    %14 = arith.addf %13, %12 : vector<32x39xf32>
    %cst_7 = arith.constant 5.000000e-01 : f32
    %15 = vector.broadcast %cst_7 : f32 to vector<32x39xf32>
    %16 = arith.mulf %15, %14 : vector<32x39xf32>
    %17 = arith.mulf %4, %16 : vector<32x39xf32>
    %c0_8 = arith.constant 0 : index
    %c0_9 = arith.constant 0 : index
    %c0_10 = arith.constant 0 : index
    %18 = vector.load %arg3[%c0_8, %c0_9, %c0_10] : memref<1x32x39xf32, #tpu.memory_space<vmem>>, vector<1x32x39xf32>
    %19 = vector.shape_cast %18 : vector<1x32x39xf32> to vector<32x39xf32>
    %20 = vector.shape_cast %17 : vector<32x39xf32> to vector<1x32x39xf32>
    tpu.vector_store %arg3[%c0_8, %c0_9, %c0_10], %20 {strides = array<i32>} : memref<1x32x39xf32, #tpu.memory_space<vmem>>, vector<1x32x39xf32>,
    return
  }
  func.func @transform_0(%arg0: i32) -> (i32, i32, i32) {
    %c0_i32 = arith.constant 0 : i32
    %c0_i32_0 = arith.constant 0 : i32
    %c0_i32_1 = arith.constant 0 : i32
    return %arg0, %c0_i32, %c0_i32_0 : i32, i32, i32
  }
  func.func @transform_1(%arg0: i32) -> (i32, i32) {
    %c0_i32 = arith.constant 0 : i32
    %c0_i32_0 = arith.constant 0 : i32
    %c0_i32_1 = arith.constant 0 : i32
    return %c0_i32, %c0_i32_0 : i32, i32
  }
  func.func @transform_2(%arg0: i32) -> (i32, i32, i32) {
    %c0_i32 = arith.constant 0 : i32
    %c0_i32_0 = arith.constant 0 : i32
    %c0_i32_1 = arith.constant 0 : i32
    return %arg0, %c0_i32, %c0_i32_0 : i32, i32, i32
  }
}

module attributes {stable_mosaic.version = 11 : i64} {
  func.func @_conv_gelu_kernel(%arg0: i32, %arg1: memref<1x64x19xf32, #tpu.memory_space<vmem>>, %arg2: memref<32x64xbf16, #tpu.memory_space<vmem>>, %arg3: memref<1x32x19xf32, #tpu.memory_space<vmem>>) attributes {dimension_semantics = [#tpu.dimension_semantics<parallel>], iteration_bounds = array<i64: 2>, scalar_prefetch = 0 : i64, scratch_operands = 0 : i64, tpu.core_type = #tpu.core_type<tc>, window_params = [{transform_indices = @transform_0, window_bounds = array<i64: 1, 64, 19>}, {pipeline_mode = #tpu.pipeline_mode<synchronous>, transform_indices = @transform_1, window_bounds = array<i64: 32, 64>}, {transform_indices = @transform_2, window_bounds = array<i64: 1, 32, 19>}]} {
    %c0 = arith.constant 0 : index
    %c0_0 = arith.constant 0 : index
    %0 = vector.load %arg2[%c0, %c0_0] : memref<32x64xbf16, #tpu.memory_space<vmem>>, vector<32x64xbf16>
    %c0_1 = arith.constant 0 : index
    %c0_2 = arith.constant 0 : index
    %c0_3 = arith.constant 0 : index
    %1 = vector.load %arg1[%c0_1, %c0_2, %c0_3] : memref<1x64x19xf32, #tpu.memory_space<vmem>>, vector<1x64x19xf32>
    %2 = vector.shape_cast %1 : vector<1x64x19xf32> to vector<64x19xf32>
    %3 = arith.truncf %2 : vector<64x19xf32> to vector<64x19xbf16>
    %cst = arith.constant dense<0.000000e+00> : vector<32x19xf32>
    %4 = tpu.matmul %0, %3, %cst {dimension_numbers = #tpu.dot_dimension_numbers<[1], [0], [0], [1], [0, 0, 1, 1], [], []>} : vector<32x64xbf16>, vector<64x19xbf16>, vector<32x19xf32> -> vector<32x19xf32>
    %5 = arith.mulf %4, %4 : vector<32x19xf32>
    %6 = arith.mulf %4, %5 : vector<32x19xf32>
    %cst_4 = arith.constant 4.471500e-02 : f32
    %7 = vector.broadcast %cst_4 : f32 to vector<32x19xf32>
    %8 = arith.mulf %7, %6 : vector<32x19xf32>
    %9 = arith.addf %4, %8 : vector<32x19xf32>
    %cst_5 = arith.constant 0.797884583 : f32
    %10 = vector.broadcast %cst_5 : f32 to vector<32x19xf32>
    %11 = arith.mulf %10, %9 : vector<32x19xf32>
    %12 = math.tanh %11 : vector<32x19xf32>
    %cst_6 = arith.constant 1.000000e+00 : f32
    %13 = vector.broadcast %cst_6 : f32 to vector<32x19xf32>
    %14 = arith.addf %13, %12 : vector<32x19xf32>
    %cst_7 = arith.constant 5.000000e-01 : f32
    %15 = vector.broadcast %cst_7 : f32 to vector<32x19xf32>
    %16 = arith.mulf %15, %14 : vector<32x19xf32>
    %17 = arith.mulf %4, %16 : vector<32x19xf32>
    %c0_8 = arith.constant 0 : index
    %c0_9 = arith.constant 0 : index
    %c0_10 = arith.constant 0 : index
    %18 = vector.load %arg3[%c0_8, %c0_9, %c0_10] : memref<1x32x19xf32, #tpu.memory_space<vmem>>, vector<1x32x19xf32>
    %19 = vector.shape_cast %18 : vector<1x32x19xf32> to vector<32x19xf32>
    %20 = vector.shape_cast %17 : vector<32x19xf32> to vector<1x32x19xf32>
    tpu.vector_store %arg3[%c0_8, %c0_9, %c0_10], %20 {strides = array<i32>} : memref<1x32x19xf32, #tpu.memory_space<vmem>>, vector<1x32x19xf32>,
    return
  }
  func.func @transform_0(%arg0: i32) -> (i32, i32, i32) {
    %c0_i32 = arith.constant 0 : i32
    %c0_i32_0 = arith.constant 0 : i32
    %c0_i32_1 = arith.constant 0 : i32
    return %arg0, %c0_i32, %c0_i32_0 : i32, i32, i32
  }
  func.func @transform_1(%arg0: i32) -> (i32, i32) {
    %c0_i32 = arith.constant 0 : i32
    %c0_i32_0 = arith.constant 0 : i32
    %c0_i32_1 = arith.constant 0 : i32
    return %c0_i32, %c0_i32_0 : i32, i32
  }
  func.func @transform_2(%arg0: i32) -> (i32, i32, i32) {
    %c0_i32 = arith.constant 0 : i32
    %c0_i32_0 = arith.constant 0 : i32
    %c0_i32_1 = arith.constant 0 : i32
    return %arg0, %c0_i32, %c0_i32_0 : i32, i32, i32
  }
}

module attributes {stable_mosaic.version = 11 : i64} {
  func.func @_conv_gelu_kernel(%arg0: i32, %arg1: memref<1x64x9xf32, #tpu.memory_space<vmem>>, %arg2: memref<32x64xbf16, #tpu.memory_space<vmem>>, %arg3: memref<1x32x9xf32, #tpu.memory_space<vmem>>) attributes {dimension_semantics = [#tpu.dimension_semantics<parallel>], iteration_bounds = array<i64: 2>, scalar_prefetch = 0 : i64, scratch_operands = 0 : i64, tpu.core_type = #tpu.core_type<tc>, window_params = [{transform_indices = @transform_0, window_bounds = array<i64: 1, 64, 9>}, {pipeline_mode = #tpu.pipeline_mode<synchronous>, transform_indices = @transform_1, window_bounds = array<i64: 32, 64>}, {transform_indices = @transform_2, window_bounds = array<i64: 1, 32, 9>}]} {
    %c0 = arith.constant 0 : index
    %c0_0 = arith.constant 0 : index
    %0 = vector.load %arg2[%c0, %c0_0] : memref<32x64xbf16, #tpu.memory_space<vmem>>, vector<32x64xbf16>
    %c0_1 = arith.constant 0 : index
    %c0_2 = arith.constant 0 : index
    %c0_3 = arith.constant 0 : index
    %1 = vector.load %arg1[%c0_1, %c0_2, %c0_3] : memref<1x64x9xf32, #tpu.memory_space<vmem>>, vector<1x64x9xf32>
    %2 = vector.shape_cast %1 : vector<1x64x9xf32> to vector<64x9xf32>
    %3 = arith.truncf %2 : vector<64x9xf32> to vector<64x9xbf16>
    %cst = arith.constant dense<0.000000e+00> : vector<32x9xf32>
    %4 = tpu.matmul %0, %3, %cst {dimension_numbers = #tpu.dot_dimension_numbers<[1], [0], [0], [1], [0, 0, 1, 1], [], []>} : vector<32x64xbf16>, vector<64x9xbf16>, vector<32x9xf32> -> vector<32x9xf32>
    %5 = arith.mulf %4, %4 : vector<32x9xf32>
    %6 = arith.mulf %4, %5 : vector<32x9xf32>
    %cst_4 = arith.constant 4.471500e-02 : f32
    %7 = vector.broadcast %cst_4 : f32 to vector<32x9xf32>
    %8 = arith.mulf %7, %6 : vector<32x9xf32>
    %9 = arith.addf %4, %8 : vector<32x9xf32>
    %cst_5 = arith.constant 0.797884583 : f32
    %10 = vector.broadcast %cst_5 : f32 to vector<32x9xf32>
    %11 = arith.mulf %10, %9 : vector<32x9xf32>
    %12 = math.tanh %11 : vector<32x9xf32>
    %cst_6 = arith.constant 1.000000e+00 : f32
    %13 = vector.broadcast %cst_6 : f32 to vector<32x9xf32>
    %14 = arith.addf %13, %12 : vector<32x9xf32>
    %cst_7 = arith.constant 5.000000e-01 : f32
    %15 = vector.broadcast %cst_7 : f32 to vector<32x9xf32>
    %16 = arith.mulf %15, %14 : vector<32x9xf32>
    %17 = arith.mulf %4, %16 : vector<32x9xf32>
    %c0_8 = arith.constant 0 : index
    %c0_9 = arith.constant 0 : index
    %c0_10 = arith.constant 0 : index
    %18 = vector.load %arg3[%c0_8, %c0_9, %c0_10] : memref<1x32x9xf32, #tpu.memory_space<vmem>>, vector<1x32x9xf32>
    %19 = vector.shape_cast %18 : vector<1x32x9xf32> to vector<32x9xf32>
    %20 = vector.shape_cast %17 : vector<32x9xf32> to vector<1x32x9xf32>
    tpu.vector_store %arg3[%c0_8, %c0_9, %c0_10], %20 {strides = array<i32>} : memref<1x32x9xf32, #tpu.memory_space<vmem>>, vector<1x32x9xf32>,
    return
  }
  func.func @transform_0(%arg0: i32) -> (i32, i32, i32) {
    %c0_i32 = arith.constant 0 : i32
    %c0_i32_0 = arith.constant 0 : i32
    %c0_i32_1 = arith.constant 0 : i32
    return %arg0, %c0_i32, %c0_i32_0 : i32, i32, i32
  }
  func.func @transform_1(%arg0: i32) -> (i32, i32) {
    %c0_i32 = arith.constant 0 : i32
    %c0_i32_0 = arith.constant 0 : i32
    %c0_i32_1 = arith.constant 0 : i32
    return %c0_i32, %c0_i32_0 : i32, i32
  }
  func.func @transform_2(%arg0: i32) -> (i32, i32, i32) {
    %c0_i32 = arith.constant 0 : i32
    %c0_i32_0 = arith.constant 0 : i32
    %c0_i32_1 = arith.constant 0 : i32
    return %arg0, %c0_i32, %c0_i32_0 : i32, i32, i32
  }
}

module attributes {stable_mosaic.version = 11 : i64} {
  func.func @_encoder_head_kernel(%arg0: i32, %arg1: memref<1x9x32xf32, #tpu.memory_space<vmem>>, %arg2: memref<1x32xf32, #tpu.memory_space<vmem>>, %arg3: memref<1x32xf32, #tpu.memory_space<vmem>>, %arg4: memref<32x32xbf16, #tpu.memory_space<vmem>>, %arg5: memref<1x32xf32, #tpu.memory_space<vmem>>, %arg6: memref<4x32x32xbf16, #tpu.memory_space<vmem>>, %arg7: memref<1x32xf32, #tpu.memory_space<vmem>>, %arg8: memref<1x32xf32, #tpu.memory_space<vmem>>, %arg9: memref<1x32xf32, #tpu.memory_space<vmem>>, %arg10: memref<2x32x96xbf16, #tpu.memory_space<vmem>>, %arg11: memref<2x1x96xf32, #tpu.memory_space<vmem>>, %arg12: memref<2x32x32xbf16, #tpu.memory_space<vmem>>, %arg13: memref<2x1x32xf32, #tpu.memory_space<vmem>>, %arg14: memref<2x1x32xf32, #tpu.memory_space<vmem>>, %arg15: memref<2x1x32xf32, #tpu.memory_space<vmem>>, %arg16: memref<2x32x128xbf16, #tpu.memory_space<vmem>>, %arg17: memref<2x1x128xf32, #tpu.memory_space<vmem>>, %arg18: memref<2x128x32xbf16, #tpu.memory_space<vmem>>, %arg19: memref<2x1x32xf32, #tpu.memory_space<vmem>>, %arg20: memref<2x1x32xf32, #tpu.memory_space<vmem>>, %arg21: memref<2x1x32xf32, #tpu.memory_space<vmem>>, %arg22: memref<32x32xbf16, #tpu.memory_space<vmem>>, %arg23: memref<1x32xf32, #tpu.memory_space<vmem>>, %arg24: memref<32x512xbf16, #tpu.memory_space<vmem>>, %arg25: memref<1x512xf32, #tpu.memory_space<vmem>>, %arg26: memref<1x512xf32, #tpu.memory_space<vmem>>, %arg27: memref<1x512xf32, #tpu.memory_space<vmem>>, %arg28: memref<512x256xbf16, #tpu.memory_space<vmem>>, %arg29: memref<1x256xf32, #tpu.memory_space<vmem>>, %arg30: memref<1x256xf32, #tpu.memory_space<vmem>>, %arg31: memref<1x256xf32, #tpu.memory_space<vmem>>, %arg32: memref<256x8xbf16, #tpu.memory_space<vmem>>, %arg33: memref<1x8xf32, #tpu.memory_space<vmem>>, %arg34: memref<1x1x8xf32, #tpu.memory_space<vmem>>) attributes {dimension_semantics = [#tpu.dimension_semantics<parallel>], iteration_bounds = array<i64: 2>, scalar_prefetch = 0 : i64, scratch_operands = 0 : i64, tpu.core_type = #tpu.core_type<tc>, window_params = [{transform_indices = @transform_0, window_bounds = array<i64: 1, 9, 32>}, {pipeline_mode = #tpu.pipeline_mode<synchronous>, transform_indices = @transform_1, window_bounds = array<i64: 1, 32>}, {pipeline_mode = #tpu.pipeline_mode<synchronous>, transform_indices = @transform_2, window_bounds = array<i64: 1, 32>}, {pipeline_mode = #tpu.pipeline_mode<synchronous>, transform_indices = @transform_3, window_bounds = array<i64: 32, 32>}, {pipeline_mode = #tpu.pipeline_mode<synchronous>, transform_indices = @transform_4, window_bounds = array<i64: 1, 32>}, {pipeline_mode = #tpu.pipeline_mode<synchronous>, transform_indices = @transform_5, window_bounds = array<i64: 4, 32, 32>}, {pipeline_mode = #tpu.pipeline_mode<synchronous>, transform_indices = @transform_6, window_bounds = array<i64: 1, 32>}, {pipeline_mode = #tpu.pipeline_mode<synchronous>, transform_indices = @transform_7, window_bounds = array<i64: 1, 32>}, {pipeline_mode = #tpu.pipeline_mode<synchronous>, transform_indices = @transform_8, window_bounds = array<i64: 1, 32>}, {pipeline_mode = #tpu.pipeline_mode<synchronous>, transform_indices = @transform_9, window_bounds = array<i64: 2, 32, 96>}, {pipeline_mode = #tpu.pipeline_mode<synchronous>, transform_indices = @transform_10, window_bounds = array<i64: 2, 1, 96>}, {pipeline_mode = #tpu.pipeline_mode<synchronous>, transform_indices = @transform_11, window_bounds = array<i64: 2, 32, 32>}, {pipeline_mode = #tpu.pipeline_mode<synchronous>, transform_indices = @transform_12, window_bounds = array<i64: 2, 1, 32>}, {pipeline_mode = #tpu.pipeline_mode<synchronous>, transform_indices = @transform_13, window_bounds = array<i64: 2, 1, 32>}, {pipeline_mode = #tpu.pipeline_mode<synchronous>, transform_indices = @transform_14, window_bounds = array<i64: 2, 1, 32>}, {pipeline_mode = #tpu.pipeline_mode<synchronous>, transform_indices = @transform_15, window_bounds = array<i64: 2, 32, 128>}, {pipeline_mode = #tpu.pipeline_mode<synchronous>, transform_indices = @transform_16, window_bounds = array<i64: 2, 1, 128>}, {pipeline_mode = #tpu.pipeline_mode<synchronous>, transform_indices = @transform_17, window_bounds = array<i64: 2, 128, 32>}, {pipeline_mode = #tpu.pipeline_mode<synchronous>, transform_indices = @transform_18, window_bounds = array<i64: 2, 1, 32>}, {pipeline_mode = #tpu.pipeline_mode<synchronous>, transform_indices = @transform_19, window_bounds = array<i64: 2, 1, 32>}, {pipeline_mode = #tpu.pipeline_mode<synchronous>, transform_indices = @transform_20, window_bounds = array<i64: 2, 1, 32>}, {pipeline_mode = #tpu.pipeline_mode<synchronous>, transform_indices = @transform_21, window_bounds = array<i64: 32, 32>}, {pipeline_mode = #tpu.pipeline_mode<synchronous>, transform_indices = @transform_22, window_bounds = array<i64: 1, 32>}, {pipeline_mode = #tpu.pipeline_mode<synchronous>, transform_indices = @transform_23, window_bounds = array<i64: 32, 512>}, {pipeline_mode = #tpu.pipeline_mode<synchronous>, transform_indices = @transform_24, window_bounds = array<i64: 1, 512>}, {pipeline_mode = #tpu.pipeline_mode<synchronous>, transform_indices = @transform_25, window_bounds = array<i64: 1, 512>}, {pipeline_mode = #tpu.pipeline_mode<synchronous>, transform_indices = @transform_26, window_bounds = array<i64: 1, 512>}, {pipeline_mode = #tpu.pipeline_mode<synchronous>, transform_indices = @transform_27, window_bounds = array<i64: 512, 256>}, {pipeline_mode = #tpu.pipeline_mode<synchronous>, transform_indices = @transform_28, window_bounds = array<i64: 1, 256>}, {pipeline_mode = #tpu.pipeline_mode<synchronous>, transform_indices = @transform_29, window_bounds = array<i64: 1, 256>}, {pipeline_mode = #tpu.pipeline_mode<synchronous>, transform_indices = @transform_30, window_bounds = array<i64: 1, 256>}, {pipeline_mode = #tpu.pipeline_mode<synchronous>, transform_indices = @transform_31, window_bounds = array<i64: 256, 8>}, {pipeline_mode = #tpu.pipeline_mode<synchronous>, transform_indices = @transform_32, window_bounds = array<i64: 1, 8>}, {transform_indices = @transform_33, window_bounds = array<i64: 1, 1, 8>}]} {
    %c0 = arith.constant 0 : index
    %c0_0 = arith.constant 0 : index
    %c0_1 = arith.constant 0 : index
    %0 = vector.load %arg1[%c0, %c0_0, %c0_1] : memref<1x9x32xf32, #tpu.memory_space<vmem>>, vector<1x9x32xf32>
    %1 = vector.shape_cast %0 : vector<1x9x32xf32> to vector<9x32xf32>
    %c0_2 = arith.constant 0 : index
    %c0_3 = arith.constant 0 : index
    %2 = vector.load %arg2[%c0_2, %c0_3] : memref<1x32xf32, #tpu.memory_space<vmem>>, vector<1x32xf32>
    %c0_4 = arith.constant 0 : index
    %c0_5 = arith.constant 0 : index
    %3 = vector.load %arg3[%c0_4, %c0_5] : memref<1x32xf32, #tpu.memory_space<vmem>>, vector<1x32xf32>
    %cst = arith.constant dense<0.000000e+00> : vector<9xf32>
    %4 = vector.multi_reduction <add>, %1, %cst [1] : vector<9x32xf32> to vector<9xf32>
    %5 = vector.shape_cast %4 : vector<9xf32> to vector<9x1xf32>
    %cst_6 = arith.constant 3.200000e+01 : f32
    %6 = vector.broadcast %cst_6 : f32 to vector<9x1xf32>
    %7 = arith.divf %5, %6 : vector<9x1xf32>
    %8 = vector.broadcast %7 : vector<9x1xf32> to vector<9x32xf32>
    %9 = arith.subf %1, %8 : vector<9x32xf32>
    %10 = arith.mulf %9, %9 : vector<9x32xf32>
    %cst_7 = arith.constant dense<0.000000e+00> : vector<9xf32>
    %11 = vector.multi_reduction <add>, %10, %cst_7 [1] : vector<9x32xf32> to vector<9xf32>
    %12 = vector.shape_cast %11 : vector<9xf32> to vector<9x1xf32>
    %cst_8 = arith.constant 3.200000e+01 : f32
    %13 = vector.broadcast %cst_8 : f32 to vector<9x1xf32>
    %14 = arith.divf %12, %13 : vector<9x1xf32>
    %15 = vector.broadcast %7 : vector<9x1xf32> to vector<9x32xf32>
    %16 = arith.subf %1, %15 : vector<9x32xf32>
    %cst_9 = arith.constant 9.99999974E-6 : f32
    %17 = vector.broadcast %cst_9 : f32 to vector<9x1xf32>
    %18 = arith.addf %14, %17 : vector<9x1xf32>
    %19 = math.rsqrt %18 : vector<9x1xf32>
    %20 = vector.broadcast %19 : vector<9x1xf32> to vector<9x32xf32>
    %21 = arith.mulf %16, %20 : vector<9x32xf32>
    %22 = vector.broadcast %2 : vector<1x32xf32> to vector<9x32xf32>
    %23 = arith.mulf %21, %22 : vector<9x32xf32>
    %24 = vector.broadcast %3 : vector<1x32xf32> to vector<9x32xf32>
    %25 = arith.addf %23, %24 : vector<9x32xf32>
    %c0_10 = arith.constant 0 : index
    %c0_11 = arith.constant 0 : index
    %26 = vector.load %arg4[%c0_10, %c0_11] : memref<32x32xbf16, #tpu.memory_space<vmem>>, vector<32x32xbf16>
    %27 = arith.truncf %25 : vector<9x32xf32> to vector<9x32xbf16>
    %cst_12 = arith.constant dense<0.000000e+00> : vector<9x32xf32>
    %28 = tpu.matmul %27, %26, %cst_12 {dimension_numbers = #tpu.dot_dimension_numbers<[1], [0], [0], [1], [0, 0, 1, 1], [], []>} : vector<9x32xbf16>, vector<32x32xbf16>, vector<9x32xf32> -> vector<9x32xf32>
    %c0_13 = arith.constant 0 : index
    %c0_14 = arith.constant 0 : index
    %29 = vector.load %arg5[%c0_13, %c0_14] : memref<1x32xf32, #tpu.memory_space<vmem>>, vector<1x32xf32>
    %30 = vector.broadcast %29 : vector<1x32xf32> to vector<9x32xf32>
    %31 = arith.addf %28, %30 : vector<9x32xf32>
    %cst_15 = arith.constant 0.000000e+00 : f32
    %32 = vector.broadcast %cst_15 : f32 to vector<2x32xf32>
    %33 = tpu.concatenate %32, %31, %32 in 0 : vector<2x32xf32>, vector<9x32xf32>, vector<2x32xf32> -> vector<13x32xf32>
    %cst_16 = arith.constant 0.000000e+00 : f32
    %34 = vector.broadcast %cst_16 : f32 to vector<9x32xf32>
    %35 = vector.extract_strided_slice %33 {offsets = [0, 0], sizes = [9, 32], strides = [1, 1]} : vector<13x32xf32> to vector<9x32xf32>
    %c0_17 = arith.constant 0 : index
    %c0_18 = arith.constant 0 : index
    %c0_19 = arith.constant 0 : index
    %36 = vector.load %arg6[%c0_17, %c0_18, %c0_19] : memref<4x32x32xbf16, #tpu.memory_space<vmem>>, vector<1x32x32xbf16>
    %37 = vector.shape_cast %36 : vector<1x32x32xbf16> to vector<32x32xbf16>
    %38 = arith.truncf %35 : vector<9x32xf32> to vector<9x32xbf16>
    %cst_20 = arith.constant dense<0.000000e+00> : vector<9x32xf32>
    %39 = tpu.matmul %38, %37, %cst_20 {dimension_numbers = #tpu.dot_dimension_numbers<[1], [0], [0], [1], [0, 0, 1, 1], [], []>} : vector<9x32xbf16>, vector<32x32xbf16>, vector<9x32xf32> -> vector<9x32xf32>
    %40 = arith.addf %34, %39 : vector<9x32xf32>
    %41 = vector.extract_strided_slice %33 {offsets = [1, 0], sizes = [9, 32], strides = [1, 1]} : vector<13x32xf32> to vector<9x32xf32>
    %c1 = arith.constant 1 : index
    %c0_21 = arith.constant 0 : index
    %c0_22 = arith.constant 0 : index
    %42 = vector.load %arg6[%c1, %c0_21, %c0_22] : memref<4x32x32xbf16, #tpu.memory_space<vmem>>, vector<1x32x32xbf16>
    %43 = vector.shape_cast %42 : vector<1x32x32xbf16> to vector<32x32xbf16>
    %44 = arith.truncf %41 : vector<9x32xf32> to vector<9x32xbf16>
    %cst_23 = arith.constant dense<0.000000e+00> : vector<9x32xf32>
    %45 = tpu.matmul %44, %43, %cst_23 {dimension_numbers = #tpu.dot_dimension_numbers<[1], [0], [0], [1], [0, 0, 1, 1], [], []>} : vector<9x32xbf16>, vector<32x32xbf16>, vector<9x32xf32> -> vector<9x32xf32>
    %46 = arith.addf %40, %45 : vector<9x32xf32>
    %47 = vector.extract_strided_slice %33 {offsets = [2, 0], sizes = [9, 32], strides = [1, 1]} : vector<13x32xf32> to vector<9x32xf32>
    %c2 = arith.constant 2 : index
    %c0_24 = arith.constant 0 : index
    %c0_25 = arith.constant 0 : index
    %48 = vector.load %arg6[%c2, %c0_24, %c0_25] : memref<4x32x32xbf16, #tpu.memory_space<vmem>>, vector<1x32x32xbf16>
    %49 = vector.shape_cast %48 : vector<1x32x32xbf16> to vector<32x32xbf16>
    %50 = arith.truncf %47 : vector<9x32xf32> to vector<9x32xbf16>
    %cst_26 = arith.constant dense<0.000000e+00> : vector<9x32xf32>
    %51 = tpu.matmul %50, %49, %cst_26 {dimension_numbers = #tpu.dot_dimension_numbers<[1], [0], [0], [1], [0, 0, 1, 1], [], []>} : vector<9x32xbf16>, vector<32x32xbf16>, vector<9x32xf32> -> vector<9x32xf32>
    %52 = arith.addf %46, %51 : vector<9x32xf32>
    %53 = vector.extract_strided_slice %33 {offsets = [3, 0], sizes = [9, 32], strides = [1, 1]} : vector<13x32xf32> to vector<9x32xf32>
    %c3 = arith.constant 3 : index
    %c0_27 = arith.constant 0 : index
    %c0_28 = arith.constant 0 : index
    %54 = vector.load %arg6[%c3, %c0_27, %c0_28] : memref<4x32x32xbf16, #tpu.memory_space<vmem>>, vector<1x32x32xbf16>
    %55 = vector.shape_cast %54 : vector<1x32x32xbf16> to vector<32x32xbf16>
    %56 = arith.truncf %53 : vector<9x32xf32> to vector<9x32xbf16>
    %cst_29 = arith.constant dense<0.000000e+00> : vector<9x32xf32>
    %57 = tpu.matmul %56, %55, %cst_29 {dimension_numbers = #tpu.dot_dimension_numbers<[1], [0], [0], [1], [0, 0, 1, 1], [], []>} : vector<9x32xbf16>, vector<32x32xbf16>, vector<9x32xf32> -> vector<9x32xf32>
    %58 = arith.addf %52, %57 : vector<9x32xf32>
    %c0_30 = arith.constant 0 : index
    %c0_31 = arith.constant 0 : index
    %59 = vector.load %arg7[%c0_30, %c0_31] : memref<1x32xf32, #tpu.memory_space<vmem>>, vector<1x32xf32>
    %60 = vector.broadcast %59 : vector<1x32xf32> to vector<9x32xf32>
    %61 = arith.addf %58, %60 : vector<9x32xf32>
    %62 = arith.mulf %61, %61 : vector<9x32xf32>
    %63 = arith.mulf %61, %62 : vector<9x32xf32>
    %cst_32 = arith.constant 4.471500e-02 : f32
    %64 = vector.broadcast %cst_32 : f32 to vector<9x32xf32>
    %65 = arith.mulf %64, %63 : vector<9x32xf32>
    %66 = arith.addf %61, %65 : vector<9x32xf32>
    %cst_33 = arith.constant 0.797884583 : f32
    %67 = vector.broadcast %cst_33 : f32 to vector<9x32xf32>
    %68 = arith.mulf %67, %66 : vector<9x32xf32>
    %69 = math.tanh %68 : vector<9x32xf32>
    %cst_34 = arith.constant 1.000000e+00 : f32
    %70 = vector.broadcast %cst_34 : f32 to vector<9x32xf32>
    %71 = arith.addf %70, %69 : vector<9x32xf32>
    %cst_35 = arith.constant 5.000000e-01 : f32
    %72 = vector.broadcast %cst_35 : f32 to vector<9x32xf32>
    %73 = arith.mulf %72, %71 : vector<9x32xf32>
    %74 = arith.mulf %61, %73 : vector<9x32xf32>
    %75 = arith.addf %31, %74 : vector<9x32xf32>
    %c0_36 = arith.constant 0 : index
    %c0_37 = arith.constant 0 : index
    %76 = vector.load %arg8[%c0_36, %c0_37] : memref<1x32xf32, #tpu.memory_space<vmem>>, vector<1x32xf32>
    %c0_38 = arith.constant 0 : index
    %c0_39 = arith.constant 0 : index
    %77 = vector.load %arg9[%c0_38, %c0_39] : memref<1x32xf32, #tpu.memory_space<vmem>>, vector<1x32xf32>
    %cst_40 = arith.constant dense<0.000000e+00> : vector<9xf32>
    %78 = vector.multi_reduction <add>, %75, %cst_40 [1] : vector<9x32xf32> to vector<9xf32>
    %79 = vector.shape_cast %78 : vector<9xf32> to vector<9x1xf32>
    %cst_41 = arith.constant 3.200000e+01 : f32
    %80 = vector.broadcast %cst_41 : f32 to vector<9x1xf32>
    %81 = arith.divf %79, %80 : vector<9x1xf32>
    %82 = vector.broadcast %81 : vector<9x1xf32> to vector<9x32xf32>
    %83 = arith.subf %75, %82 : vector<9x32xf32>
    %84 = arith.mulf %83, %83 : vector<9x32xf32>
    %cst_42 = arith.constant dense<0.000000e+00> : vector<9xf32>
    %85 = vector.multi_reduction <add>, %84, %cst_42 [1] : vector<9x32xf32> to vector<9xf32>
    %86 = vector.shape_cast %85 : vector<9xf32> to vector<9x1xf32>
    %cst_43 = arith.constant 3.200000e+01 : f32
    %87 = vector.broadcast %cst_43 : f32 to vector<9x1xf32>
    %88 = arith.divf %86, %87 : vector<9x1xf32>
    %89 = vector.broadcast %81 : vector<9x1xf32> to vector<9x32xf32>
    %90 = arith.subf %75, %89 : vector<9x32xf32>
    %cst_44 = arith.constant 9.99999974E-6 : f32
    %91 = vector.broadcast %cst_44 : f32 to vector<9x1xf32>
    %92 = arith.addf %88, %91 : vector<9x1xf32>
    %93 = math.rsqrt %92 : vector<9x1xf32>
    %94 = vector.broadcast %93 : vector<9x1xf32> to vector<9x32xf32>
    %95 = arith.mulf %90, %94 : vector<9x32xf32>
    %96 = vector.broadcast %76 : vector<1x32xf32> to vector<9x32xf32>
    %97 = arith.mulf %95, %96 : vector<9x32xf32>
    %98 = vector.broadcast %77 : vector<1x32xf32> to vector<9x32xf32>
    %99 = arith.addf %97, %98 : vector<9x32xf32>
    %c0_45 = arith.constant 0 : index
    %c0_46 = arith.constant 0 : index
    %c0_47 = arith.constant 0 : index
    %100 = vector.load %arg10[%c0_45, %c0_46, %c0_47] : memref<2x32x96xbf16, #tpu.memory_space<vmem>>, vector<1x32x96xbf16>
    %101 = vector.shape_cast %100 : vector<1x32x96xbf16> to vector<32x96xbf16>
    %102 = arith.truncf %99 : vector<9x32xf32> to vector<9x32xbf16>
    %cst_48 = arith.constant dense<0.000000e+00> : vector<9x96xf32>
    %103 = tpu.matmul %102, %101, %cst_48 {dimension_numbers = #tpu.dot_dimension_numbers<[1], [0], [0], [1], [0, 0, 1, 1], [], []>} : vector<9x32xbf16>, vector<32x96xbf16>, vector<9x96xf32> -> vector<9x96xf32>
    %c0_49 = arith.constant 0 : index
    %c0_50 = arith.constant 0 : index
    %c0_51 = arith.constant 0 : index
    %104 = vector.load %arg11[%c0_49, %c0_50, %c0_51] : memref<2x1x96xf32, #tpu.memory_space<vmem>>, vector<1x1x96xf32>
    %105 = vector.shape_cast %104 : vector<1x1x96xf32> to vector<1x96xf32>
    %106 = vector.broadcast %105 : vector<1x96xf32> to vector<9x96xf32>
    %107 = arith.addf %103, %106 : vector<9x96xf32>
    %108 = vector.extract_strided_slice %107 {offsets = [0, 0], sizes = [9, 32], strides = [1, 1]} : vector<9x96xf32> to vector<9x32xf32>
    %cst_52 = arith.constant 2.500000e-01 : f32
    %109 = vector.broadcast %cst_52 : f32 to vector<9x32xf32>
    %110 = arith.mulf %108, %109 : vector<9x32xf32>
    %111 = vector.extract_strided_slice %107 {offsets = [0, 32], sizes = [9, 32], strides = [1, 1]} : vector<9x96xf32> to vector<9x32xf32>
    %112 = vector.extract_strided_slice %107 {offsets = [0, 64], sizes = [9, 32], strides = [1, 1]} : vector<9x96xf32> to vector<9x32xf32>
    %113 = vector.extract_strided_slice %110 {offsets = [0, 0], sizes = [9, 16], strides = [1, 1]} : vector<9x32xf32> to vector<9x16xf32>
    %114 = vector.extract_strided_slice %111 {offsets = [0, 0], sizes = [9, 16], strides = [1, 1]} : vector<9x32xf32> to vector<9x16xf32>
    %115 = arith.truncf %113 : vector<9x16xf32> to vector<9x16xbf16>
    %116 = arith.truncf %114 : vector<9x16xf32> to vector<9x16xbf16>
    %cst_53 = arith.constant dense<0.000000e+00> : vector<9x9xf32>
    %117 = tpu.matmul %115, %116, %cst_53 {dimension_numbers = #tpu.dot_dimension_numbers<[1], [1], [0], [0], [0, 0, 1, 0], [], []>} : vector<9x16xbf16>, vector<9x16xbf16>, vector<9x9xf32> -> vector<9x9xf32>
    %cst_54 = arith.constant dense<0xFF800000> : vector<9xf32>
    %118 = vector.multi_reduction <maximumf>, %117, %cst_54 [1] : vector<9x9xf32> to vector<9xf32>
    %119 = vector.shape_cast %118 : vector<9xf32> to vector<9x1xf32>
    %120 = vector.broadcast %119 : vector<9x1xf32> to vector<9x9xf32>
    %121 = arith.subf %117, %120 : vector<9x9xf32>
    %122 = math.exp %121 : vector<9x9xf32>
    %cst_55 = arith.constant dense<0.000000e+00> : vector<9xf32>
    %123 = vector.multi_reduction <add>, %122, %cst_55 [1] : vector<9x9xf32> to vector<9xf32>
    %124 = vector.shape_cast %123 : vector<9xf32> to vector<9x1xf32>
    %125 = tpu.reciprocal %124 {approx = true} : vector<9x1xf32> -> vector<9x1xf32>
    %126 = vector.broadcast %125 : vector<9x1xf32> to vector<9x9xf32>
    %127 = arith.mulf %122, %126 : vector<9x9xf32>
    %128 = vector.extract_strided_slice %112 {offsets = [0, 0], sizes = [9, 16], strides = [1, 1]} : vector<9x32xf32> to vector<9x16xf32>
    %129 = arith.truncf %127 : vector<9x9xf32> to vector<9x9xbf16>
    %130 = arith.truncf %128 : vector<9x16xf32> to vector<9x16xbf16>
    %cst_56 = arith.constant dense<0.000000e+00> : vector<9x16xf32>
    %131 = tpu.matmul %129, %130, %cst_56 {dimension_numbers = #tpu.dot_dimension_numbers<[1], [0], [0], [1], [0, 0, 1, 1], [], []>} : vector<9x9xbf16>, vector<9x16xbf16>, vector<9x16xf32> -> vector<9x16xf32>
    %132 = vector.extract_strided_slice %110 {offsets = [0, 16], sizes = [9, 16], strides = [1, 1]} : vector<9x32xf32> to vector<9x16xf32>
    %133 = vector.extract_strided_slice %111 {offsets = [0, 16], sizes = [9, 16], strides = [1, 1]} : vector<9x32xf32> to vector<9x16xf32>
    %134 = arith.truncf %132 : vector<9x16xf32> to vector<9x16xbf16>
    %135 = arith.truncf %133 : vector<9x16xf32> to vector<9x16xbf16>
    %cst_57 = arith.constant dense<0.000000e+00> : vector<9x9xf32>
    %136 = tpu.matmul %134, %135, %cst_57 {dimension_numbers = #tpu.dot_dimension_numbers<[1], [1], [0], [0], [0, 0, 1, 0], [], []>} : vector<9x16xbf16>, vector<9x16xbf16>, vector<9x9xf32> -> vector<9x9xf32>
    %cst_58 = arith.constant dense<0xFF800000> : vector<9xf32>
    %137 = vector.multi_reduction <maximumf>, %136, %cst_58 [1] : vector<9x9xf32> to vector<9xf32>
    %138 = vector.shape_cast %137 : vector<9xf32> to vector<9x1xf32>
    %139 = vector.broadcast %138 : vector<9x1xf32> to vector<9x9xf32>
    %140 = arith.subf %136, %139 : vector<9x9xf32>
    %141 = math.exp %140 : vector<9x9xf32>
    %cst_59 = arith.constant dense<0.000000e+00> : vector<9xf32>
    %142 = vector.multi_reduction <add>, %141, %cst_59 [1] : vector<9x9xf32> to vector<9xf32>
    %143 = vector.shape_cast %142 : vector<9xf32> to vector<9x1xf32>
    %144 = tpu.reciprocal %143 {approx = true} : vector<9x1xf32> -> vector<9x1xf32>
    %145 = vector.broadcast %144 : vector<9x1xf32> to vector<9x9xf32>
    %146 = arith.mulf %141, %145 : vector<9x9xf32>
    %147 = vector.extract_strided_slice %112 {offsets = [0, 16], sizes = [9, 16], strides = [1, 1]} : vector<9x32xf32> to vector<9x16xf32>
    %148 = arith.truncf %146 : vector<9x9xf32> to vector<9x9xbf16>
    %149 = arith.truncf %147 : vector<9x16xf32> to vector<9x16xbf16>
    %cst_60 = arith.constant dense<0.000000e+00> : vector<9x16xf32>
    %150 = tpu.matmul %148, %149, %cst_60 {dimension_numbers = #tpu.dot_dimension_numbers<[1], [0], [0], [1], [0, 0, 1, 1], [], []>} : vector<9x9xbf16>, vector<9x16xbf16>, vector<9x16xf32> -> vector<9x16xf32>
    %151 = tpu.concatenate %131, %150 in 1 : vector<9x16xf32>, vector<9x16xf32> -> vector<9x32xf32>
    %c0_61 = arith.constant 0 : index
    %c0_62 = arith.constant 0 : index
    %c0_63 = arith.constant 0 : index
    %152 = vector.load %arg12[%c0_61, %c0_62, %c0_63] : memref<2x32x32xbf16, #tpu.memory_space<vmem>>, vector<1x32x32xbf16>
    %153 = vector.shape_cast %152 : vector<1x32x32xbf16> to vector<32x32xbf16>
    %154 = arith.truncf %151 : vector<9x32xf32> to vector<9x32xbf16>
    %cst_64 = arith.constant dense<0.000000e+00> : vector<9x32xf32>
    %155 = tpu.matmul %154, %153, %cst_64 {dimension_numbers = #tpu.dot_dimension_numbers<[1], [0], [0], [1], [0, 0, 1, 1], [], []>} : vector<9x32xbf16>, vector<32x32xbf16>, vector<9x32xf32> -> vector<9x32xf32>
    %c0_65 = arith.constant 0 : index
    %c0_66 = arith.constant 0 : index
    %c0_67 = arith.constant 0 : index
    %156 = vector.load %arg13[%c0_65, %c0_66, %c0_67] : memref<2x1x32xf32, #tpu.memory_space<vmem>>, vector<1x1x32xf32>
    %157 = vector.shape_cast %156 : vector<1x1x32xf32> to vector<1x32xf32>
    %158 = vector.broadcast %157 : vector<1x32xf32> to vector<9x32xf32>
    %159 = arith.addf %155, %158 : vector<9x32xf32>
    %160 = arith.addf %99, %159 : vector<9x32xf32>
    %c0_68 = arith.constant 0 : index
    %c0_69 = arith.constant 0 : index
    %c0_70 = arith.constant 0 : index
    %161 = vector.load %arg14[%c0_68, %c0_69, %c0_70] : memref<2x1x32xf32, #tpu.memory_space<vmem>>, vector<1x1x32xf32>
    %162 = vector.shape_cast %161 : vector<1x1x32xf32> to vector<1x32xf32>
    %c0_71 = arith.constant 0 : index
    %c0_72 = arith.constant 0 : index
    %c0_73 = arith.constant 0 : index
    %163 = vector.load %arg15[%c0_71, %c0_72, %c0_73] : memref<2x1x32xf32, #tpu.memory_space<vmem>>, vector<1x1x32xf32>
    %164 = vector.shape_cast %163 : vector<1x1x32xf32> to vector<1x32xf32>
    %cst_74 = arith.constant dense<0.000000e+00> : vector<9xf32>
    %165 = vector.multi_reduction <add>, %160, %cst_74 [1] : vector<9x32xf32> to vector<9xf32>
    %166 = vector.shape_cast %165 : vector<9xf32> to vector<9x1xf32>
    %cst_75 = arith.constant 3.200000e+01 : f32
    %167 = vector.broadcast %cst_75 : f32 to vector<9x1xf32>
    %168 = arith.divf %166, %167 : vector<9x1xf32>
    %169 = vector.broadcast %168 : vector<9x1xf32> to vector<9x32xf32>
    %170 = arith.subf %160, %169 : vector<9x32xf32>
    %171 = arith.mulf %170, %170 : vector<9x32xf32>
    %cst_76 = arith.constant dense<0.000000e+00> : vector<9xf32>
    %172 = vector.multi_reduction <add>, %171, %cst_76 [1] : vector<9x32xf32> to vector<9xf32>
    %173 = vector.shape_cast %172 : vector<9xf32> to vector<9x1xf32>
    %cst_77 = arith.constant 3.200000e+01 : f32
    %174 = vector.broadcast %cst_77 : f32 to vector<9x1xf32>
    %175 = arith.divf %173, %174 : vector<9x1xf32>
    %176 = vector.broadcast %168 : vector<9x1xf32> to vector<9x32xf32>
    %177 = arith.subf %160, %176 : vector<9x32xf32>
    %cst_78 = arith.constant 9.99999974E-6 : f32
    %178 = vector.broadcast %cst_78 : f32 to vector<9x1xf32>
    %179 = arith.addf %175, %178 : vector<9x1xf32>
    %180 = math.rsqrt %179 : vector<9x1xf32>
    %181 = vector.broadcast %180 : vector<9x1xf32> to vector<9x32xf32>
    %182 = arith.mulf %177, %181 : vector<9x32xf32>
    %183 = vector.broadcast %162 : vector<1x32xf32> to vector<9x32xf32>
    %184 = arith.mulf %182, %183 : vector<9x32xf32>
    %185 = vector.broadcast %164 : vector<1x32xf32> to vector<9x32xf32>
    %186 = arith.addf %184, %185 : vector<9x32xf32>
    %c0_79 = arith.constant 0 : index
    %c0_80 = arith.constant 0 : index
    %c0_81 = arith.constant 0 : index
    %187 = vector.load %arg16[%c0_79, %c0_80, %c0_81] : memref<2x32x128xbf16, #tpu.memory_space<vmem>>, vector<1x32x128xbf16>
    %188 = vector.shape_cast %187 : vector<1x32x128xbf16> to vector<32x128xbf16>
    %189 = arith.truncf %186 : vector<9x32xf32> to vector<9x32xbf16>
    %cst_82 = arith.constant dense<0.000000e+00> : vector<9x128xf32>
    %190 = tpu.matmul %189, %188, %cst_82 {dimension_numbers = #tpu.dot_dimension_numbers<[1], [0], [0], [1], [0, 0, 1, 1], [], []>} : vector<9x32xbf16>, vector<32x128xbf16>, vector<9x128xf32> -> vector<9x128xf32>
    %c0_83 = arith.constant 0 : index
    %c0_84 = arith.constant 0 : index
    %c0_85 = arith.constant 0 : index
    %191 = vector.load %arg17[%c0_83, %c0_84, %c0_85] : memref<2x1x128xf32, #tpu.memory_space<vmem>>, vector<1x1x128xf32>
    %192 = vector.shape_cast %191 : vector<1x1x128xf32> to vector<1x128xf32>
    %193 = vector.broadcast %192 : vector<1x128xf32> to vector<9x128xf32>
    %194 = arith.addf %190, %193 : vector<9x128xf32>
    %195 = arith.mulf %194, %194 : vector<9x128xf32>
    %196 = arith.mulf %194, %195 : vector<9x128xf32>
    %cst_86 = arith.constant 4.471500e-02 : f32
    %197 = vector.broadcast %cst_86 : f32 to vector<9x128xf32>
    %198 = arith.mulf %197, %196 : vector<9x128xf32>
    %199 = arith.addf %194, %198 : vector<9x128xf32>
    %cst_87 = arith.constant 0.797884583 : f32
    %200 = vector.broadcast %cst_87 : f32 to vector<9x128xf32>
    %201 = arith.mulf %200, %199 : vector<9x128xf32>
    %202 = math.tanh %201 : vector<9x128xf32>
    %cst_88 = arith.constant 1.000000e+00 : f32
    %203 = vector.broadcast %cst_88 : f32 to vector<9x128xf32>
    %204 = arith.addf %203, %202 : vector<9x128xf32>
    %cst_89 = arith.constant 5.000000e-01 : f32
    %205 = vector.broadcast %cst_89 : f32 to vector<9x128xf32>
    %206 = arith.mulf %205, %204 : vector<9x128xf32>
    %207 = arith.mulf %194, %206 : vector<9x128xf32>
    %c0_90 = arith.constant 0 : index
    %c0_91 = arith.constant 0 : index
    %c0_92 = arith.constant 0 : index
    %208 = vector.load %arg18[%c0_90, %c0_91, %c0_92] : memref<2x128x32xbf16, #tpu.memory_space<vmem>>, vector<1x128x32xbf16>
    %209 = vector.shape_cast %208 : vector<1x128x32xbf16> to vector<128x32xbf16>
    %210 = arith.truncf %207 : vector<9x128xf32> to vector<9x128xbf16>
    %cst_93 = arith.constant dense<0.000000e+00> : vector<9x32xf32>
    %211 = tpu.matmul %210, %209, %cst_93 {dimension_numbers = #tpu.dot_dimension_numbers<[1], [0], [0], [1], [0, 0, 1, 1], [], []>} : vector<9x128xbf16>, vector<128x32xbf16>, vector<9x32xf32> -> vector<9x32xf32>
    %c0_94 = arith.constant 0 : index
    %c0_95 = arith.constant 0 : index
    %c0_96 = arith.constant 0 : index
    %212 = vector.load %arg19[%c0_94, %c0_95, %c0_96] : memref<2x1x32xf32, #tpu.memory_space<vmem>>, vector<1x1x32xf32>
    %213 = vector.shape_cast %212 : vector<1x1x32xf32> to vector<1x32xf32>
    %214 = vector.broadcast %213 : vector<1x32xf32> to vector<9x32xf32>
    %215 = arith.addf %211, %214 : vector<9x32xf32>
    %216 = arith.addf %186, %215 : vector<9x32xf32>
    %c0_97 = arith.constant 0 : index
    %c0_98 = arith.constant 0 : index
    %c0_99 = arith.constant 0 : index
    %217 = vector.load %arg20[%c0_97, %c0_98, %c0_99] : memref<2x1x32xf32, #tpu.memory_space<vmem>>, vector<1x1x32xf32>
    %218 = vector.shape_cast %217 : vector<1x1x32xf32> to vector<1x32xf32>
    %c0_100 = arith.constant 0 : index
    %c0_101 = arith.constant 0 : index
    %c0_102 = arith.constant 0 : index
    %219 = vector.load %arg21[%c0_100, %c0_101, %c0_102] : memref<2x1x32xf32, #tpu.memory_space<vmem>>, vector<1x1x32xf32>
    %220 = vector.shape_cast %219 : vector<1x1x32xf32> to vector<1x32xf32>
    %cst_103 = arith.constant dense<0.000000e+00> : vector<9xf32>
    %221 = vector.multi_reduction <add>, %216, %cst_103 [1] : vector<9x32xf32> to vector<9xf32>
    %222 = vector.shape_cast %221 : vector<9xf32> to vector<9x1xf32>
    %cst_104 = arith.constant 3.200000e+01 : f32
    %223 = vector.broadcast %cst_104 : f32 to vector<9x1xf32>
    %224 = arith.divf %222, %223 : vector<9x1xf32>
    %225 = vector.broadcast %224 : vector<9x1xf32> to vector<9x32xf32>
    %226 = arith.subf %216, %225 : vector<9x32xf32>
    %227 = arith.mulf %226, %226 : vector<9x32xf32>
    %cst_105 = arith.constant dense<0.000000e+00> : vector<9xf32>
    %228 = vector.multi_reduction <add>, %227, %cst_105 [1] : vector<9x32xf32> to vector<9xf32>
    %229 = vector.shape_cast %228 : vector<9xf32> to vector<9x1xf32>
    %cst_106 = arith.constant 3.200000e+01 : f32
    %230 = vector.broadcast %cst_106 : f32 to vector<9x1xf32>
    %231 = arith.divf %229, %230 : vector<9x1xf32>
    %232 = vector.broadcast %224 : vector<9x1xf32> to vector<9x32xf32>
    %233 = arith.subf %216, %232 : vector<9x32xf32>
    %cst_107 = arith.constant 9.99999974E-6 : f32
    %234 = vector.broadcast %cst_107 : f32 to vector<9x1xf32>
    %235 = arith.addf %231, %234 : vector<9x1xf32>
    %236 = math.rsqrt %235 : vector<9x1xf32>
    %237 = vector.broadcast %236 : vector<9x1xf32> to vector<9x32xf32>
    %238 = arith.mulf %233, %237 : vector<9x32xf32>
    %239 = vector.broadcast %218 : vector<1x32xf32> to vector<9x32xf32>
    %240 = arith.mulf %238, %239 : vector<9x32xf32>
    %241 = vector.broadcast %220 : vector<1x32xf32> to vector<9x32xf32>
    %242 = arith.addf %240, %241 : vector<9x32xf32>
    %c1_108 = arith.constant 1 : index
    %c0_109 = arith.constant 0 : index
    %c0_110 = arith.constant 0 : index
    %243 = vector.load %arg10[%c1_108, %c0_109, %c0_110] : memref<2x32x96xbf16, #tpu.memory_space<vmem>>, vector<1x32x96xbf16>
    %244 = vector.shape_cast %243 : vector<1x32x96xbf16> to vector<32x96xbf16>
    %245 = arith.truncf %242 : vector<9x32xf32> to vector<9x32xbf16>
    %cst_111 = arith.constant dense<0.000000e+00> : vector<9x96xf32>
    %246 = tpu.matmul %245, %244, %cst_111 {dimension_numbers = #tpu.dot_dimension_numbers<[1], [0], [0], [1], [0, 0, 1, 1], [], []>} : vector<9x32xbf16>, vector<32x96xbf16>, vector<9x96xf32> -> vector<9x96xf32>
    %c1_112 = arith.constant 1 : index
    %c0_113 = arith.constant 0 : index
    %c0_114 = arith.constant 0 : index
    %247 = vector.load %arg11[%c1_112, %c0_113, %c0_114] : memref<2x1x96xf32, #tpu.memory_space<vmem>>, vector<1x1x96xf32>
    %248 = vector.shape_cast %247 : vector<1x1x96xf32> to vector<1x96xf32>
    %249 = vector.broadcast %248 : vector<1x96xf32> to vector<9x96xf32>
    %250 = arith.addf %246, %249 : vector<9x96xf32>
    %251 = vector.extract_strided_slice %250 {offsets = [0, 0], sizes = [9, 32], strides = [1, 1]} : vector<9x96xf32> to vector<9x32xf32>
    %cst_115 = arith.constant 2.500000e-01 : f32
    %252 = vector.broadcast %cst_115 : f32 to vector<9x32xf32>
    %253 = arith.mulf %251, %252 : vector<9x32xf32>
    %254 = vector.extract_strided_slice %250 {offsets = [0, 32], sizes = [9, 32], strides = [1, 1]} : vector<9x96xf32> to vector<9x32xf32>
    %255 = vector.extract_strided_slice %250 {offsets = [0, 64], sizes = [9, 32], strides = [1, 1]} : vector<9x96xf32> to vector<9x32xf32>
    %256 = vector.extract_strided_slice %253 {offsets = [0, 0], sizes = [9, 16], strides = [1, 1]} : vector<9x32xf32> to vector<9x16xf32>
    %257 = vector.extract_strided_slice %254 {offsets = [0, 0], sizes = [9, 16], strides = [1, 1]} : vector<9x32xf32> to vector<9x16xf32>
    %258 = arith.truncf %256 : vector<9x16xf32> to vector<9x16xbf16>
    %259 = arith.truncf %257 : vector<9x16xf32> to vector<9x16xbf16>
    %cst_116 = arith.constant dense<0.000000e+00> : vector<9x9xf32>
    %260 = tpu.matmul %258, %259, %cst_116 {dimension_numbers = #tpu.dot_dimension_numbers<[1], [1], [0], [0], [0, 0, 1, 0], [], []>} : vector<9x16xbf16>, vector<9x16xbf16>, vector<9x9xf32> -> vector<9x9xf32>
    %cst_117 = arith.constant dense<0xFF800000> : vector<9xf32>
    %261 = vector.multi_reduction <maximumf>, %260, %cst_117 [1] : vector<9x9xf32> to vector<9xf32>
    %262 = vector.shape_cast %261 : vector<9xf32> to vector<9x1xf32>
    %263 = vector.broadcast %262 : vector<9x1xf32> to vector<9x9xf32>
    %264 = arith.subf %260, %263 : vector<9x9xf32>
    %265 = math.exp %264 : vector<9x9xf32>
    %cst_118 = arith.constant dense<0.000000e+00> : vector<9xf32>
    %266 = vector.multi_reduction <add>, %265, %cst_118 [1] : vector<9x9xf32> to vector<9xf32>
    %267 = vector.shape_cast %266 : vector<9xf32> to vector<9x1xf32>
    %268 = tpu.reciprocal %267 {approx = true} : vector<9x1xf32> -> vector<9x1xf32>
    %269 = vector.broadcast %268 : vector<9x1xf32> to vector<9x9xf32>
    %270 = arith.mulf %265, %269 : vector<9x9xf32>
    %271 = vector.extract_strided_slice %255 {offsets = [0, 0], sizes = [9, 16], strides = [1, 1]} : vector<9x32xf32> to vector<9x16xf32>
    %272 = arith.truncf %270 : vector<9x9xf32> to vector<9x9xbf16>
    %273 = arith.truncf %271 : vector<9x16xf32> to vector<9x16xbf16>
    %cst_119 = arith.constant dense<0.000000e+00> : vector<9x16xf32>
    %274 = tpu.matmul %272, %273, %cst_119 {dimension_numbers = #tpu.dot_dimension_numbers<[1], [0], [0], [1], [0, 0, 1, 1], [], []>} : vector<9x9xbf16>, vector<9x16xbf16>, vector<9x16xf32> -> vector<9x16xf32>
    %275 = vector.extract_strided_slice %253 {offsets = [0, 16], sizes = [9, 16], strides = [1, 1]} : vector<9x32xf32> to vector<9x16xf32>
    %276 = vector.extract_strided_slice %254 {offsets = [0, 16], sizes = [9, 16], strides = [1, 1]} : vector<9x32xf32> to vector<9x16xf32>
    %277 = arith.truncf %275 : vector<9x16xf32> to vector<9x16xbf16>
    %278 = arith.truncf %276 : vector<9x16xf32> to vector<9x16xbf16>
    %cst_120 = arith.constant dense<0.000000e+00> : vector<9x9xf32>
    %279 = tpu.matmul %277, %278, %cst_120 {dimension_numbers = #tpu.dot_dimension_numbers<[1], [1], [0], [0], [0, 0, 1, 0], [], []>} : vector<9x16xbf16>, vector<9x16xbf16>, vector<9x9xf32> -> vector<9x9xf32>
    %cst_121 = arith.constant dense<0xFF800000> : vector<9xf32>
    %280 = vector.multi_reduction <maximumf>, %279, %cst_121 [1] : vector<9x9xf32> to vector<9xf32>
    %281 = vector.shape_cast %280 : vector<9xf32> to vector<9x1xf32>
    %282 = vector.broadcast %281 : vector<9x1xf32> to vector<9x9xf32>
    %283 = arith.subf %279, %282 : vector<9x9xf32>
    %284 = math.exp %283 : vector<9x9xf32>
    %cst_122 = arith.constant dense<0.000000e+00> : vector<9xf32>
    %285 = vector.multi_reduction <add>, %284, %cst_122 [1] : vector<9x9xf32> to vector<9xf32>
    %286 = vector.shape_cast %285 : vector<9xf32> to vector<9x1xf32>
    %287 = tpu.reciprocal %286 {approx = true} : vector<9x1xf32> -> vector<9x1xf32>
    %288 = vector.broadcast %287 : vector<9x1xf32> to vector<9x9xf32>
    %289 = arith.mulf %284, %288 : vector<9x9xf32>
    %290 = vector.extract_strided_slice %255 {offsets = [0, 16], sizes = [9, 16], strides = [1, 1]} : vector<9x32xf32> to vector<9x16xf32>
    %291 = arith.truncf %289 : vector<9x9xf32> to vector<9x9xbf16>
    %292 = arith.truncf %290 : vector<9x16xf32> to vector<9x16xbf16>
    %cst_123 = arith.constant dense<0.000000e+00> : vector<9x16xf32>
    %293 = tpu.matmul %291, %292, %cst_123 {dimension_numbers = #tpu.dot_dimension_numbers<[1], [0], [0], [1], [0, 0, 1, 1], [], []>} : vector<9x9xbf16>, vector<9x16xbf16>, vector<9x16xf32> -> vector<9x16xf32>
    %294 = tpu.concatenate %274, %293 in 1 : vector<9x16xf32>, vector<9x16xf32> -> vector<9x32xf32>
    %c1_124 = arith.constant 1 : index
    %c0_125 = arith.constant 0 : index
    %c0_126 = arith.constant 0 : index
    %295 = vector.load %arg12[%c1_124, %c0_125, %c0_126] : memref<2x32x32xbf16, #tpu.memory_space<vmem>>, vector<1x32x32xbf16>
    %296 = vector.shape_cast %295 : vector<1x32x32xbf16> to vector<32x32xbf16>
    %297 = arith.truncf %294 : vector<9x32xf32> to vector<9x32xbf16>
    %cst_127 = arith.constant dense<0.000000e+00> : vector<9x32xf32>
    %298 = tpu.matmul %297, %296, %cst_127 {dimension_numbers = #tpu.dot_dimension_numbers<[1], [0], [0], [1], [0, 0, 1, 1], [], []>} : vector<9x32xbf16>, vector<32x32xbf16>, vector<9x32xf32> -> vector<9x32xf32>
    %c1_128 = arith.constant 1 : index
    %c0_129 = arith.constant 0 : index
    %c0_130 = arith.constant 0 : index
    %299 = vector.load %arg13[%c1_128, %c0_129, %c0_130] : memref<2x1x32xf32, #tpu.memory_space<vmem>>, vector<1x1x32xf32>
    %300 = vector.shape_cast %299 : vector<1x1x32xf32> to vector<1x32xf32>
    %301 = vector.broadcast %300 : vector<1x32xf32> to vector<9x32xf32>
    %302 = arith.addf %298, %301 : vector<9x32xf32>
    %303 = arith.addf %242, %302 : vector<9x32xf32>
    %c1_131 = arith.constant 1 : index
    %c0_132 = arith.constant 0 : index
    %c0_133 = arith.constant 0 : index
    %304 = vector.load %arg14[%c1_131, %c0_132, %c0_133] : memref<2x1x32xf32, #tpu.memory_space<vmem>>, vector<1x1x32xf32>
    %305 = vector.shape_cast %304 : vector<1x1x32xf32> to vector<1x32xf32>
    %c1_134 = arith.constant 1 : index
    %c0_135 = arith.constant 0 : index
    %c0_136 = arith.constant 0 : index
    %306 = vector.load %arg15[%c1_134, %c0_135, %c0_136] : memref<2x1x32xf32, #tpu.memory_space<vmem>>, vector<1x1x32xf32>
    %307 = vector.shape_cast %306 : vector<1x1x32xf32> to vector<1x32xf32>
    %cst_137 = arith.constant dense<0.000000e+00> : vector<9xf32>
    %308 = vector.multi_reduction <add>, %303, %cst_137 [1] : vector<9x32xf32> to vector<9xf32>
    %309 = vector.shape_cast %308 : vector<9xf32> to vector<9x1xf32>
    %cst_138 = arith.constant 3.200000e+01 : f32
    %310 = vector.broadcast %cst_138 : f32 to vector<9x1xf32>
    %311 = arith.divf %309, %310 : vector<9x1xf32>
    %312 = vector.broadcast %311 : vector<9x1xf32> to vector<9x32xf32>
    %313 = arith.subf %303, %312 : vector<9x32xf32>
    %314 = arith.mulf %313, %313 : vector<9x32xf32>
    %cst_139 = arith.constant dense<0.000000e+00> : vector<9xf32>
    %315 = vector.multi_reduction <add>, %314, %cst_139 [1] : vector<9x32xf32> to vector<9xf32>
    %316 = vector.shape_cast %315 : vector<9xf32> to vector<9x1xf32>
    %cst_140 = arith.constant 3.200000e+01 : f32
    %317 = vector.broadcast %cst_140 : f32 to vector<9x1xf32>
    %318 = arith.divf %316, %317 : vector<9x1xf32>
    %319 = vector.broadcast %311 : vector<9x1xf32> to vector<9x32xf32>
    %320 = arith.subf %303, %319 : vector<9x32xf32>
    %cst_141 = arith.constant 9.99999974E-6 : f32
    %321 = vector.broadcast %cst_141 : f32 to vector<9x1xf32>
    %322 = arith.addf %318, %321 : vector<9x1xf32>
    %323 = math.rsqrt %322 : vector<9x1xf32>
    %324 = vector.broadcast %323 : vector<9x1xf32> to vector<9x32xf32>
    %325 = arith.mulf %320, %324 : vector<9x32xf32>
    %326 = vector.broadcast %305 : vector<1x32xf32> to vector<9x32xf32>
    %327 = arith.mulf %325, %326 : vector<9x32xf32>
    %328 = vector.broadcast %307 : vector<1x32xf32> to vector<9x32xf32>
    %329 = arith.addf %327, %328 : vector<9x32xf32>
    %c1_142 = arith.constant 1 : index
    %c0_143 = arith.constant 0 : index
    %c0_144 = arith.constant 0 : index
    %330 = vector.load %arg16[%c1_142, %c0_143, %c0_144] : memref<2x32x128xbf16, #tpu.memory_space<vmem>>, vector<1x32x128xbf16>
    %331 = vector.shape_cast %330 : vector<1x32x128xbf16> to vector<32x128xbf16>
    %332 = arith.truncf %329 : vector<9x32xf32> to vector<9x32xbf16>
    %cst_145 = arith.constant dense<0.000000e+00> : vector<9x128xf32>
    %333 = tpu.matmul %332, %331, %cst_145 {dimension_numbers = #tpu.dot_dimension_numbers<[1], [0], [0], [1], [0, 0, 1, 1], [], []>} : vector<9x32xbf16>, vector<32x128xbf16>, vector<9x128xf32> -> vector<9x128xf32>
    %c1_146 = arith.constant 1 : index
    %c0_147 = arith.constant 0 : index
    %c0_148 = arith.constant 0 : index
    %334 = vector.load %arg17[%c1_146, %c0_147, %c0_148] : memref<2x1x128xf32, #tpu.memory_space<vmem>>, vector<1x1x128xf32>
    %335 = vector.shape_cast %334 : vector<1x1x128xf32> to vector<1x128xf32>
    %336 = vector.broadcast %335 : vector<1x128xf32> to vector<9x128xf32>
    %337 = arith.addf %333, %336 : vector<9x128xf32>
    %338 = arith.mulf %337, %337 : vector<9x128xf32>
    %339 = arith.mulf %337, %338 : vector<9x128xf32>
    %cst_149 = arith.constant 4.471500e-02 : f32
    %340 = vector.broadcast %cst_149 : f32 to vector<9x128xf32>
    %341 = arith.mulf %340, %339 : vector<9x128xf32>
    %342 = arith.addf %337, %341 : vector<9x128xf32>
    %cst_150 = arith.constant 0.797884583 : f32
    %343 = vector.broadcast %cst_150 : f32 to vector<9x128xf32>
    %344 = arith.mulf %343, %342 : vector<9x128xf32>
    %345 = math.tanh %344 : vector<9x128xf32>
    %cst_151 = arith.constant 1.000000e+00 : f32
    %346 = vector.broadcast %cst_151 : f32 to vector<9x128xf32>
    %347 = arith.addf %346, %345 : vector<9x128xf32>
    %cst_152 = arith.constant 5.000000e-01 : f32
    %348 = vector.broadcast %cst_152 : f32 to vector<9x128xf32>
    %349 = arith.mulf %348, %347 : vector<9x128xf32>
    %350 = arith.mulf %337, %349 : vector<9x128xf32>
    %c1_153 = arith.constant 1 : index
    %c0_154 = arith.constant 0 : index
    %c0_155 = arith.constant 0 : index
    %351 = vector.load %arg18[%c1_153, %c0_154, %c0_155] : memref<2x128x32xbf16, #tpu.memory_space<vmem>>, vector<1x128x32xbf16>
    %352 = vector.shape_cast %351 : vector<1x128x32xbf16> to vector<128x32xbf16>
    %353 = arith.truncf %350 : vector<9x128xf32> to vector<9x128xbf16>
    %cst_156 = arith.constant dense<0.000000e+00> : vector<9x32xf32>
    %354 = tpu.matmul %353, %352, %cst_156 {dimension_numbers = #tpu.dot_dimension_numbers<[1], [0], [0], [1], [0, 0, 1, 1], [], []>} : vector<9x128xbf16>, vector<128x32xbf16>, vector<9x32xf32> -> vector<9x32xf32>
    %c1_157 = arith.constant 1 : index
    %c0_158 = arith.constant 0 : index
    %c0_159 = arith.constant 0 : index
    %355 = vector.load %arg19[%c1_157, %c0_158, %c0_159] : memref<2x1x32xf32, #tpu.memory_space<vmem>>, vector<1x1x32xf32>
    %356 = vector.shape_cast %355 : vector<1x1x32xf32> to vector<1x32xf32>
    %357 = vector.broadcast %356 : vector<1x32xf32> to vector<9x32xf32>
    %358 = arith.addf %354, %357 : vector<9x32xf32>
    %359 = arith.addf %329, %358 : vector<9x32xf32>
    %c1_160 = arith.constant 1 : index
    %c0_161 = arith.constant 0 : index
    %c0_162 = arith.constant 0 : index
    %360 = vector.load %arg20[%c1_160, %c0_161, %c0_162] : memref<2x1x32xf32, #tpu.memory_space<vmem>>, vector<1x1x32xf32>
    %361 = vector.shape_cast %360 : vector<1x1x32xf32> to vector<1x32xf32>
    %c1_163 = arith.constant 1 : index
    %c0_164 = arith.constant 0 : index
    %c0_165 = arith.constant 0 : index
    %362 = vector.load %arg21[%c1_163, %c0_164, %c0_165] : memref<2x1x32xf32, #tpu.memory_space<vmem>>, vector<1x1x32xf32>
    %363 = vector.shape_cast %362 : vector<1x1x32xf32> to vector<1x32xf32>
    %cst_166 = arith.constant dense<0.000000e+00> : vector<9xf32>
    %364 = vector.multi_reduction <add>, %359, %cst_166 [1] : vector<9x32xf32> to vector<9xf32>
    %365 = vector.shape_cast %364 : vector<9xf32> to vector<9x1xf32>
    %cst_167 = arith.constant 3.200000e+01 : f32
    %366 = vector.broadcast %cst_167 : f32 to vector<9x1xf32>
    %367 = arith.divf %365, %366 : vector<9x1xf32>
    %368 = vector.broadcast %367 : vector<9x1xf32> to vector<9x32xf32>
    %369 = arith.subf %359, %368 : vector<9x32xf32>
    %370 = arith.mulf %369, %369 : vector<9x32xf32>
    %cst_168 = arith.constant dense<0.000000e+00> : vector<9xf32>
    %371 = vector.multi_reduction <add>, %370, %cst_168 [1] : vector<9x32xf32> to vector<9xf32>
    %372 = vector.shape_cast %371 : vector<9xf32> to vector<9x1xf32>
    %cst_169 = arith.constant 3.200000e+01 : f32
    %373 = vector.broadcast %cst_169 : f32 to vector<9x1xf32>
    %374 = arith.divf %372, %373 : vector<9x1xf32>
    %375 = vector.broadcast %367 : vector<9x1xf32> to vector<9x32xf32>
    %376 = arith.subf %359, %375 : vector<9x32xf32>
    %cst_170 = arith.constant 9.99999974E-6 : f32
    %377 = vector.broadcast %cst_170 : f32 to vector<9x1xf32>
    %378 = arith.addf %374, %377 : vector<9x1xf32>
    %379 = math.rsqrt %378 : vector<9x1xf32>
    %380 = vector.broadcast %379 : vector<9x1xf32> to vector<9x32xf32>
    %381 = arith.mulf %376, %380 : vector<9x32xf32>
    %382 = vector.broadcast %361 : vector<1x32xf32> to vector<9x32xf32>
    %383 = arith.mulf %381, %382 : vector<9x32xf32>
    %384 = vector.broadcast %363 : vector<1x32xf32> to vector<9x32xf32>
    %385 = arith.addf %383, %384 : vector<9x32xf32>
    %c0_171 = arith.constant 0 : index
    %c0_172 = arith.constant 0 : index
    %386 = vector.load %arg22[%c0_171, %c0_172] : memref<32x32xbf16, #tpu.memory_space<vmem>>, vector<32x32xbf16>
    %387 = arith.truncf %385 : vector<9x32xf32> to vector<9x32xbf16>
    %cst_173 = arith.constant dense<0.000000e+00> : vector<9x32xf32>
    %388 = tpu.matmul %387, %386, %cst_173 {dimension_numbers = #tpu.dot_dimension_numbers<[1], [0], [0], [1], [0, 0, 1, 1], [], []>} : vector<9x32xbf16>, vector<32x32xbf16>, vector<9x32xf32> -> vector<9x32xf32>
    %c0_174 = arith.constant 0 : index
    %c0_175 = arith.constant 0 : index
    %389 = vector.load %arg23[%c0_174, %c0_175] : memref<1x32xf32, #tpu.memory_space<vmem>>, vector<1x32xf32>
    %390 = vector.broadcast %389 : vector<1x32xf32> to vector<9x32xf32>
    %391 = arith.addf %388, %390 : vector<9x32xf32>
    %cst_176 = arith.constant dense<0.000000e+00> : vector<32xf32>
    %392 = vector.multi_reduction <add>, %391, %cst_176 [0] : vector<9x32xf32> to vector<32xf32>
    %393 = vector.shape_cast %392 : vector<32xf32> to vector<1x32xf32>
    %cst_177 = arith.constant 0.111111112 : f32
    %394 = vector.broadcast %cst_177 : f32 to vector<1x32xf32>
    %395 = arith.mulf %393, %394 : vector<1x32xf32>
    %c0_178 = arith.constant 0 : index
    %c0_179 = arith.constant 0 : index
    %396 = vector.load %arg24[%c0_178, %c0_179] : memref<32x512xbf16, #tpu.memory_space<vmem>>, vector<32x512xbf16>
    %397 = arith.truncf %395 : vector<1x32xf32> to vector<1x32xbf16>
    %cst_180 = arith.constant dense<0.000000e+00> : vector<1x512xf32>
    %398 = tpu.matmul %397, %396, %cst_180 {dimension_numbers = #tpu.dot_dimension_numbers<[1], [0], [0], [1], [0, 0, 1, 1], [], []>} : vector<1x32xbf16>, vector<32x512xbf16>, vector<1x512xf32> -> vector<1x512xf32>
    %c0_181 = arith.constant 0 : index
    %c0_182 = arith.constant 0 : index
    %399 = vector.load %arg25[%c0_181, %c0_182] : memref<1x512xf32, #tpu.memory_space<vmem>>, vector<1x512xf32>
    %400 = arith.addf %398, %399 : vector<1x512xf32>
    %cst_183 = arith.constant 0.000000e+00 : f32
    %401 = vector.broadcast %cst_183 : f32 to vector<1x512xf32>
    %402 = arith.maximumf %400, %401 : vector<1x512xf32>
    %c0_184 = arith.constant 0 : index
    %c0_185 = arith.constant 0 : index
    %403 = vector.load %arg26[%c0_184, %c0_185] : memref<1x512xf32, #tpu.memory_space<vmem>>, vector<1x512xf32>
    %404 = arith.mulf %402, %403 : vector<1x512xf32>
    %c0_186 = arith.constant 0 : index
    %c0_187 = arith.constant 0 : index
    %405 = vector.load %arg27[%c0_186, %c0_187] : memref<1x512xf32, #tpu.memory_space<vmem>>, vector<1x512xf32>
    %406 = arith.addf %404, %405 : vector<1x512xf32>
    %c0_188 = arith.constant 0 : index
    %c0_189 = arith.constant 0 : index
    %407 = vector.load %arg28[%c0_188, %c0_189] : memref<512x256xbf16, #tpu.memory_space<vmem>>, vector<512x256xbf16>
    %408 = arith.truncf %406 : vector<1x512xf32> to vector<1x512xbf16>
    %cst_190 = arith.constant dense<0.000000e+00> : vector<1x256xf32>
    %409 = tpu.matmul %408, %407, %cst_190 {dimension_numbers = #tpu.dot_dimension_numbers<[1], [0], [0], [1], [0, 0, 1, 1], [], []>} : vector<1x512xbf16>, vector<512x256xbf16>, vector<1x256xf32> -> vector<1x256xf32>
    %c0_191 = arith.constant 0 : index
    %c0_192 = arith.constant 0 : index
    %410 = vector.load %arg29[%c0_191, %c0_192] : memref<1x256xf32, #tpu.memory_space<vmem>>, vector<1x256xf32>
    %411 = arith.addf %409, %410 : vector<1x256xf32>
    %cst_193 = arith.constant 0.000000e+00 : f32
    %412 = vector.broadcast %cst_193 : f32 to vector<1x256xf32>
    %413 = arith.maximumf %411, %412 : vector<1x256xf32>
    %c0_194 = arith.constant 0 : index
    %c0_195 = arith.constant 0 : index
    %414 = vector.load %arg30[%c0_194, %c0_195] : memref<1x256xf32, #tpu.memory_space<vmem>>, vector<1x256xf32>
    %415 = arith.mulf %413, %414 : vector<1x256xf32>
    %c0_196 = arith.constant 0 : index
    %c0_197 = arith.constant 0 : index
    %416 = vector.load %arg31[%c0_196, %c0_197] : memref<1x256xf32, #tpu.memory_space<vmem>>, vector<1x256xf32>
    %417 = arith.addf %415, %416 : vector<1x256xf32>
    %c0_198 = arith.constant 0 : index
    %c0_199 = arith.constant 0 : index
    %418 = vector.load %arg32[%c0_198, %c0_199] : memref<256x8xbf16, #tpu.memory_space<vmem>>, vector<256x8xbf16>
    %419 = arith.truncf %417 : vector<1x256xf32> to vector<1x256xbf16>
    %cst_200 = arith.constant dense<0.000000e+00> : vector<1x8xf32>
    %420 = tpu.matmul %419, %418, %cst_200 {dimension_numbers = #tpu.dot_dimension_numbers<[1], [0], [0], [1], [0, 0, 1, 1], [], []>} : vector<1x256xbf16>, vector<256x8xbf16>, vector<1x8xf32> -> vector<1x8xf32>
    %c0_201 = arith.constant 0 : index
    %c0_202 = arith.constant 0 : index
    %421 = vector.load %arg33[%c0_201, %c0_202] : memref<1x8xf32, #tpu.memory_space<vmem>>, vector<1x8xf32>
    %422 = arith.addf %420, %421 : vector<1x8xf32>
    %c0_203 = arith.constant 0 : index
    %c0_204 = arith.constant 0 : index
    %c0_205 = arith.constant 0 : index
    %423 = vector.load %arg34[%c0_203, %c0_204, %c0_205] : memref<1x1x8xf32, #tpu.memory_space<vmem>>, vector<1x1x8xf32>
    %424 = vector.shape_cast %423 : vector<1x1x8xf32> to vector<1x8xf32>
    %425 = vector.shape_cast %422 : vector<1x8xf32> to vector<1x1x8xf32>
    tpu.vector_store %arg34[%c0_203, %c0_204, %c0_205], %425 {strides = array<i32>} : memref<1x1x8xf32, #tpu.memory_space<vmem>>, vector<1x1x8xf32>,
    return
  }
  func.func @transform_0(%arg0: i32) -> (i32, i32, i32) {
    %c0_i32 = arith.constant 0 : i32
    %c0_i32_0 = arith.constant 0 : i32
    %c0_i32_1 = arith.constant 0 : i32
    return %arg0, %c0_i32, %c0_i32_0 : i32, i32, i32
  }
  func.func @transform_1(%arg0: i32) -> (i32, i32) {
    %c0_i32 = arith.constant 0 : i32
    %c0_i32_0 = arith.constant 0 : i32
    %c0_i32_1 = arith.constant 0 : i32
    return %c0_i32, %c0_i32_0 : i32, i32
  }
  func.func @transform_2(%arg0: i32) -> (i32, i32) {
    %c0_i32 = arith.constant 0 : i32
    %c0_i32_0 = arith.constant 0 : i32
    %c0_i32_1 = arith.constant 0 : i32
    return %c0_i32, %c0_i32_0 : i32, i32
  }
  func.func @transform_3(%arg0: i32) -> (i32, i32) {
    %c0_i32 = arith.constant 0 : i32
    %c0_i32_0 = arith.constant 0 : i32
    %c0_i32_1 = arith.constant 0 : i32
    return %c0_i32, %c0_i32_0 : i32, i32
  }
  func.func @transform_4(%arg0: i32) -> (i32, i32) {
    %c0_i32 = arith.constant 0 : i32
    %c0_i32_0 = arith.constant 0 : i32
    %c0_i32_1 = arith.constant 0 : i32
    return %c0_i32, %c0_i32_0 : i32, i32
  }
  func.func @transform_5(%arg0: i32) -> (i32, i32, i32) {
    %c0_i32 = arith.constant 0 : i32
    %c0_i32_0 = arith.constant 0 : i32
    %c0_i32_1 = arith.constant 0 : i32
    %c0_i32_2 = arith.constant 0 : i32
    return %c0_i32, %c0_i32_0, %c0_i32_1 : i32, i32, i32
  }
  func.func @transform_6(%arg0: i32) -> (i32, i32) {
    %c0_i32 = arith.constant 0 : i32
    %c0_i32_0 = arith.constant 0 : i32
    %c0_i32_1 = arith.constant 0 : i32
    return %c0_i32, %c0_i32_0 : i32, i32
  }
  func.func @transform_7(%arg0: i32) -> (i32, i32) {
    %c0_i32 = arith.constant 0 : i32
    %c0_i32_0 = arith.constant 0 : i32
    %c0_i32_1 = arith.constant 0 : i32
    return %c0_i32, %c0_i32_0 : i32, i32
  }
  func.func @transform_8(%arg0: i32) -> (i32, i32) {
    %c0_i32 = arith.constant 0 : i32
    %c0_i32_0 = arith.constant 0 : i32
    %c0_i32_1 = arith.constant 0 : i32
    return %c0_i32, %c0_i32_0 : i32, i32
  }
  func.func @transform_9(%arg0: i32) -> (i32, i32, i32) {
    %c0_i32 = arith.constant 0 : i32
    %c0_i32_0 = arith.constant 0 : i32
    %c0_i32_1 = arith.constant 0 : i32
    %c0_i32_2 = arith.constant 0 : i32
    return %c0_i32, %c0_i32_0, %c0_i32_1 : i32, i32, i32
  }
  func.func @transform_10(%arg0: i32) -> (i32, i32, i32) {
    %c0_i32 = arith.constant 0 : i32
    %c0_i32_0 = arith.constant 0 : i32
    %c0_i32_1 = arith.constant 0 : i32
    %c0_i32_2 = arith.constant 0 : i32
    return %c0_i32, %c0_i32_0, %c0_i32_1 : i32, i32, i32
  }
  func.func @transform_11(%arg0: i32) -> (i32, i32, i32) {
    %c0_i32 = arith.constant 0 : i32
    %c0_i32_0 = arith.constant 0 : i32
    %c0_i32_1 = arith.constant 0 : i32
    %c0_i32_2 = arith.constant 0 : i32
    return %c0_i32, %c0_i32_0, %c0_i32_1 : i32, i32, i32
  }
  func.func @transform_12(%arg0: i32) -> (i32, i32, i32) {
    %c0_i32 = arith.constant 0 : i32
    %c0_i32_0 = arith.constant 0 : i32
    %c0_i32_1 = arith.constant 0 : i32
    %c0_i32_2 = arith.constant 0 : i32
    return %c0_i32, %c0_i32_0, %c0_i32_1 : i32, i32, i32
  }
  func.func @transform_13(%arg0: i32) -> (i32, i32, i32) {
    %c0_i32 = arith.constant 0 : i32
    %c0_i32_0 = arith.constant 0 : i32
    %c0_i32_1 = arith.constant 0 : i32
    %c0_i32_2 = arith.constant 0 : i32
    return %c0_i32, %c0_i32_0, %c0_i32_1 : i32, i32, i32
  }
  func.func @transform_14(%arg0: i32) -> (i32, i32, i32) {
    %c0_i32 = arith.constant 0 : i32
    %c0_i32_0 = arith.constant 0 : i32
    %c0_i32_1 = arith.constant 0 : i32
    %c0_i32_2 = arith.constant 0 : i32
    return %c0_i32, %c0_i32_0, %c0_i32_1 : i32, i32, i32
  }
  func.func @transform_15(%arg0: i32) -> (i32, i32, i32) {
    %c0_i32 = arith.constant 0 : i32
    %c0_i32_0 = arith.constant 0 : i32
    %c0_i32_1 = arith.constant 0 : i32
    %c0_i32_2 = arith.constant 0 : i32
    return %c0_i32, %c0_i32_0, %c0_i32_1 : i32, i32, i32
  }
  func.func @transform_16(%arg0: i32) -> (i32, i32, i32) {
    %c0_i32 = arith.constant 0 : i32
    %c0_i32_0 = arith.constant 0 : i32
    %c0_i32_1 = arith.constant 0 : i32
    %c0_i32_2 = arith.constant 0 : i32
    return %c0_i32, %c0_i32_0, %c0_i32_1 : i32, i32, i32
  }
  func.func @transform_17(%arg0: i32) -> (i32, i32, i32) {
    %c0_i32 = arith.constant 0 : i32
    %c0_i32_0 = arith.constant 0 : i32
    %c0_i32_1 = arith.constant 0 : i32
    %c0_i32_2 = arith.constant 0 : i32
    return %c0_i32, %c0_i32_0, %c0_i32_1 : i32, i32, i32
  }
  func.func @transform_18(%arg0: i32) -> (i32, i32, i32) {
    %c0_i32 = arith.constant 0 : i32
    %c0_i32_0 = arith.constant 0 : i32
    %c0_i32_1 = arith.constant 0 : i32
    %c0_i32_2 = arith.constant 0 : i32
    return %c0_i32, %c0_i32_0, %c0_i32_1 : i32, i32, i32
  }
  func.func @transform_19(%arg0: i32) -> (i32, i32, i32) {
    %c0_i32 = arith.constant 0 : i32
    %c0_i32_0 = arith.constant 0 : i32
    %c0_i32_1 = arith.constant 0 : i32
    %c0_i32_2 = arith.constant 0 : i32
    return %c0_i32, %c0_i32_0, %c0_i32_1 : i32, i32, i32
  }
  func.func @transform_20(%arg0: i32) -> (i32, i32, i32) {
    %c0_i32 = arith.constant 0 : i32
    %c0_i32_0 = arith.constant 0 : i32
    %c0_i32_1 = arith.constant 0 : i32
    %c0_i32_2 = arith.constant 0 : i32
    return %c0_i32, %c0_i32_0, %c0_i32_1 : i32, i32, i32
  }
  func.func @transform_21(%arg0: i32) -> (i32, i32) {
    %c0_i32 = arith.constant 0 : i32
    %c0_i32_0 = arith.constant 0 : i32
    %c0_i32_1 = arith.constant 0 : i32
    return %c0_i32, %c0_i32_0 : i32, i32
  }
  func.func @transform_22(%arg0: i32) -> (i32, i32) {
    %c0_i32 = arith.constant 0 : i32
    %c0_i32_0 = arith.constant 0 : i32
    %c0_i32_1 = arith.constant 0 : i32
    return %c0_i32, %c0_i32_0 : i32, i32
  }
  func.func @transform_23(%arg0: i32) -> (i32, i32) {
    %c0_i32 = arith.constant 0 : i32
    %c0_i32_0 = arith.constant 0 : i32
    %c0_i32_1 = arith.constant 0 : i32
    return %c0_i32, %c0_i32_0 : i32, i32
  }
  func.func @transform_24(%arg0: i32) -> (i32, i32) {
    %c0_i32 = arith.constant 0 : i32
    %c0_i32_0 = arith.constant 0 : i32
    %c0_i32_1 = arith.constant 0 : i32
    return %c0_i32, %c0_i32_0 : i32, i32
  }
  func.func @transform_25(%arg0: i32) -> (i32, i32) {
    %c0_i32 = arith.constant 0 : i32
    %c0_i32_0 = arith.constant 0 : i32
    %c0_i32_1 = arith.constant 0 : i32
    return %c0_i32, %c0_i32_0 : i32, i32
  }
  func.func @transform_26(%arg0: i32) -> (i32, i32) {
    %c0_i32 = arith.constant 0 : i32
    %c0_i32_0 = arith.constant 0 : i32
    %c0_i32_1 = arith.constant 0 : i32
    return %c0_i32, %c0_i32_0 : i32, i32
  }
  func.func @transform_27(%arg0: i32) -> (i32, i32) {
    %c0_i32 = arith.constant 0 : i32
    %c0_i32_0 = arith.constant 0 : i32
    %c0_i32_1 = arith.constant 0 : i32
    return %c0_i32, %c0_i32_0 : i32, i32
  }
  func.func @transform_28(%arg0: i32) -> (i32, i32) {
    %c0_i32 = arith.constant 0 : i32
    %c0_i32_0 = arith.constant 0 : i32
    %c0_i32_1 = arith.constant 0 : i32
    return %c0_i32, %c0_i32_0 : i32, i32
  }
  func.func @transform_29(%arg0: i32) -> (i32, i32) {
    %c0_i32 = arith.constant 0 : i32
    %c0_i32_0 = arith.constant 0 : i32
    %c0_i32_1 = arith.constant 0 : i32
    return %c0_i32, %c0_i32_0 : i32, i32
  }
  func.func @transform_30(%arg0: i32) -> (i32, i32) {
    %c0_i32 = arith.constant 0 : i32
    %c0_i32_0 = arith.constant 0 : i32
    %c0_i32_1 = arith.constant 0 : i32
    return %c0_i32, %c0_i32_0 : i32, i32
  }
  func.func @transform_31(%arg0: i32) -> (i32, i32) {
    %c0_i32 = arith.constant 0 : i32
    %c0_i32_0 = arith.constant 0 : i32
    %c0_i32_1 = arith.constant 0 : i32
    return %c0_i32, %c0_i32_0 : i32, i32
  }
  func.func @transform_32(%arg0: i32) -> (i32, i32) {
    %c0_i32 = arith.constant 0 : i32
    %c0_i32_0 = arith.constant 0 : i32
    %c0_i32_1 = arith.constant 0 : i32
    return %c0_i32, %c0_i32_0 : i32, i32
  }
  func.func @transform_33(%arg0: i32) -> (i32, i32, i32) {
    %c0_i32 = arith.constant 0 : i32
    %c0_i32_0 = arith.constant 0 : i32
    %c0_i32_1 = arith.constant 0 : i32
    return %arg0, %c0_i32, %c0_i32_0 : i32, i32, i32
  }
}

</mosaic_0001>

<bundles_post_ra>
// kernel: wav2vec2_emotion_forward.8
= control target key start
LH: loop header
LB: loop body
LE: loop exit
PB: predicated region body
PF: predicated region fallthrough
CT: control target
= control target key end

     0   :  { %s1009_s15 = smov 0   ;;  %s1411_s0 = inlined_call_operand.vmem [shape: f32[2,10,639], index: 0, kind: input, shape index: {}]   ;;  %s1412_s1 = inlined_call_operand.vmem [shape: bf16[32,10], index: 1, kind: input, shape index: {}]   ;;  %s1413_s2 = inlined_call_operand.vmem [shape: f32[32,1], index: 2, kind: input, shape index: {}]   ;;  %s1414_s3 = inlined_call_operand.vmem [shape: f32[32,1], index: 3, kind: input, shape index: {}]   ;;  %s1415_s4 = inlined_call_operand.vmem [shape: f32[2,32,639], index: 4, kind: output, shape index: {}]  }
   0x1 LB: > { %s883_s16 = sadd.s32 4294967295, %s981_s15   ;;  %p887_p0 = scmp.ge.s32.totalorder %s981_s15, 1  ;;  %s981_s15 = sphi %s1009_s15, %s14_s15  }
   0x2   : > { %p162_p1 = scmp.lt.s32.totalorder %s981_s15, 3 }
   0x4   : > { %p163_p2 = pnand %p887_p0, %p162_p1 }
   0x5   : > { %p188_p3 = scmp.lt.s32.totalorder (!%p163_p2), %s883_s16, 1  ;;  %v983_v0 = vmov (!%p163_p2), 0   ;;  %vm235_vm0 = vcmask (!%p163_p2), 1044480   ;;  %v925_v16 = vld [vmem:[%s1412_s1] sm:$0xff] (!%p163_p2)   ;;  %vm228_vm1 = vcmask (!%p163_p2), 80896   ;;  %v926_v20 = vld [vmem:[%s1412_s1 + $0x8] sm:$0xff] (!%p163_p2)  }
   0x6   : > { %166 = sbr.rel (%p163_p2) target bundleno = 648 (0x288), region = 36  ;;  %283 = vmatprep.mubr.bf16.mxu0 (!%p163_p2), %v983_v0  ;;  %336 = vmatprep.mubr.bf16.mxu1 (!%p163_p2), %v983_v0  ;;  %vm409_vm2 = vcmask (!%p163_p2), 1039360   ;;  %v541_v61 = vld [vmem:[%s1413_s2 + $0x8] sm:$0xff] (!%p163_p2)  ;;  %v542_v62 = vld [vmem:[%s1413_s2 + $0x10] sm:$0xff] (!%p163_p2)  ;;  %v543_v63 = vld [vmem:[%s1413_s2 + $0x18] sm:$0xff] (!%p163_p2) }
   0x7   : > { %924 = vset.pattern.permute.xlu1 (!%p163_p2), %v983_v0  ;;  %923 = vset.pattern.permute.xlu0 (!%p163_p2), %v983_v0 }
   0xd   : > { %s1417_s16 = smov (!%p188_p3, %s883_s16), 1 }
   0xe   : > { %s912_s17 = smul.u32 80, %s1417_s16 }
  0x10   : > { %s192_s20 = scalar_lea.vmem %s1411_s0, %s912_s17  ;;  %s913_s17 = smul.u32 160, %s1417_s16 }
  0x11   : > { %v204_v1 = vld [vmem:[%s192_s20 + $0x8] sm:$0xff]  ;;  %v209_v2 = vld [vmem:[%s192_s20 + $0x30] sm:$0x3]  ;;  %v203_v3 = vld [vmem:[%s192_s20] sm:$0xff] }
  0x12   : > { %v214_v4 = vpack.c.bf16 %v209_v2, %v204_v1  ;;  %v208_v5 = vld [vmem:[%s192_s20 + $0x28] sm:$0x3]  ;;  %v206_v6 = vld [vmem:[%s192_s20 + $0x18] sm:$0xff]  ;;  %v211_v7 = vld [vmem:[%s192_s20 + $0x40] sm:$0x3]  ;;  %s1310_s19 = scalar_lea.vmem %s1415_s4, %s913_s17 }
  0x13   : > { %v213_v8 = vpack.c.bf16 %v208_v5, %v203_v3  ;;  %v216_v9 = vpack.c.bf16 %v211_v7, %v206_v6  ;;  %v205_v10 = vld [vmem:[%s192_s20 + $0x10] sm:$0xff]  ;;  %v210_v11 = vld [vmem:[%s192_s20 + $0x38] sm:$0x3]  ;;  %v207_v12 = vld [vmem:[%s192_s20 + $0x20] sm:$0xff] }
  0x14   : > { %892 = vmatprep.subr.msk.bf16.mxu0 %vm235_vm0, %v214_v4  ;;  %v215_v13 = vpack.c.bf16 %v210_v11, %v205_v10  ;;  %v212_v14 = vld [vmem:[%s192_s20 + $0x48] sm:$0x3]  ;;  %v586_v2 = vld [vmem:[%s1414_s3 + $0x10] sm:$0xff] }
  0x15   : > { %v237_v15 = vsel %vm235_vm0, %v213_v8, 0  ;;  %895 = vmatprep.subr.msk.bf16.mxu1 %vm235_vm0, %v216_v9  ;;  %v217_v17 = vpack.c.bf16 %v212_v14, %v207_v12  ;;  %v585_v1 = vld [vmem:[%s1414_s3 + $0x8] sm:$0xff] }
  0x16   : > { %252 = vmatpush1.bf16.msra.mxu0 %v237_v15  ;;  %v243_v18 = vsel %vm235_vm0, %v215_v13, 0 }
  0x17   : > { %305 = vmatpush1.bf16.msra.mxu1 %v243_v18  ;;  %911 = vmatprep.subr.msk.bf16.mxu0 %vm235_vm0, %v217_v17  ;;  %v249_v19 = vsel %vm235_vm0, %v217_v17, 0 }
  0x19   : > { %893 = vmatmul.mubr.msk.bf16.vlgmr.msra.gmra.mrb[0].mxu0 %vm228_vm1, %v925_v16 }
  0x1a   : > { %906 = vmatpush3.bf16.msra.mxu0 %v249_v19  ;;  %896 = vmatmul.mubr.msk.bf16.vlgmr.msra.gmra.mrb[0].mxu1 %vm228_vm1, %v925_v16 }
  0x1b   : > { %293 = vmatprep.mubr.bf16.mxu0 %v983_v0  ;;  %346 = vmatprep.mubr.bf16.mxu1 %v983_v0  ;;  %v584_v0 = vld [vmem:[%s1414_s3] sm:$0xff] }
  0x21   : > { %894 = vmatmul.mubr.msk.bf16.gmra.mrb[4].mxu0 %vm228_vm1, %v926_v20 }
  0x22   : > { %897 = vmatmul.mubr.msk.bf16.gmra.mrb[4].mxu1 %vm228_vm1, %v926_v20  ;;  %907 = vmatprep.mubr.msk.bf16.mxu0 %vm228_vm1, %v925_v16 }
  0x29   : > { %908 = vmatmul.mubr.msk.bf16.vlgmr.msra.gmra.mrb[8].mxu0 %vm228_vm1, %v926_v20 }
  0xec   : > { %v1035_v21 = vpop.f32.mrb[0].mxu0 }
  0xed   : > { %v1037_v22 = vpop.f32.mrb[1].mxu0  ;;  %v1039_v23 = vpop.f32.mrb[0].mxu1 }
  0xee   : > { %v406_v24 = vadd.f32 %v1037_v22, %v1035_v21  ;;  %v1043_v25 = vpop.f32.mrb[2].mxu0  ;;  %v1045_v26 = vpop.f32.mrb[1].mxu1 }
  0xef   : > { %v1047_v27 = vpop.f32.mrb[3].mxu0  ;;  %v1049_v28 = vpop.f32.mrb[2].mxu1 }
  0xf0   : > { %v414_v29 = vadd.f32 %v1047_v27, %v1043_v25  ;;  %v407_v30 = vadd.f32 %v406_v24, %v1039_v23  ;;  %v1054_v31 = vpop.f32.mrb[3].mxu1 }
  0xf2   : > { %v408_v32 = vadd.f32 %v407_v30, %v1045_v26  ;;  %v415_v33 = vadd.f32 %v414_v29, %v1049_v28 }
  0xf4   : > { %v416_v34 = vadd.f32 %v415_v33, %v1054_v31  ;;  %v295_v35 = vpop.f32.mrb[4].mxu0 }
  0xf5   : > { %v297_v36 = vpop.f32.mrb[5].mxu0  ;;  %v348_v37 = vpop.f32.mrb[4].mxu1 }
  0xf6   : > { %v421_v38 = vadd.f32 %v297_v36, %v295_v35  ;;  %v299_v39 = vpop.f32.mrb[6].mxu0  ;;  %v350_v40 = vpop.f32.mrb[5].mxu1 }
  0xf7   : > { %v301_v41 = vpop.f32.mrb[7].mxu0  ;;  %v352_v42 = vpop.f32.mrb[6].mxu1 }
  0xf8   : > { %v428_v43 = vadd.f32 %v301_v41, %v299_v39  ;;  %v422_v44 = vadd.f32 %v421_v38, %v348_v37  ;;  %v354_v45 = vpop.f32.mrb[7].mxu1 }
  0xfa   : > { %v423_v46 = vadd.f32 %v422_v44, %v350_v40  ;;  %v429_v47 = vadd.f32 %v428_v43, %v352_v42 }
  0xfc   : > { %v430_v48 = vadd.f32 %v429_v47, %v354_v45  ;;  %v909_v49 = vpop.f32.mrb[8].mxu0 }
  0xfd   : > { %v391_v50 = vpop.f32.mrb[9].mxu0  ;;  %v424_v51 = vsel %vm409_vm2, %v909_v49, 0.0 }
  0xfe   : > { %v910_v52 = vpop.f32.mrb[10].mxu0  ;;  %v425_v53 = vadd.f32 %v424_v51, %v423_v46  ;;  %v410_v54 = vsel %vm409_vm2, %v391_v50, 0.0 }
  0xff   : > { %v431_v55 = vsel %vm409_vm2, %v910_v52, 0.0  ;;  %v1062_v56 = vpop.f32.mrb[11].mxu0  ;;  %v411_v57 = vadd.f32 %v410_v54, %v408_v32 }
 0x100   : > { %v417_v58 = vsel %vm409_vm2, %v1062_v56, 0.0  ;;  %426 = vadd.xlane.f32.xlu1 %v425_v53  ;;  %v432_v59 = vadd.f32 %v431_v55, %v430_v48 }
 0x101   : > { %412 = vadd.xlane.f32.xlu0 %v411_v57  ;;  %v418_v60 = vadd.f32 %v417_v58, %v416_v34 }
 0x104   : > { %433 = vadd.xlane.f32.xlu1 %v432_v59 }
 0x105   : > { %419 = vadd.xlane.f32.xlu0 %v418_v60 }
 0x115   : > { %551 = vperm.xlu1 %924, %v541_v61  }
 0x119   : > { %556 = vperm.xlu1 %924, %v542_v62  }
 0x11d   : > { %561 = vperm.xlu1 %924, %v543_v63  }
 0x121   : > { %590 = vperm.xlu1 %924, %v584_v0  }
 0x125   : > { %595 = vperm.xlu1 %924, %v585_v1  }
 0x129   : > { %600 = vperm.xlu1 %924, %v586_v2  }
 0x18d   : > { %v427_v3 = vpop.xlane.xlu1 %426 }
 0x18e   : > { %v438_v4 = vmul.f32 0.0015649452, %v427_v3  ;;  %v413_v5 = vpop.xlane.xlu0 %412 }
 0x18f   : > { %v436_v6 = vmul.f32 0.0015649452, %v413_v5 }
 0x190   : > { %v1084_v7 = vsub.f32 %v295_v35, %v438_v4  ;;  %v1086_v8 = vsub.f32 %v297_v36, %v438_v4  ;;  %v1088_v9 = vsub.f32 %v348_v37, %v438_v4  ;;  %v1090_v11 = vsub.f32 %v350_v40, %v438_v4 }
 0x191   : > { %v434_v10 = vpop.xlane.xlu1 %433  ;;  %v1092_v12 = vsub.f32 %v909_v49, %v438_v4  ;;  %v1095_v13 = vsub.f32 %v1035_v21, %v436_v6  ;;  %v1102_v18 = vsub.f32 %v1037_v22, %v436_v6  ;;  %v1109_v21 = vsub.f32 %v1039_v23, %v436_v6 }
 0x192   : > { %v439_v14 = vmul.f32 0.0015649452, %v434_v10  ;;  %v420_v15 = vpop.xlane.xlu0 %419  ;;  %v470_v16 = vmul.f32 %v1084_v7, %v1084_v7  ;;  %v471_v17 = vmul.f32 %v1086_v8, %v1086_v8  ;;  %v472_v20 = vmul.f32 %v1088_v9, %v1088_v9  ;;  %v587_v10 = vld [vmem:[%s1414_s3 + $0x18] sm:$0xff] }
 0x193   : > { %v437_v19 = vmul.f32 0.0015649452, %v420_v15  ;;  %v474_v24 = vmul.f32 %v1092_v12, %v1092_v12  ;;  %v473_v22 = vmul.f32 %v1090_v11, %v1090_v11  ;;  %v1123_v36 = vsub.f32 %v391_v50, %v436_v6 }
 0x194   : > { %v494_v29 = vadd.f32 %v471_v17, %v470_v16  ;;  %v1111_v30 = vsub.f32 %v299_v39, %v439_v14  ;;  %v1113_v32 = vsub.f32 %v301_v41, %v439_v14  ;;  %v1115_v33 = vsub.f32 %v352_v42, %v439_v14 }
 0x195   : > { %v1119_v34 = vsub.f32 %v354_v45, %v439_v14  ;;  %v1121_v35 = vsub.f32 %v910_v52, %v439_v14  ;;  %v1130_v39 = vsub.f32 %v1045_v26, %v436_v6  ;;  %v497_v40 = vsel %vm409_vm2, %v474_v24, 0.0  ;;  %v540_v14 = vld [vmem:[%s1413_s2] sm:$0xff]  ;;  %v1183_v15 = vpop.permute.xlu1 %551 }
 0x196   : > { %v495_v37 = vadd.f32 %v494_v29, %v472_v20  ;;  %v475_v23 = vmul.f32 %v1111_v30, %v1111_v30  ;;  %v476_v38 = vmul.f32 %v1113_v32, %v1113_v32  ;;  %v477_v41 = vmul.f32 %v1115_v33, %v1115_v33 }
 0x197   : > { %v460_v42 = vmul.f32 %v1095_v13, %v1095_v13  ;;  %v461_v43 = vmul.f32 %v1102_v18, %v1102_v18  ;;  %v478_v45 = vmul.f32 %v1119_v34, %v1119_v34  ;;  %v479_v46 = vmul.f32 %v1121_v35, %v1121_v35 }
 0x198   : > { %v496_v44 = vadd.f32 %v495_v37, %v473_v22  ;;  %v501_v26 = vadd.f32 %v476_v38, %v475_v23  ;;  %v462_v47 = vmul.f32 %v1109_v21, %v1109_v21  ;;  %v464_v48 = vmul.f32 %v1123_v36, %v1123_v36 }
 0x199   : > { %v480_v49 = vadd.f32 %v461_v43, %v460_v42  ;;  %v1148_v50 = vsub.f32 %v1043_v25, %v437_v19  ;;  %v1151_v53 = vsub.f32 %v1047_v27, %v437_v19  ;;  %v1154_v54 = vsub.f32 %v1049_v28, %v437_v19  ;;  %v557_v16 = vpop.permute.xlu1 %556 }
 0x19a   : > { %v498_v51 = vadd.f32 %v497_v40, %v496_v44  ;;  %v502_v52 = vadd.f32 %v501_v26, %v477_v41  ;;  %v463_v55 = vmul.f32 %v1130_v39, %v1130_v39  ;;  %v1159_v58 = vsub.f32 %v1062_v56, %v437_v19 }
 0x19b   : > { %v481_v57 = vadd.f32 %v480_v49, %v462_v47  ;;  %v1162_v25 = vsub.f32 %v1054_v31, %v437_v19  ;;  %v465_v60 = vmul.f32 %v1148_v50, %v1148_v50  ;;  %v466_v27 = vmul.f32 %v1151_v53, %v1151_v53 }
 0x19c   : > { %499 = vadd.xlane.f32.xlu0 %v498_v51  ;;  %v503_v59 = vadd.f32 %v502_v52, %v478_v45  ;;  %v504_v28 = vsel %vm409_vm2, %v479_v46, 0.0  ;;  %v483_v63 = vsel %vm409_vm2, %v464_v48, 0.0  ;;  %v467_v56 = vmul.f32 %v1154_v54, %v1154_v54 }
 0x19d   : > { %v482_v61 = vadd.f32 %v481_v57, %v463_v55  ;;  %v487_v0 = vadd.f32 %v466_v27, %v465_v60  ;;  %v469_v31 = vmul.f32 %v1159_v58, %v1159_v58  ;;  %v468_v2 = vmul.f32 %v1162_v25, %v1162_v25  ;;  %v1185_v17 = vpop.permute.xlu1 %561 }
 0x19e   : > { %v505_v62 = vadd.f32 %v504_v28, %v503_v59 }
 0x19f   : > { %v484_v1 = vadd.f32 %v483_v63, %v482_v61  ;;  %v488_v3 = vadd.f32 %v487_v0, %v467_v56  ;;  %v490_v5 = vsel %vm409_vm2, %v469_v31, 0.0 }
 0x1a0   : > { %506 = vadd.xlane.f32.xlu1 %v505_v62 }
 0x1a1   : > { %485 = vadd.xlane.f32.xlu0 %v484_v1  ;;  %v489_v4 = vadd.f32 %v488_v3, %v468_v2  ;;  %v1187_v19 = vpop.permute.xlu1 %590 }
 0x1a3   : > { %v491_v6 = vadd.f32 %v490_v5, %v489_v4 }
 0x1a5   : > { %492 = vadd.xlane.f32.xlu1 %v491_v6  ;;  %v1189_v20 = vpop.permute.xlu1 %595 }
 0x1a9   : > { %v601_v24 = vpop.permute.xlu1 %600 }
 0x1b6   : > { %605 = vperm.xlu1 %924, %v587_v10  }
 0x1b7   : > { %546 = vperm.xlu0 %923, %v540_v14  }
 0x229   : > { %v500_v29 = vpop.xlane.xlu0 %499 }
 0x22a   : > { %v510_v22 = vmul.f32 0.0015649452, %v500_v29 }
 0x22c   : > { %v514_v37 = vadd.f32 1e-05, %v510_v22 }
 0x22d   : > { %v507_v23 = vpop.xlane.xlu1 %506 }
 0x22e   : > { %927 = vrsqrt.f32 %v514_v37  ;;  %v511_v38 = vmul.f32 0.0015649452, %v507_v23  ;;  %v486_v41 = vpop.xlane.xlu0 %485 }
 0x22f   : > { %v508_v43 = vmul.f32 0.0015649452, %v486_v41 }
 0x230   : > { %v515_v40 = vadd.f32 1e-05, %v511_v38 }
 0x231   : > { %v512_v26 = vadd.f32 1e-05, %v508_v43 }
 0x232   : > { %929 = vrsqrt.f32 %v515_v40  ;;  %v493_v42 = vpop.xlane.xlu1 %492 }
 0x233   : > { %v509_v44 = vmul.f32 0.0015649452, %v493_v42 }
 0x235   : > { %v513_v45 = vadd.f32 1e-05, %v509_v44 }
 0x237   : > { %931 = vrsqrt.f32 %v513_v45 }
 0x238   : > { %v928_v46 = vpop.eup %927  ;;  %933 = vrsqrt.f32 %v512_v26 }
 0x239   : > { %v530_v47 = vmul.f32 %v928_v46, %v1084_v7  ;;  %v531_v48 = vmul.f32 %v928_v46, %v1086_v8  ;;  %v532_v49 = vmul.f32 %v928_v46, %v1088_v9  ;;  %v533_v51 = vmul.f32 %v928_v46, %v1090_v11 }
 0x23a   : > { %v534_v52 = vmul.f32 %v928_v46, %v1092_v12 }
 0x23b   : > { %v574_v55 = vmul.f32 %v557_v16, %v530_v47  ;;  %v575_v57 = vmul.f32 %v557_v16, %v531_v48  ;;  %v576_v59 = vmul.f32 %v557_v16, %v532_v49  ;;  %v577_v60 = vmul.f32 %v557_v16, %v533_v51 }
 0x23c   : > { %v930_v27 = vpop.eup %929  ;;  %v578_v28 = vmul.f32 %v557_v16, %v534_v52 }
 0x23d   : > { %v1196_v61 = vadd.f32 %v601_v24, %v574_v55  ;;  %v1198_v62 = vadd.f32 %v601_v24, %v575_v57  ;;  %v1200_v7 = vadd.f32 %v601_v24, %v576_v59  ;;  %v1202_v8 = vadd.f32 %v601_v24, %v577_v60 }
 0x23e   : > { %v1204_v9 = vadd.f32 %v601_v24, %v578_v28  ;;  %v535_v11 = vmul.f32 %v930_v27, %v1111_v30  ;;  %v536_v12 = vmul.f32 %v930_v27, %v1113_v32  ;;  %v537_v63 = vmul.f32 %v930_v27, %v1115_v33 }
 0x23f   : > { %v638_v56 = vmul.f32 %v1196_v61, %v1196_v61  ;;  %v639_v0 = vmul.f32 %v1198_v62, %v1198_v62  ;;  %v640_v1 = vmul.f32 %v1200_v7, %v1200_v7  ;;  %v641_v31 = vmul.f32 %v1202_v8, %v1202_v8 }
 0x240   : > { %v642_v2 = vmul.f32 %v1204_v9, %v1204_v9  ;;  %v538_v30 = vmul.f32 %v930_v27, %v1119_v34  ;;  %v539_v32 = vmul.f32 %v930_v27, %v1121_v35  ;;  %v579_v33 = vmul.f32 %v1185_v17, %v535_v11 }
 0x241   : > { %v658_v3 = vmul.f32 %v638_v56, %v1196_v61  ;;  %v659_v4 = vmul.f32 %v639_v0, %v1198_v62  ;;  %v660_v5 = vmul.f32 %v640_v1, %v1200_v7  ;;  %v661_v6 = vmul.f32 %v641_v31, %v1202_v8  ;;  %v932_v10 = vpop.eup %931  ;;  %v606_v56 = vpop.permute.xlu1 %605 }
 0x242   : > { %v662_v14 = vmul.f32 %v642_v2, %v1204_v9  ;;  %v580_v16 = vmul.f32 %v1185_v17, %v536_v12  ;;  %v581_v24 = vmul.f32 %v1185_v17, %v537_v63  ;;  %v582_v34 = vmul.f32 %v1185_v17, %v538_v30  ;;  %v1237_v46 = vpop.eup %933 }
 0x243   : > { %v678_v35 = vmul.f32 0.044715, %v658_v3  ;;  %v679_v29 = vmul.f32 0.044715, %v659_v4  ;;  %v680_v22 = vmul.f32 0.044715, %v660_v5  ;;  %v525_v37 = vmul.f32 %v932_v10, %v1148_v50 }
 0x244   : > { %v681_v23 = vmul.f32 0.044715, %v661_v6  ;;  %v682_v38 = vmul.f32 0.044715, %v662_v14  ;;  %v526_v40 = vmul.f32 %v932_v10, %v1151_v53  ;;  %v527_v41 = vmul.f32 %v932_v10, %v1154_v54 }
 0x245   : > { %v698_v42 = vadd.f32 %v678_v35, %v1196_v61  ;;  %v699_v43 = vadd.f32 %v679_v29, %v1198_v62  ;;  %v700_v44 = vadd.f32 %v680_v22, %v1200_v7  ;;  %v528_v45 = vmul.f32 %v932_v10, %v1162_v25 }
 0x246   : > { %v701_v26 = vadd.f32 %v681_v23, %v1202_v8  ;;  %v702_v50 = vadd.f32 %v682_v38, %v1204_v9  ;;  %v529_v47 = vmul.f32 %v932_v10, %v1159_v58  ;;  %v569_v53 = vmul.f32 %v1183_v15, %v525_v37 }
 0x247   : > { %v718_v48 = vmul.f32 0.7978846, %v698_v42  ;;  %v719_v54 = vmul.f32 0.7978846, %v699_v43  ;;  %v720_v49 = vmul.f32 0.7978846, %v700_v44  ;;  %v570_v51 = vmul.f32 %v1183_v15, %v526_v40 }
 0x248   : > { %v721_v52 = vmul.f32 0.7978846, %v701_v26  ;;  %v722_v55 = vmul.f32 0.7978846, %v702_v50  ;;  %v571_v57 = vmul.f32 %v1183_v15, %v527_v41  ;;  %v572_v25 = vmul.f32 %v1183_v15, %v528_v45 }
 0x249   : > { %935 = vtanh.f32 %v718_v48  ;;  %v573_v59 = vmul.f32 %v1183_v15, %v529_v47  ;;  %v1248_v60 = vadd.f32 %v1189_v20, %v569_v53  ;;  %v1251_v58 = vadd.f32 %v1189_v20, %v570_v51 }
 0x24a   : > { %937 = vtanh.f32 %v719_v54  ;;  %v1254_v27 = vadd.f32 %v1189_v20, %v571_v57  ;;  %v1257_v28 = vadd.f32 %v1189_v20, %v572_v25  ;;  %v583_v11 = vmul.f32 %v1185_v17, %v539_v32 }
 0x24b   : > { %939 = vtanh.f32 %v720_v49  ;;  %v1261_v12 = vadd.f32 %v1189_v20, %v573_v59  ;;  %v633_v15 = vmul.f32 %v1248_v60, %v1248_v60  ;;  %v634_v63 = vmul.f32 %v1251_v58, %v1251_v58 }
 0x24c   : > { %941 = vtanh.f32 %v721_v52  ;;  %v635_v0 = vmul.f32 %v1254_v27, %v1254_v27  ;;  %v636_v1 = vmul.f32 %v1257_v28, %v1257_v28  ;;  %v1271_v31 = vadd.f32 %v606_v56, %v579_v33 }
 0x24d   : > { %943 = vtanh.f32 %v722_v55  ;;  %v637_v17 = vmul.f32 %v1261_v12, %v1261_v12  ;;  %v653_v20 = vmul.f32 %v633_v15, %v1248_v60  ;;  %v654_v2 = vmul.f32 %v634_v63, %v1251_v58 }
 0x24e   : > { %v655_v30 = vmul.f32 %v635_v0, %v1254_v27  ;;  %v656_v32 = vmul.f32 %v636_v1, %v1257_v28  ;;  %v1279_v3 = vadd.f32 %v606_v56, %v580_v16  ;;  %v1281_v4 = vadd.f32 %v606_v56, %v581_v24 }
 0x24f   : > { %v657_v5 = vmul.f32 %v637_v17, %v1261_v12  ;;  %v673_v33 = vmul.f32 0.044715, %v653_v20  ;;  %v674_v6 = vmul.f32 0.044715, %v654_v2  ;;  %v1284_v10 = vadd.f32 %v606_v56, %v582_v34 }
 0x250   : > { %v675_v14 = vmul.f32 0.044715, %v655_v30  ;;  %v676_v35 = vmul.f32 0.044715, %v656_v32  ;;  %v1286_v29 = vadd.f32 %v606_v56, %v583_v11  ;;  %v643_v22 = vmul.f32 %v1271_v31, %v1271_v31 }
 0x251   : > { %v677_v37 = vmul.f32 0.044715, %v657_v5  ;;  %v693_v16 = vadd.f32 %v673_v33, %v1248_v60  ;;  %v694_v24 = vadd.f32 %v674_v6, %v1251_v58  ;;  %v644_v23 = vmul.f32 %v1279_v3, %v1279_v3 }
 0x252   : > { %v695_v38 = vadd.f32 %v675_v14, %v1254_v27  ;;  %v696_v34 = vadd.f32 %v676_v35, %v1257_v28  ;;  %v645_v40 = vmul.f32 %v1281_v4, %v1281_v4  ;;  %v646_v41 = vmul.f32 %v1284_v10, %v1284_v10 }
 0x253   : > { %v936_v42 = vpop.eup %935  ;;  %v697_v43 = vadd.f32 %v677_v37, %v1261_v12  ;;  %v713_v44 = vmul.f32 0.7978846, %v693_v16  ;;  %v714_v45 = vmul.f32 0.7978846, %v694_v24  ;;  %v647_v26 = vmul.f32 %v1286_v29, %v1286_v29 }
 0x254   : > { %v938_v50 = vpop.eup %937  ;;  %v758_v47 = vadd.f32 1.0, %v936_v42  ;;  %v715_v53 = vmul.f32 0.7978846, %v695_v38  ;;  %v716_v48 = vmul.f32 0.7978846, %v696_v34  ;;  %v663_v54 = vmul.f32 %v643_v22, %v1271_v31 }
 0x255   : > { %v940_v49 = vpop.eup %939  ;;  %v759_v51 = vadd.f32 1.0, %v938_v50  ;;  %v717_v52 = vmul.f32 0.7978846, %v697_v43  ;;  %945 = vtanh.f32 %v713_v44  ;;  %v664_v55 = vmul.f32 %v644_v23, %v1279_v3 }
 0x256   : > { %v942_v57 = vpop.eup %941  ;;  %v760_v25 = vadd.f32 1.0, %v940_v49  ;;  %v778_v59 = vmul.f32 0.5, %v758_v47  ;;  %947 = vtanh.f32 %v714_v45  ;;  %v665_v11 = vmul.f32 %v645_v40, %v1281_v4  ;;  %v547_v40 = vpop.permute.xlu0 %546 }
 0x257   : > { %v944_v15 = vpop.eup %943  ;;  %v761_v63 = vadd.f32 1.0, %v942_v57  ;;  %v779_v56 = vmul.f32 0.5, %v759_v51  ;;  %949 = vtanh.f32 %v715_v53  ;;  %v666_v0 = vmul.f32 %v646_v41, %v1284_v10 }
 0x258   : > { %v762_v1 = vadd.f32 1.0, %v944_v15  ;;  %v780_v17 = vmul.f32 0.5, %v760_v25  ;;  %v798_v20 = vmul.f32 %v778_v59, %v1196_v61  ;;  %951 = vtanh.f32 %v716_v48 }
 0x259   : > { %v781_v2 = vmul.f32 0.5, %v761_v63  ;;  %v799_v30 = vmul.f32 %v779_v56, %v1198_v62  ;;  %953 = vtanh.f32 %v717_v52  ;;  %v667_v32 = vmul.f32 %v647_v26, %v1286_v29 }
 0x25a   : > { %v782_v5 = vmul.f32 0.5, %v762_v1  ;;  %v800_v33 = vmul.f32 %v780_v17, %v1200_v7  ;;  %818 = vst [vmem:[%s1310_s19 + $0x50] sm:$0xff] %v798_v20  ;;  %v683_v6 = vmul.f32 0.044715, %v663_v54  ;;  %v684_v14 = vmul.f32 0.044715, %v664_v55 }
 0x25b   : > { %v801_v35 = vmul.f32 %v781_v2, %v1202_v8  ;;  %819 = vst [vmem:[%s1310_s19 + $0x58] sm:$0xff] %v799_v30  ;;  %v685_v61 = vmul.f32 0.044715, %v665_v11  ;;  %v686_v22 = vmul.f32 0.044715, %v666_v0  ;;  %v520_v7 = vmul.f32 %v1237_v46, %v1095_v13 }
 0x25c   : > { %v687_v37 = vmul.f32 0.044715, %v667_v32  ;;  %v802_v16 = vmul.f32 %v782_v5, %v1204_v9  ;;  %820 = vst [vmem:[%s1310_s19 + $0x60] sm:$0xff] %v800_v33  ;;  %v703_v62 = vadd.f32 %v683_v6, %v1271_v31  ;;  %v704_v24 = vadd.f32 %v684_v14, %v1279_v3 }
 0x25d   : > { %821 = vst [vmem:[%s1310_s19 + $0x68] sm:$0xff] %v801_v35  ;;  %v705_v23 = vadd.f32 %v685_v61, %v1281_v4  ;;  %v706_v8 = vadd.f32 %v686_v22, %v1284_v10  ;;  %v521_v34 = vmul.f32 %v1237_v46, %v1102_v18  ;;  %v522_v42 = vmul.f32 %v1237_v46, %v1109_v21 }
 0x25e   : > { %v707_v38 = vadd.f32 %v687_v37, %v1286_v29  ;;  %822 = vst.msk [vmem:[%s1310_s19 + $0x70] sm:$0xff] %vm409_vm2, %v802_v16  ;;  %v723_v9 = vmul.f32 0.7978846, %v703_v62  ;;  %v724_v41 = vmul.f32 0.7978846, %v704_v24  ;;  %v523_v13 = vmul.f32 %v1237_v46, %v1130_v39 }
 0x25f   : > { %v946_v43 = vpop.eup %945  ;;  %v725_v44 = vmul.f32 0.7978846, %v705_v23  ;;  %v726_v45 = vmul.f32 0.7978846, %v706_v8  ;;  %v524_v50 = vmul.f32 %v1237_v46, %v1123_v36  ;;  %v564_v53 = vmul.f32 %v547_v40, %v520_v7 }
 0x260   : > { %v727_v26 = vmul.f32 0.7978846, %v707_v38  ;;  %v948_v47 = vpop.eup %947  ;;  %v753_v18 = vadd.f32 1.0, %v946_v43  ;;  %955 = vtanh.f32 %v723_v9  ;;  %v565_v48 = vmul.f32 %v547_v40, %v521_v34 }
 0x261   : > { %v950_v54 = vpop.eup %949  ;;  %v754_v49 = vadd.f32 1.0, %v948_v47  ;;  %957 = vtanh.f32 %v724_v41  ;;  %v566_v51 = vmul.f32 %v547_v40, %v522_v42  ;;  %v567_v21 = vmul.f32 %v547_v40, %v523_v13 }
 0x262   : > { %v952_v52 = vpop.eup %951  ;;  %v755_v55 = vadd.f32 1.0, %v950_v54  ;;  %v773_v39 = vmul.f32 0.5, %v753_v18  ;;  %959 = vtanh.f32 %v725_v44  ;;  %v568_v57 = vmul.f32 %v547_v40, %v524_v50 }
 0x263   : > { %v954_v25 = vpop.eup %953  ;;  %v756_v59 = vadd.f32 1.0, %v952_v52  ;;  %v774_v11 = vmul.f32 0.5, %v754_v49  ;;  %961 = vtanh.f32 %v726_v45  ;;  %v1341_v36 = vadd.f32 %v1187_v19, %v564_v53 }
 0x264   : > { %v757_v46 = vadd.f32 1.0, %v954_v25  ;;  %v775_v15 = vmul.f32 0.5, %v755_v55  ;;  %v793_v63 = vmul.f32 %v773_v39, %v1248_v60  ;;  %963 = vtanh.f32 %v727_v26 }
 0x265   : > { %v776_v56 = vmul.f32 0.5, %v756_v59  ;;  %v794_v0 = vmul.f32 %v774_v11, %v1251_v58  ;;  %v1346_v1 = vadd.f32 %v1187_v19, %v565_v48  ;;  %v1349_v17 = vadd.f32 %v1187_v19, %v566_v51 }
 0x266   : > { %v777_v20 = vmul.f32 0.5, %v757_v46  ;;  %v795_v2 = vmul.f32 %v775_v15, %v1254_v27  ;;  %813 = vst [vmem:[%s1310_s19 + $0x28] sm:$0xff] %v793_v63  ;;  %v1354_v30 = vadd.f32 %v1187_v19, %v567_v21  ;;  %v1357_v60 = vadd.f32 %v1187_v19, %v568_v57 }
 0x267   : > { %v796_v58 = vmul.f32 %v776_v56, %v1257_v28  ;;  %814 = vst [vmem:[%s1310_s19 + $0x30] sm:$0xff] %v794_v0  ;;  %v628_v32 = vmul.f32 %v1341_v36, %v1341_v36  ;;  %v629_v5 = vmul.f32 %v1346_v1, %v1346_v1  ;;  %v630_v27 = vmul.f32 %v1349_v17, %v1349_v17 }
 0x268   : > { %v797_v33 = vmul.f32 %v777_v20, %v1261_v12  ;;  %815 = vst [vmem:[%s1310_s19 + $0x38] sm:$0xff] %v795_v2  ;;  %v631_v6 = vmul.f32 %v1354_v30, %v1354_v30  ;;  %v632_v19 = vmul.f32 %v1357_v60, %v1357_v60 }
 0x269   : > { %816 = vst [vmem:[%s1310_s19 + $0x40] sm:$0xff] %v796_v58  ;;  %v648_v28 = vmul.f32 %v628_v32, %v1341_v36  ;;  %v649_v14 = vmul.f32 %v629_v5, %v1346_v1  ;;  %v650_v35 = vmul.f32 %v630_v27, %v1349_v17 }
 0x26a   : > { %v956_v61 = vpop.eup %955  ;;  %817 = vst.msk [vmem:[%s1310_s19 + $0x48] sm:$0xff] %vm409_vm2, %v797_v33  ;;  %v651_v22 = vmul.f32 %v631_v6, %v1354_v30  ;;  %v652_v12 = vmul.f32 %v632_v19, %v1357_v60 }
 0x26b   : > { %v958_v37 = vpop.eup %957  ;;  %v763_v16 = vadd.f32 1.0, %v956_v61  ;;  %v668_v62 = vmul.f32 0.044715, %v648_v28  ;;  %v669_v24 = vmul.f32 0.044715, %v649_v14 }
 0x26c   : > { %v960_v7 = vpop.eup %959  ;;  %v764_v23 = vadd.f32 1.0, %v958_v37  ;;  %v670_v8 = vmul.f32 0.044715, %v650_v35  ;;  %v671_v38 = vmul.f32 0.044715, %v651_v22 }
 0x26d   : > { %v962_v34 = vpop.eup %961  ;;  %v765_v40 = vadd.f32 1.0, %v960_v7  ;;  %v783_v9 = vmul.f32 0.5, %v763_v16  ;;  %v672_v41 = vmul.f32 0.044715, %v652_v12  ;;  %v688_v42 = vadd.f32 %v668_v62, %v1341_v36 }
 0x26e   : > { %v964_v13 = vpop.eup %963  ;;  %v766_v43 = vadd.f32 1.0, %v962_v34  ;;  %v784_v44 = vmul.f32 0.5, %v764_v23  ;;  %v689_v45 = vadd.f32 %v669_v24, %v1346_v1  ;;  %v690_v26 = vadd.f32 %v670_v8, %v1349_v17 }
 0x26f   : > { %v767_v50 = vadd.f32 1.0, %v964_v13  ;;  %v785_v47 = vmul.f32 0.5, %v765_v40  ;;  %v803_v18 = vmul.f32 %v783_v9, %v1271_v31  ;;  %v691_v53 = vadd.f32 %v671_v38, %v1354_v30 }
 0x270   : > { %v786_v48 = vmul.f32 0.5, %v766_v43  ;;  %v804_v54 = vmul.f32 %v784_v44, %v1279_v3  ;;  %v692_v49 = vadd.f32 %v672_v41, %v1357_v60  ;;  %v708_v51 = vmul.f32 0.7978846, %v688_v42 }
 0x271   : > { %v787_v21 = vmul.f32 0.5, %v767_v50  ;;  %v805_v52 = vmul.f32 %v785_v47, %v1281_v4  ;;  %823 = vst [vmem:[%s1310_s19 + $0x78] sm:$0xff] %v803_v18  ;;  %v709_v55 = vmul.f32 0.7978846, %v689_v45  ;;  %v710_v39 = vmul.f32 0.7978846, %v690_v26 }
 0x272   : > { %v806_v57 = vmul.f32 %v786_v48, %v1284_v10  ;;  %824 = vst [vmem:[%s1310_s19 + $0x80] sm:$0xff] %v804_v54  ;;  %v711_v31 = vmul.f32 0.7978846, %v691_v53  ;;  %v712_v25 = vmul.f32 0.7978846, %v692_v49  ;;  %965 = vtanh.f32 %v708_v51 }
 0x273   : > { %v807_v59 = vmul.f32 %v787_v21, %v1286_v29  ;;  %825 = vst [vmem:[%s1310_s19 + $0x88] sm:$0xff] %v805_v52  ;;  %967 = vtanh.f32 %v709_v55 }
 0x274   : > { %826 = vst [vmem:[%s1310_s19 + $0x90] sm:$0xff] %v806_v57  ;;  %969 = vtanh.f32 %v710_v39 }
 0x275   : > { %827 = vst.msk [vmem:[%s1310_s19 + $0x98] sm:$0xff] %vm409_vm2, %v807_v59  ;;  %971 = vtanh.f32 %v711_v31 }
 0x276   : > { %973 = vtanh.f32 %v712_v25 }
 0x27c   : > { %v966_v3 = vpop.eup %965 }
 0x27d   : > { %v968_v4 = vpop.eup %967  ;;  %v748_v11 = vadd.f32 1.0, %v966_v3 }
 0x27e   : > { %v970_v46 = vpop.eup %969  ;;  %v749_v10 = vadd.f32 1.0, %v968_v4 }
 0x27f   : > { %v972_v15 = vpop.eup %971  ;;  %v750_v63 = vadd.f32 1.0, %v970_v46  ;;  %v768_v56 = vmul.f32 0.5, %v748_v11 }
 0x280   : > { %v974_v29 = vpop.eup %973  ;;  %v751_v0 = vadd.f32 1.0, %v972_v15  ;;  %v769_v20 = vmul.f32 0.5, %v749_v10 }
 0x281   : > { %v752_v2 = vadd.f32 1.0, %v974_v29  ;;  %v770_v58 = vmul.f32 0.5, %v750_v63  ;;  %v788_v32 = vmul.f32 %v768_v56, %v1341_v36 }
 0x282   : > { %v771_v5 = vmul.f32 0.5, %v751_v0  ;;  %v789_v27 = vmul.f32 %v769_v20, %v1346_v1 }
 0x283   : > { %v772_v33 = vmul.f32 0.5, %v752_v2  ;;  %v790_v6 = vmul.f32 %v770_v58, %v1349_v17  ;;  %808 = vst [vmem:[%s1310_s19] sm:$0xff] %v788_v32 }
 0x284   : > { %v791_v19 = vmul.f32 %v771_v5, %v1354_v30  ;;  %809 = vst [vmem:[%s1310_s19 + $0x8] sm:$0xff] %v789_v27 }
 0x285   : > { %v792_v28 = vmul.f32 %v772_v33, %v1357_v60  ;;  %810 = vst [vmem:[%s1310_s19 + $0x10] sm:$0xff] %v790_v6 }
 0x286   : > { %811 = vst [vmem:[%s1310_s19 + $0x18] sm:$0xff] %v791_v19 }
 0x287   : > { %812 = vst.msk [vmem:[%s1310_s19 + $0x20] sm:$0xff] %vm409_vm2, %v792_v28 }
 0x288 PF: > { %s14_s15 = sadd.s32 1, %s981_s15  }
 0x289   : > { %p11_p4 = scmp.ge.s32.totalorder %s14_s15, 4  }
 0x28b   :  { %13 = sbr.rel (!%p11_p4) target bundleno = 1 (0x1), region = 66 }

// kernel: wav2vec2_emotion_forward.9
= control target key start
LH: loop header
LB: loop body
LE: loop exit
PB: predicated region body
PF: predicated region fallthrough
CT: control target
= control target key end

     0   :  { %s598_s9 = smov 0   ;;  %s775_s0 = inlined_call_operand.vmem [shape: f32[2,96,319], index: 0, kind: input, shape index: {}]   ;;  %s776_s1 = inlined_call_operand.vmem [shape: bf16[32,96], index: 1, kind: input, shape index: {}]   ;;  %s777_s2 = inlined_call_operand.vmem [shape: f32[2,32,319], index: 2, kind: output, shape index: {}]  }
   0x1 LB: > { %s498_s10 = sadd.s32 4294967295, %s580_s9   ;;  %p502_p0 = scmp.ge.s32.totalorder %s580_s9, 1  ;;  %s580_s9 = sphi %s598_s9, %s12_s9  }
   0x2   : > { %p112_p1 = scmp.lt.s32.totalorder %s580_s9, 3 }
   0x4   : > { %p113_p2 = pnand %p502_p0, %p112_p1 }
   0x5   : > { %p134_p3 = scmp.lt.s32.totalorder (!%p113_p2), %s498_s10, 1  ;;  %v582_v0 = vmov (!%p113_p2), 0   ;;  %v610_v1 = vld [vmem:[%s776_s1] sm:$0xff] (!%p113_p2)   ;;  %vm213_vm0 = vcmask (!%p113_p2), 785408   ;;  %v549_v56 = vld [vmem:[%s776_s1 + $0x8] sm:$0xff] (!%p113_p2)   ;;  %vm432_vm1 = vcmask (!%p113_p2), 515072  }
   0x6   : > { %116 = sbr.rel (%p113_p2) target bundleno = 298 (0x12a), region = 28  ;;  %252 = vmatprep.mubr.bf16.mxu0 (!%p113_p2), %v582_v0  ;;  %533 = vmatprep.mubr.msk.bf16.mxu1 (!%p113_p2), %vm213_vm0, %v610_v1 }
   0xd   : > { %s779_s10 = smov (!%p134_p3, %s498_s10), 1 }
   0xe   : > { %s537_s13 = smul.u32 288, %s779_s10 }
   0xf   : > { %s538_s19 = smul.u32 96, %s779_s10 }
  0x10   : > { %s620_s16 = scalar_lea.vmem %s775_s0, %s537_s13 }
  0x11   : > { %v150_v2 = vld [vmem:[%s620_s16 + $0x8] sm:$0xff]  ;;  %v153_v3 = vld [vmem:[%s620_s16 + $0x20] sm:$0xff]  ;;  %v151_v4 = vld [vmem:[%s620_s16 + $0x10] sm:$0xff]  ;;  %s742_s22 = scalar_lea.vmem %s777_s2, %s538_s19 }
  0x12   : > { %v186_v5 = vpack.c.bf16 %v153_v3, %v150_v2  ;;  %v154_v6 = vld [vmem:[%s620_s16 + $0x28] sm:$0xff]  ;;  %v149_v7 = vld [vmem:[%s620_s16] sm:$0xff]  ;;  %v152_v8 = vld [vmem:[%s620_s16 + $0x18] sm:$0xff] }
  0x13   : > { %v187_v9 = vpack.c.bf16 %v154_v6, %v151_v4  ;;  %v185_v10 = vpack.c.bf16 %v152_v8, %v149_v7  ;;  %v156_v11 = vld [vmem:[%s620_s16 + $0x38] sm:$0xff]  ;;  %v159_v12 = vld [vmem:[%s620_s16 + $0x50] sm:$0xff]  ;;  %v157_v13 = vld [vmem:[%s620_s16 + $0x40] sm:$0xff] }
  0x14   : > { %220 = vmatprep.subr.bf16.mxu0 %v186_v5  ;;  %v189_v14 = vpack.c.bf16 %v159_v12, %v156_v11  ;;  %v160_v15 = vld [vmem:[%s620_s16 + $0x58] sm:$0xff]  ;;  %v155_v16 = vld [vmem:[%s620_s16 + $0x30] sm:$0xff]  ;;  %v158_v17 = vld [vmem:[%s620_s16 + $0x48] sm:$0xff] }
  0x15   : > { %521 = vmatprep.subr.bf16.mxu1 %v187_v9  ;;  %221 = vmatpush1.bf16.msra.mxu0 %v185_v10  ;;  %v190_v18 = vpack.c.bf16 %v160_v15, %v157_v13  ;;  %v188_v19 = vpack.c.bf16 %v158_v17, %v155_v16  ;;  %v162_v20 = vld [vmem:[%s620_s16 + $0x68] sm:$0xff]  ;;  %v165_v21 = vld [vmem:[%s620_s16 + $0x80] sm:$0xff]  ;;  %v163_v22 = vld [vmem:[%s620_s16 + $0x70] sm:$0xff] }
  0x16   : > { %522 = vmatpush3.bf16.msra.mxu1 %v187_v9  ;;  %222 = vmatprep.subr.bf16.mxu0 %v189_v14  ;;  %v192_v23 = vpack.c.bf16 %v165_v21, %v162_v20  ;;  %v166_v24 = vld [vmem:[%s620_s16 + $0x88] sm:$0xff]  ;;  %v161_v25 = vld [vmem:[%s620_s16 + $0x60] sm:$0xff]  ;;  %v164_v26 = vld [vmem:[%s620_s16 + $0x78] sm:$0xff] }
  0x17   : > { %523 = vmatprep.subr.bf16.mxu1 %v190_v18  ;;  %v193_v27 = vpack.c.bf16 %v166_v24, %v163_v22  ;;  %v168_v28 = vld [vmem:[%s620_s16 + $0x98] sm:$0xff]  ;;  %v171_v29 = vld [vmem:[%s620_s16 + $0xb0] sm:$0xff]  ;;  %v169_v30 = vld [vmem:[%s620_s16 + $0xa0] sm:$0xff]  ;;  %v191_v32 = vpack.c.bf16 %v164_v26, %v161_v25 }
  0x18   : > { %v172_v31 = vld [vmem:[%s620_s16 + $0xb8] sm:$0xff]  ;;  %v195_v33 = vpack.c.bf16 %v171_v29, %v168_v28  ;;  %v167_v34 = vld [vmem:[%s620_s16 + $0x90] sm:$0xff]  ;;  %v170_v35 = vld [vmem:[%s620_s16 + $0xa8] sm:$0xff] }
  0x19   : > { %223 = vmatpush1.bf16.msra.mxu0 %v188_v19  ;;  %v196_v36 = vpack.c.bf16 %v172_v31, %v169_v30  ;;  %v174_v37 = vld [vmem:[%s620_s16 + $0xc8] sm:$0xff]  ;;  %v177_v38 = vld [vmem:[%s620_s16 + $0xe0] sm:$0xff]  ;;  %v175_v39 = vld [vmem:[%s620_s16 + $0xd0] sm:$0xff]  ;;  %v194_v41 = vpack.c.bf16 %v170_v35, %v167_v34 }
  0x1a   : > { %524 = vmatpush3.bf16.msra.mxu1 %v190_v18  ;;  %224 = vmatprep.subr.bf16.mxu0 %v192_v23  ;;  %v178_v40 = vld [vmem:[%s620_s16 + $0xe8] sm:$0xff]  ;;  %v198_v42 = vpack.c.bf16 %v177_v38, %v174_v37  ;;  %v173_v43 = vld [vmem:[%s620_s16 + $0xc0] sm:$0xff]  ;;  %v176_v44 = vld [vmem:[%s620_s16 + $0xd8] sm:$0xff] }
  0x1b   : > { %525 = vmatprep.subr.bf16.mxu1 %v193_v27  ;;  %v199_v45 = vpack.c.bf16 %v178_v40, %v175_v39  ;;  %v180_v46 = vld [vmem:[%s620_s16 + $0xf8] sm:$0xff]  ;;  %v183_v47 = vld [vmem:[%s620_s16 + $0x110] sm:$0xff]  ;;  %v181_v48 = vld [vmem:[%s620_s16 + $0x100] sm:$0xff]  ;;  %v197_v50 = vpack.c.bf16 %v176_v44, %v173_v43 }
  0x1c   : > { %v184_v49 = vld [vmem:[%s620_s16 + $0x118] sm:$0xff]  ;;  %v201_v51 = vpack.c.bf16 %v183_v47, %v180_v46  ;;  %v179_v52 = vld [vmem:[%s620_s16 + $0xf0] sm:$0xff]  ;;  %v182_v53 = vld [vmem:[%s620_s16 + $0x108] sm:$0xff] }
  0x1d   : > { %225 = vmatpush1.bf16.msra.mxu0 %v191_v32  ;;  %v202_v54 = vpack.c.bf16 %v184_v49, %v181_v48  ;;  %v200_v55 = vpack.c.bf16 %v182_v53, %v179_v52 }
  0x1e   : > { %526 = vmatpush3.bf16.msra.mxu1 %v193_v27  ;;  %226 = vmatprep.subr.bf16.mxu0 %v195_v33 }
  0x1f   : > { %527 = vmatprep.subr.bf16.mxu1 %v196_v36 }
  0x21   : > { %227 = vmatpush1.bf16.msra.mxu0 %v194_v41 }
  0x22   : > { %528 = vmatpush3.bf16.msra.mxu1 %v196_v36  ;;  %228 = vmatprep.subr.bf16.mxu0 %v198_v42 }
  0x23   : > { %529 = vmatprep.subr.bf16.mxu1 %v199_v45 }
  0x25   : > { %229 = vmatpush1.bf16.msra.mxu0 %v197_v50 }
  0x26   : > { %530 = vmatpush3.bf16.msra.mxu1 %v199_v45  ;;  %230 = vmatprep.subr.bf16.mxu0 %v201_v51 }
  0x27   : > { %531 = vmatprep.subr.bf16.mxu1 %v202_v54 }
  0x29   : > { %231 = vmatpush1.bf16.msra.mxu0 %v200_v55 }
  0x2a   : > { %532 = vmatpush3.bf16.msra.mxu1 %v202_v54 }
  0x2c   : > { %507 = vmatmul.mubr.msk.bf16.vlgmr.msra.gmra.mrb[0].mxu0 %vm213_vm0, %v610_v1 }
  0x2d   : > { %534 = vmatmul.mubr.msk.bf16.vlgmr.msra.gmra.mrb[0].mxu1 %vm213_vm0, %v549_v56  ;;  %262 = vmatprep.mubr.bf16.mxu0 %v582_v0 }
  0x34   : > { %508 = vmatmul.mubr.msk.bf16.gmra.mrb[4].mxu0 %vm213_vm0, %v549_v56 }
  0xff   : > { %v666_v57 = vpop.f32.mrb[0].mxu0 }
 0x100   : > { %v322_v58 = vmul.f32 %v666_v57, %v666_v57  ;;  %v670_v59 = vpop.f32.mrb[0].mxu1  ;;  %v672_v60 = vpop.f32.mrb[1].mxu0 }
 0x101   : > { %v330_v61 = vmul.f32 %v670_v59, %v670_v59  ;;  %v323_v62 = vmul.f32 %v672_v60, %v672_v60  ;;  %v678_v63 = vpop.f32.mrb[1].mxu1  ;;  %v680_v0 = vpop.f32.mrb[2].mxu0 }
 0x102   : > { %v334_v1 = vmul.f32 %v322_v58, %v666_v57  ;;  %v324_v2 = vmul.f32 %v678_v63, %v678_v63  ;;  %v325_v3 = vmul.f32 %v680_v0, %v680_v0  ;;  %v687_v4 = vpop.f32.mrb[2].mxu1  ;;  %v689_v5 = vpop.f32.mrb[3].mxu0 }
 0x103   : > { %v342_v6 = vmul.f32 %v670_v59, %v330_v61  ;;  %v335_v7 = vmul.f32 %v323_v62, %v672_v60  ;;  %v333_v8 = vmul.f32 %v687_v4, %v687_v4  ;;  %v326_v9 = vmul.f32 %v689_v5, %v689_v5  ;;  %v697_v10 = vpop.f32.mrb[3].mxu1 }
 0x104   : > { %v346_v11 = vmul.f32 0.044715, %v334_v1  ;;  %v336_v12 = vmul.f32 %v324_v2, %v678_v63  ;;  %v337_v13 = vmul.f32 %v325_v3, %v680_v0  ;;  %v327_v14 = vmul.f32 %v697_v10, %v697_v10 }
 0x105   : > { %v354_v15 = vmul.f32 0.044715, %v342_v6  ;;  %v347_v16 = vmul.f32 0.044715, %v335_v7  ;;  %v345_v17 = vmul.f32 %v687_v4, %v333_v8  ;;  %v338_v18 = vmul.f32 %v326_v9, %v689_v5 }
 0x106   : > { %v358_v19 = vadd.f32 %v346_v11, %v666_v57  ;;  %v348_v20 = vmul.f32 0.044715, %v336_v12  ;;  %v349_v21 = vmul.f32 0.044715, %v337_v13  ;;  %v339_v22 = vmul.f32 %v327_v14, %v697_v10 }
 0x107   : > { %v366_v23 = vadd.f32 %v670_v59, %v354_v15  ;;  %v359_v24 = vadd.f32 %v347_v16, %v672_v60  ;;  %v357_v25 = vmul.f32 0.044715, %v345_v17  ;;  %v350_v26 = vmul.f32 0.044715, %v338_v18  ;;  %v709_v27 = vpop.f32.mrb[4].mxu0 }
 0x108   : > { %v370_v28 = vmul.f32 0.7978846, %v358_v19  ;;  %v360_v29 = vadd.f32 %v348_v20, %v678_v63  ;;  %v361_v30 = vadd.f32 %v349_v21, %v680_v0  ;;  %v351_v31 = vmul.f32 0.044715, %v339_v22  ;;  %v713_v32 = vpop.f32.mrb[5].mxu0 }
 0x109   : > { %v378_v33 = vmul.f32 0.7978846, %v366_v23  ;;  %v371_v34 = vmul.f32 0.7978846, %v359_v24  ;;  %v369_v35 = vadd.f32 %v687_v4, %v357_v25  ;;  %v362_v36 = vadd.f32 %v350_v26, %v689_v5  ;;  %v717_v37 = vpop.f32.mrb[6].mxu0 }
 0x10a   : > { %550 = vtanh.f32 %v370_v28  ;;  %v372_v38 = vmul.f32 0.7978846, %v360_v29  ;;  %v373_v39 = vmul.f32 0.7978846, %v361_v30  ;;  %v363_v40 = vadd.f32 %v351_v31, %v697_v10  ;;  %v720_v41 = vpop.f32.mrb[7].mxu0 }
 0x10b   : > { %552 = vtanh.f32 %v378_v33  ;;  %v381_v42 = vmul.f32 0.7978846, %v369_v35  ;;  %v328_v43 = vmul.f32 %v709_v27, %v709_v27  ;;  %v374_v44 = vmul.f32 0.7978846, %v362_v36 }
 0x10c   : > { %554 = vtanh.f32 %v371_v34  ;;  %v329_v45 = vmul.f32 %v713_v32, %v713_v32  ;;  %v331_v46 = vmul.f32 %v717_v37, %v717_v37  ;;  %v375_v47 = vmul.f32 0.7978846, %v363_v40 }
 0x10d   : > { %556 = vtanh.f32 %v372_v38  ;;  %v340_v48 = vmul.f32 %v328_v43, %v709_v27  ;;  %v332_v49 = vmul.f32 %v720_v41, %v720_v41 }
 0x10e   : > { %558 = vtanh.f32 %v373_v39  ;;  %v341_v50 = vmul.f32 %v329_v45, %v713_v32  ;;  %v343_v51 = vmul.f32 %v331_v46, %v717_v37 }
 0x10f   : > { %560 = vtanh.f32 %v381_v42  ;;  %v352_v52 = vmul.f32 0.044715, %v340_v48  ;;  %v344_v53 = vmul.f32 %v332_v49, %v720_v41 }
 0x110   : > { %562 = vtanh.f32 %v374_v44  ;;  %v353_v54 = vmul.f32 0.044715, %v341_v50  ;;  %v355_v55 = vmul.f32 0.044715, %v343_v51 }
 0x111   : > { %564 = vtanh.f32 %v375_v47  ;;  %v364_v56 = vadd.f32 %v352_v52, %v709_v27  ;;  %v356_v58 = vmul.f32 0.044715, %v344_v53 }
 0x112   : > { %v365_v61 = vadd.f32 %v353_v54, %v713_v32  ;;  %v367_v62 = vadd.f32 %v355_v55, %v717_v37 }
 0x113   : > { %v376_v1 = vmul.f32 0.7978846, %v364_v56  ;;  %v368_v2 = vadd.f32 %v356_v58, %v720_v41 }
 0x114   : > { %v551_v3 = vpop.eup %550  ;;  %v377_v6 = vmul.f32 0.7978846, %v365_v61  ;;  %v379_v7 = vmul.f32 0.7978846, %v367_v62 }
 0x115   : > { %v553_v8 = vpop.eup %552  ;;  %v394_v9 = vadd.f32 1.0, %v551_v3  ;;  %566 = vtanh.f32 %v376_v1  ;;  %v380_v11 = vmul.f32 0.7978846, %v368_v2 }
 0x116   : > { %v555_v12 = vpop.eup %554  ;;  %v402_v13 = vadd.f32 1.0, %v553_v8  ;;  %568 = vtanh.f32 %v377_v6 }
 0x117   : > { %v557_v14 = vpop.eup %556  ;;  %v406_v15 = vmul.f32 0.5, %v394_v9  ;;  %v395_v16 = vadd.f32 1.0, %v555_v12  ;;  %570 = vtanh.f32 %v379_v7 }
 0x118   : > { %v559_v17 = vpop.eup %558  ;;  %v414_v18 = vmul.f32 0.5, %v402_v13  ;;  %v396_v19 = vadd.f32 1.0, %v557_v14  ;;  %572 = vtanh.f32 %v380_v11 }
 0x119   : > { %v561_v20 = vpop.eup %560  ;;  %v418_v21 = vmul.f32 %v406_v15, %v666_v57  ;;  %v407_v22 = vmul.f32 0.5, %v395_v16  ;;  %v397_v23 = vadd.f32 1.0, %v559_v17 }
 0x11a   : > { %v563_v24 = vpop.eup %562  ;;  %v426_v25 = vmul.f32 %v670_v59, %v414_v18  ;;  %v408_v26 = vmul.f32 0.5, %v396_v19  ;;  %v405_v28 = vadd.f32 1.0, %v561_v20 }
 0x11b   : > { %v565_v29 = vpop.eup %564  ;;  %430 = vst [vmem:[%s742_s22] sm:$0xff] %v418_v21  ;;  %v419_v30 = vmul.f32 %v407_v22, %v672_v60  ;;  %v409_v31 = vmul.f32 0.5, %v397_v23  ;;  %v398_v33 = vadd.f32 1.0, %v563_v24 }
 0x11c   : > { %439 = vst.msk [vmem:[%s742_s22 + $0x40] sm:$0xff] %vm432_vm1, %v426_v25  ;;  %v420_v57 = vmul.f32 %v408_v26, %v678_v63  ;;  %v417_v34 = vmul.f32 0.5, %v405_v28  ;;  %v399_v35 = vadd.f32 1.0, %v565_v29 }
 0x11d   : > { %431 = vst [vmem:[%s742_s22 + $0x8] sm:$0xff] %v419_v30  ;;  %v421_v59 = vmul.f32 %v409_v31, %v680_v0  ;;  %v410_v36 = vmul.f32 0.5, %v398_v33 }
 0x11e   : > { %433 = vst.msk [vmem:[%s742_s22 + $0x10] sm:$0xff] %vm432_vm1, %v420_v57  ;;  %v429_v38 = vmul.f32 %v687_v4, %v417_v34  ;;  %v411_v60 = vmul.f32 0.5, %v399_v35 }
 0x11f   : > { %v567_v39 = vpop.eup %566  ;;  %434 = vst [vmem:[%s742_s22 + $0x18] sm:$0xff] %v421_v59  ;;  %v422_v40 = vmul.f32 %v410_v36, %v689_v5 }
 0x120   : > { %v569_v42 = vpop.eup %568  ;;  %442 = vst.msk [vmem:[%s742_s22 + $0x58] sm:$0xff] %vm432_vm1, %v429_v38  ;;  %v423_v63 = vmul.f32 %v411_v60, %v697_v10  ;;  %v400_v43 = vadd.f32 1.0, %v567_v39 }
 0x121   : > { %v571_v0 = vpop.eup %570  ;;  %435 = vst [vmem:[%s742_s22 + $0x20] sm:$0xff] %v422_v40  ;;  %v401_v44 = vadd.f32 1.0, %v569_v42 }
 0x122   : > { %v573_v45 = vpop.eup %572  ;;  %436 = vst.msk [vmem:[%s742_s22 + $0x28] sm:$0xff] %vm432_vm1, %v423_v63  ;;  %v412_v4 = vmul.f32 0.5, %v400_v43  ;;  %v403_v46 = vadd.f32 1.0, %v571_v0 }
 0x123   : > { %v413_v47 = vmul.f32 0.5, %v401_v44  ;;  %v404_v5 = vadd.f32 1.0, %v573_v45 }
 0x124   : > { %v424_v48 = vmul.f32 %v412_v4, %v709_v27  ;;  %v415_v49 = vmul.f32 0.5, %v403_v46 }
 0x125   : > { %v425_v50 = vmul.f32 %v413_v47, %v713_v32  ;;  %v416_v10 = vmul.f32 0.5, %v404_v5 }
 0x126   : > { %437 = vst [vmem:[%s742_s22 + $0x30] sm:$0xff] %v424_v48  ;;  %v427_v51 = vmul.f32 %v415_v49, %v717_v37 }
 0x127   : > { %438 = vst [vmem:[%s742_s22 + $0x38] sm:$0xff] %v425_v50  ;;  %v428_v52 = vmul.f32 %v416_v10, %v720_v41 }
 0x128   : > { %440 = vst [vmem:[%s742_s22 + $0x48] sm:$0xff] %v427_v51 }
 0x129   : > { %441 = vst [vmem:[%s742_s22 + $0x50] sm:$0xff] %v428_v52 }
 0x12a PF: > { %s12_s9 = sadd.s32 1, %s580_s9  }
 0x12b   : > { %p9_p4 = scmp.ge.s32.totalorder %s12_s9, 4  }
 0x12d   :  { %11 = sbr.rel (!%p9_p4) target bundleno = 1 (0x1), region = 58 }

// kernel: wav2vec2_emotion_forward.10
= control target key start
LH: loop header
LB: loop body
LE: loop exit
PB: predicated region body
PF: predicated region fallthrough
CT: control target
= control target key end

     0   :  { %s470_s9 = smov 0   ;;  %s593_s0 = inlined_call_operand.vmem [shape: f32[2,96,159], index: 0, kind: input, shape index: {}]   ;;  %s594_s1 = inlined_call_operand.vmem [shape: bf16[32,96], index: 1, kind: input, shape index: {}]   ;;  %s595_s2 = inlined_call_operand.vmem [shape: f32[2,32,159], index: 2, kind: output, shape index: {}]  }
   0x1 LB: > { %s391_s10 = sadd.s32 4294967295, %s452_s9   ;;  %p395_p0 = scmp.ge.s32.totalorder %s452_s9, 1  ;;  %s452_s9 = sphi %s470_s9, %s12_s9  }
   0x2   : > { %p112_p1 = scmp.lt.s32.totalorder %s452_s9, 3 }
   0x4   : > { %p113_p2 = pnand %p395_p0, %p112_p1 }
   0x5   : > { %p134_p3 = scmp.lt.s32.totalorder (!%p113_p2), %s391_s10, 1  ;;  %v454_v0 = vmov (!%p113_p2), 0   ;;  %v428_v37 = vld [vmem:[%s594_s1] sm:$0xff] (!%p113_p2)   ;;  %v429_v38 = vld [vmem:[%s594_s1 + $0x8] sm:$0xff] (!%p113_p2)   ;;  %vm195_vm0 = vcmask (!%p113_p2), 785408   ;;  %vm328_vm1 = vcmask (!%p113_p2), 252928  }
   0x6   : > { %116 = sbr.rel (%p113_p2) target bundleno = 291 (0x123), region = 28  ;;  %234 = vmatprep.mubr.bf16.mxu0 (!%p113_p2), %v454_v0  ;;  %244 = vmatprep.mubr.bf16.mxu1 (!%p113_p2), %v454_v0 }
   0xd   : > { %s597_s10 = smov (!%p134_p3, %s391_s10), 1 }
   0xe   : > { %s418_s11 = smul.u32 192, %s597_s10  ;;  %s405_s19 = sshll.u32 %s597_s10, 6 }
   0xf   : > { %s568_s22 = scalar_lea.vmem %s595_s2, %s405_s19 }
  0x10   : > { %s484_s14 = scalar_lea.vmem %s593_s0, %s418_s11 }
  0x11   : > { %v150_v1 = vld [vmem:[%s484_s14 + $0x8] sm:$0xff]  ;;  %v152_v2 = vld [vmem:[%s484_s14 + $0x18] sm:$0xff]  ;;  %v149_v3 = vld [vmem:[%s484_s14] sm:$0xff] }
  0x12   : > { %v174_v4 = vpack.c.bf16 %v152_v2, %v150_v1  ;;  %v151_v5 = vld [vmem:[%s484_s14 + $0x10] sm:$0xff]  ;;  %v154_v6 = vld [vmem:[%s484_s14 + $0x28] sm:$0xff]  ;;  %v156_v7 = vld [vmem:[%s484_s14 + $0x38] sm:$0xff] }
  0x13   : > { %v173_v8 = vpack.c.bf16 %v151_v5, %v149_v3  ;;  %v176_v9 = vpack.c.bf16 %v156_v7, %v154_v6  ;;  %v153_v10 = vld [vmem:[%s484_s14 + $0x20] sm:$0xff]  ;;  %v155_v11 = vld [vmem:[%s484_s14 + $0x30] sm:$0xff]  ;;  %v158_v12 = vld [vmem:[%s484_s14 + $0x48] sm:$0xff] }
  0x14   : > { %202 = vmatprep.subr.bf16.mxu0 %v174_v4  ;;  %406 = vmatprep.subr.bf16.mxu1 %v174_v4  ;;  %v160_v13 = vld [vmem:[%s484_s14 + $0x58] sm:$0xff]  ;;  %v175_v14 = vpack.c.bf16 %v155_v11, %v153_v10  ;;  %v157_v16 = vld [vmem:[%s484_s14 + $0x40] sm:$0xff]  ;;  %v159_v17 = vld [vmem:[%s484_s14 + $0x50] sm:$0xff] }
  0x15   : > { %203 = vmatpush1.bf16.msra.mxu0 %v173_v8  ;;  %412 = vmatpush1.bf16.msra.mxu1 %v173_v8  ;;  %v178_v15 = vpack.c.bf16 %v160_v13, %v158_v12  ;;  %v162_v18 = vld [vmem:[%s484_s14 + $0x68] sm:$0xff]  ;;  %v164_v19 = vld [vmem:[%s484_s14 + $0x78] sm:$0xff]  ;;  %v177_v20 = vpack.c.bf16 %v159_v17, %v157_v16  ;;  %v161_v22 = vld [vmem:[%s484_s14 + $0x60] sm:$0xff] }
  0x16   : > { %204 = vmatprep.subr.bf16.mxu0 %v176_v9  ;;  %407 = vmatprep.subr.bf16.mxu1 %v176_v9  ;;  %v180_v21 = vpack.c.bf16 %v164_v19, %v162_v18  ;;  %v163_v23 = vld [vmem:[%s484_s14 + $0x70] sm:$0xff]  ;;  %v166_v24 = vld [vmem:[%s484_s14 + $0x88] sm:$0xff]  ;;  %v168_v25 = vld [vmem:[%s484_s14 + $0x98] sm:$0xff] }
  0x17   : > { %v179_v26 = vpack.c.bf16 %v163_v23, %v161_v22  ;;  %v182_v27 = vpack.c.bf16 %v168_v25, %v166_v24  ;;  %v165_v28 = vld [vmem:[%s484_s14 + $0x80] sm:$0xff]  ;;  %v167_v29 = vld [vmem:[%s484_s14 + $0x90] sm:$0xff]  ;;  %v170_v30 = vld [vmem:[%s484_s14 + $0xa8] sm:$0xff] }
  0x18   : > { %v172_v31 = vld [vmem:[%s484_s14 + $0xb8] sm:$0xff]  ;;  %v181_v32 = vpack.c.bf16 %v167_v29, %v165_v28  ;;  %v169_v34 = vld [vmem:[%s484_s14 + $0xa0] sm:$0xff]  ;;  %v171_v35 = vld [vmem:[%s484_s14 + $0xb0] sm:$0xff] }
  0x19   : > { %205 = vmatpush1.bf16.msra.mxu0 %v175_v14  ;;  %413 = vmatpush1.bf16.msra.mxu1 %v175_v14  ;;  %v184_v33 = vpack.c.bf16 %v172_v31, %v170_v30  ;;  %v183_v36 = vpack.c.bf16 %v171_v35, %v169_v34 }
  0x1a   : > { %206 = vmatprep.subr.bf16.mxu0 %v178_v15  ;;  %408 = vmatprep.subr.bf16.mxu1 %v178_v15 }
  0x1d   : > { %207 = vmatpush1.bf16.msra.mxu0 %v177_v20  ;;  %414 = vmatpush1.bf16.msra.mxu1 %v177_v20 }
  0x1e   : > { %208 = vmatprep.subr.bf16.mxu0 %v180_v21  ;;  %409 = vmatprep.subr.bf16.mxu1 %v180_v21 }
  0x21   : > { %209 = vmatpush1.bf16.msra.mxu0 %v179_v26  ;;  %415 = vmatpush1.bf16.msra.mxu1 %v179_v26 }
  0x22   : > { %210 = vmatprep.subr.bf16.mxu0 %v182_v27  ;;  %410 = vmatprep.subr.bf16.mxu1 %v182_v27 }
  0x25   : > { %211 = vmatpush1.bf16.msra.mxu0 %v181_v32  ;;  %416 = vmatpush1.bf16.msra.mxu1 %v181_v32 }
  0x26   : > { %212 = vmatprep.subr.bf16.mxu0 %v184_v33  ;;  %411 = vmatprep.subr.bf16.mxu1 %v184_v33 }
  0x29   : > { %213 = vmatpush1.bf16.msra.mxu0 %v183_v36  ;;  %417 = vmatpush1.bf16.msra.mxu1 %v183_v36 }
  0x2c   : > { %401 = vmatmul.mubr.msk.bf16.vlgmr.msra.gmra.mrb[0].mxu0 %vm195_vm0, %v428_v37  ;;  %402 = vmatmul.mubr.msk.bf16.vlgmr.msra.gmra.mrb[0].mxu1 %vm195_vm0, %v429_v38 }
  0xff   : > { %v516_v39 = vpop.f32.mrb[0].mxu0  ;;  %v518_v40 = vpop.f32.mrb[0].mxu1 }
 0x100   : > { %v255_v41 = vmul.f32 %v516_v39, %v516_v39  ;;  %v259_v42 = vmul.f32 %v518_v40, %v518_v40  ;;  %v524_v43 = vpop.f32.mrb[1].mxu0  ;;  %v526_v44 = vpop.f32.mrb[1].mxu1 }
 0x101   : > { %v256_v45 = vmul.f32 %v524_v43, %v524_v43  ;;  %v260_v46 = vmul.f32 %v526_v44, %v526_v44  ;;  %v532_v47 = vpop.f32.mrb[2].mxu0  ;;  %v534_v48 = vpop.f32.mrb[2].mxu1 }
 0x102   : > { %v263_v49 = vmul.f32 %v255_v41, %v516_v39  ;;  %v267_v50 = vmul.f32 %v259_v42, %v518_v40  ;;  %v257_v51 = vmul.f32 %v532_v47, %v532_v47  ;;  %v261_v52 = vmul.f32 %v534_v48, %v534_v48  ;;  %v542_v53 = vpop.f32.mrb[3].mxu0  ;;  %v544_v54 = vpop.f32.mrb[3].mxu1 }
 0x103   : > { %v264_v55 = vmul.f32 %v256_v45, %v524_v43  ;;  %v268_v56 = vmul.f32 %v260_v46, %v526_v44  ;;  %v258_v57 = vmul.f32 %v542_v53, %v542_v53  ;;  %v262_v58 = vmul.f32 %v544_v54, %v544_v54 }
 0x104   : > { %v271_v59 = vmul.f32 0.044715, %v263_v49  ;;  %v275_v60 = vmul.f32 0.044715, %v267_v50  ;;  %v265_v61 = vmul.f32 %v257_v51, %v532_v47  ;;  %v269_v62 = vmul.f32 %v261_v52, %v534_v48 }
 0x105   : > { %v272_v63 = vmul.f32 0.044715, %v264_v55  ;;  %v276_v0 = vmul.f32 0.044715, %v268_v56  ;;  %v266_v1 = vmul.f32 %v258_v57, %v542_v53  ;;  %v270_v2 = vmul.f32 %v262_v58, %v544_v54 }
 0x106   : > { %v279_v3 = vadd.f32 %v271_v59, %v516_v39  ;;  %v283_v4 = vadd.f32 %v275_v60, %v518_v40  ;;  %v273_v5 = vmul.f32 0.044715, %v265_v61  ;;  %v277_v6 = vmul.f32 0.044715, %v269_v62 }
 0x107   : > { %v280_v7 = vadd.f32 %v272_v63, %v524_v43  ;;  %v284_v8 = vadd.f32 %v276_v0, %v526_v44  ;;  %v274_v9 = vmul.f32 0.044715, %v266_v1  ;;  %v278_v10 = vmul.f32 0.044715, %v270_v2 }
 0x108   : > { %v287_v11 = vmul.f32 0.7978846, %v279_v3  ;;  %v291_v12 = vmul.f32 0.7978846, %v283_v4  ;;  %v281_v13 = vadd.f32 %v273_v5, %v532_v47  ;;  %v285_v14 = vadd.f32 %v277_v6, %v534_v48 }
 0x109   : > { %v288_v15 = vmul.f32 0.7978846, %v280_v7  ;;  %v292_v16 = vmul.f32 0.7978846, %v284_v8  ;;  %v282_v17 = vadd.f32 %v274_v9, %v542_v53  ;;  %v286_v18 = vadd.f32 %v278_v10, %v544_v54 }
 0x10a   : > { %430 = vtanh.f32 %v287_v11  ;;  %v289_v19 = vmul.f32 0.7978846, %v281_v13  ;;  %v293_v20 = vmul.f32 0.7978846, %v285_v14 }
 0x10b   : > { %432 = vtanh.f32 %v291_v12  ;;  %v290_v21 = vmul.f32 0.7978846, %v282_v17  ;;  %v294_v22 = vmul.f32 0.7978846, %v286_v18 }
 0x10c   : > { %434 = vtanh.f32 %v288_v15 }
 0x10d   : > { %436 = vtanh.f32 %v292_v16 }
 0x10e   : > { %438 = vtanh.f32 %v289_v19 }
 0x10f   : > { %440 = vtanh.f32 %v293_v20 }
 0x110   : > { %442 = vtanh.f32 %v290_v21 }
 0x111   : > { %444 = vtanh.f32 %v294_v22 }
 0x114   : > { %v431_v23 = vpop.eup %430 }
 0x115   : > { %v433_v24 = vpop.eup %432  ;;  %v303_v25 = vadd.f32 1.0, %v431_v23 }
 0x116   : > { %v435_v26 = vpop.eup %434  ;;  %v307_v27 = vadd.f32 1.0, %v433_v24 }
 0x117   : > { %v437_v28 = vpop.eup %436  ;;  %v311_v29 = vmul.f32 0.5, %v303_v25  ;;  %v304_v30 = vadd.f32 1.0, %v435_v26 }
 0x118   : > { %v439_v31 = vpop.eup %438  ;;  %v315_v32 = vmul.f32 0.5, %v307_v27  ;;  %v308_v33 = vadd.f32 1.0, %v437_v28 }
 0x119   : > { %v441_v34 = vpop.eup %440  ;;  %v319_v35 = vmul.f32 %v311_v29, %v516_v39  ;;  %v312_v36 = vmul.f32 0.5, %v304_v30  ;;  %v305_v37 = vadd.f32 1.0, %v439_v31 }
 0x11a   : > { %v443_v38 = vpop.eup %442  ;;  %v323_v41 = vmul.f32 %v315_v32, %v518_v40  ;;  %v316_v42 = vmul.f32 0.5, %v308_v33  ;;  %v309_v45 = vadd.f32 1.0, %v441_v34 }
 0x11b   : > { %v445_v46 = vpop.eup %444  ;;  %327 = vst [vmem:[%s568_s22] sm:$0xff] %v319_v35  ;;  %v320_v49 = vmul.f32 %v312_v36, %v524_v43  ;;  %v313_v50 = vmul.f32 0.5, %v305_v37  ;;  %v306_v51 = vadd.f32 1.0, %v443_v38 }
 0x11c   : > { %332 = vst [vmem:[%s568_s22 + $0x20] sm:$0xff] %v323_v41  ;;  %v324_v39 = vmul.f32 %v316_v42, %v526_v44  ;;  %v317_v52 = vmul.f32 0.5, %v309_v45  ;;  %v310_v55 = vadd.f32 1.0, %v445_v46 }
 0x11d   : > { %329 = vst.msk [vmem:[%s568_s22 + $0x8] sm:$0xff] %vm328_vm1, %v320_v49  ;;  %v321_v40 = vmul.f32 %v313_v50, %v532_v47  ;;  %v314_v56 = vmul.f32 0.5, %v306_v51 }
 0x11e   : > { %333 = vst.msk [vmem:[%s568_s22 + $0x28] sm:$0xff] %vm328_vm1, %v324_v39  ;;  %v325_v57 = vmul.f32 %v317_v52, %v534_v48  ;;  %v318_v58 = vmul.f32 0.5, %v310_v55 }
 0x11f   : > { %330 = vst [vmem:[%s568_s22 + $0x10] sm:$0xff] %v321_v40  ;;  %v322_v43 = vmul.f32 %v314_v56, %v542_v53 }
 0x120   : > { %334 = vst [vmem:[%s568_s22 + $0x30] sm:$0xff] %v325_v57  ;;  %v326_v59 = vmul.f32 %v318_v58, %v544_v54 }
 0x121   : > { %331 = vst.msk [vmem:[%s568_s22 + $0x18] sm:$0xff] %vm328_vm1, %v322_v43 }
 0x122   : > { %335 = vst.msk [vmem:[%s568_s22 + $0x38] sm:$0xff] %vm328_vm1, %v326_v59 }
 0x123 PF: > { %s12_s9 = sadd.s32 1, %s452_s9  }
 0x124   : > { %p9_p4 = scmp.ge.s32.totalorder %s12_s9, 4  }
 0x126   :  { %11 = sbr.rel (!%p9_p4) target bundleno = 1 (0x1), region = 58 }

// kernel: wav2vec2_emotion_forward.11
= control target key start
LH: loop header
LB: loop body
LE: loop exit
PB: predicated region body
PF: predicated region fallthrough
CT: control target
= control target key end

     0   :  { %s410_s9 = smov 0   ;;  %s439_s0 = inlined_call_operand.vmem [shape: f32[2,96,79], index: 0, kind: input, shape index: {}]   ;;  %s440_s1 = inlined_call_operand.vmem [shape: bf16[32,96], index: 1, kind: input, shape index: {}]   ;;  %s441_s2 = inlined_call_operand.vmem [shape: f32[2,32,79], index: 2, kind: output, shape index: {}]  }
   0x1 LB: > { %s329_s10 = sadd.s32 4294967295, %s393_s9   ;;  %p333_p0 = scmp.ge.s32.totalorder %s393_s9, 1  ;;  %s393_s9 = sphi %s410_s9, %s12_s9  }
   0x2   : > { %p112_p1 = scmp.lt.s32.totalorder %s393_s9, 3 }
   0x4   : > { %p113_p2 = pnand %p333_p0, %p112_p1 }
   0x5   : > { %p134_p3 = scmp.lt.s32.totalorder (!%p113_p2), %s329_s10, 1  ;;  %v377_v0 = vld [vmem:[%s440_s1] sm:$0xff] (!%p113_p2)   ;;  %vm177_vm0 = vcmask (!%p113_p2), 785408   ;;  %v378_v19 = vld [vmem:[%s440_s1 + $0x8] sm:$0xff] (!%p113_p2)   ;;  %vm269_vm1 = vcmask (!%p113_p2), 646144  }
   0x6   : > { %116 = sbr.rel (%p113_p2) target bundleno = 287 (0x11f), region = 28  ;;  %364 = vmatprep.mubr.msk.bf16.mxu0 (!%p113_p2), %vm177_vm0, %v377_v0 }
   0xd   : > { %s443_s10 = smov (!%p134_p3, %s329_s10), 1 }
   0xe   : > { %s368_s13 = smul.u32 96, %s443_s10  ;;  %s343_s19 = sshll.u32 %s443_s10, 5 }
   0xf   : > { %s143_s22 = scalar_lea.vmem %s441_s2, %s343_s19 }
  0x10   : > { %s138_s16 = scalar_lea.vmem %s439_s0, %s368_s13 }
  0x11   : > { %v149_v1 = vld [vmem:[%s138_s16] sm:$0xff]  ;;  %v150_v2 = vld [vmem:[%s138_s16 + $0x8] sm:$0xff]  ;;  %v151_v3 = vld [vmem:[%s138_s16 + $0x10] sm:$0xff] }
  0x12   : > { %v161_v4 = vpack.c.bf16 %v150_v2, %v149_v1  ;;  %v152_v5 = vld [vmem:[%s138_s16 + $0x18] sm:$0xff]  ;;  %v153_v7 = vld [vmem:[%s138_s16 + $0x20] sm:$0xff]  ;;  %v154_v8 = vld [vmem:[%s138_s16 + $0x28] sm:$0xff] }
  0x13   : > { %v162_v6 = vpack.c.bf16 %v152_v5, %v151_v3  ;;  %v163_v9 = vpack.c.bf16 %v154_v8, %v153_v7  ;;  %v155_v10 = vld [vmem:[%s138_s16 + $0x30] sm:$0xff]  ;;  %v156_v11 = vld [vmem:[%s138_s16 + $0x38] sm:$0xff]  ;;  %v157_v13 = vld [vmem:[%s138_s16 + $0x40] sm:$0xff] }
  0x14   : > { %352 = vmatprep.subr.bf16.mxu0 %v161_v4  ;;  %v164_v12 = vpack.c.bf16 %v156_v11, %v155_v10  ;;  %v158_v14 = vld [vmem:[%s138_s16 + $0x48] sm:$0xff]  ;;  %v159_v16 = vld [vmem:[%s138_s16 + $0x50] sm:$0xff]  ;;  %v160_v17 = vld [vmem:[%s138_s16 + $0x58] sm:$0xff] }
  0x15   : > { %353 = vmatpush3.bf16.msra.mxu0 %v161_v4  ;;  %v165_v15 = vpack.c.bf16 %v158_v14, %v157_v13  ;;  %v166_v18 = vpack.c.bf16 %v160_v17, %v159_v16 }
  0x16   : > { %354 = vmatprep.subr.bf16.mxu0 %v162_v6 }
  0x19   : > { %355 = vmatpush3.bf16.msra.mxu0 %v162_v6 }
  0x1a   : > { %356 = vmatprep.subr.bf16.mxu0 %v163_v9 }
  0x1d   : > { %357 = vmatpush3.bf16.msra.mxu0 %v163_v9 }
  0x1e   : > { %358 = vmatprep.subr.bf16.mxu0 %v164_v12 }
  0x21   : > { %359 = vmatpush3.bf16.msra.mxu0 %v164_v12 }
  0x22   : > { %360 = vmatprep.subr.bf16.mxu0 %v165_v15 }
  0x25   : > { %361 = vmatpush3.bf16.msra.mxu0 %v165_v15 }
  0x26   : > { %362 = vmatprep.subr.bf16.mxu0 %v166_v18 }
  0x29   : > { %363 = vmatpush3.bf16.msra.mxu0 %v166_v18 }
  0x2c   : > { %365 = vmatmul.mubr.msk.bf16.vlgmr.msra.gmra.mrb[0].mxu0 %vm177_vm0, %v378_v19 }
  0xff   : > { %v366_v20 = vpop.f32.mrb[0].mxu0 }
 0x100   : > { %v235_v21 = vmul.f32 %v366_v20, %v366_v20  ;;  %v218_v22 = vpop.f32.mrb[1].mxu0 }
 0x101   : > { %v233_v23 = vmul.f32 %v218_v22, %v218_v22  ;;  %v367_v24 = vpop.f32.mrb[2].mxu0 }
 0x102   : > { %v239_v25 = vmul.f32 %v366_v20, %v235_v21  ;;  %v236_v26 = vmul.f32 %v367_v24, %v367_v24  ;;  %v221_v27 = vpop.f32.mrb[3].mxu0 }
 0x103   : > { %v237_v28 = vmul.f32 %v233_v23, %v218_v22  ;;  %v234_v29 = vmul.f32 %v221_v27, %v221_v27 }
 0x104   : > { %v243_v30 = vmul.f32 0.044715, %v239_v25  ;;  %v240_v31 = vmul.f32 %v367_v24, %v236_v26 }
 0x105   : > { %v241_v32 = vmul.f32 0.044715, %v237_v28  ;;  %v238_v33 = vmul.f32 %v234_v29, %v221_v27 }
 0x106   : > { %v247_v34 = vadd.f32 %v366_v20, %v243_v30  ;;  %v244_v35 = vmul.f32 0.044715, %v240_v31 }
 0x107   : > { %v245_v36 = vadd.f32 %v241_v32, %v218_v22  ;;  %v242_v37 = vmul.f32 0.044715, %v238_v33 }
 0x108   : > { %v251_v38 = vmul.f32 0.7978846, %v247_v34  ;;  %v248_v39 = vadd.f32 %v367_v24, %v244_v35 }
 0x109   : > { %v249_v40 = vmul.f32 0.7978846, %v245_v36  ;;  %v246_v41 = vadd.f32 %v242_v37, %v221_v27 }
 0x10a   : > { %379 = vtanh.f32 %v251_v38  ;;  %v252_v42 = vmul.f32 0.7978846, %v248_v39 }
 0x10b   : > { %381 = vtanh.f32 %v249_v40  ;;  %v250_v43 = vmul.f32 0.7978846, %v246_v41 }
 0x10c   : > { %383 = vtanh.f32 %v252_v42 }
 0x10d   : > { %385 = vtanh.f32 %v250_v43 }
 0x114   : > { %v380_v44 = vpop.eup %379 }
 0x115   : > { %v382_v45 = vpop.eup %381  ;;  %v259_v46 = vadd.f32 1.0, %v380_v44 }
 0x116   : > { %v384_v47 = vpop.eup %383  ;;  %v257_v48 = vadd.f32 1.0, %v382_v45 }
 0x117   : > { %v386_v49 = vpop.eup %385  ;;  %v263_v50 = vmul.f32 0.5, %v259_v46  ;;  %v260_v51 = vadd.f32 1.0, %v384_v47 }
 0x118   : > { %v261_v52 = vmul.f32 0.5, %v257_v48  ;;  %v258_v53 = vadd.f32 1.0, %v386_v49 }
 0x119   : > { %v267_v54 = vmul.f32 %v366_v20, %v263_v50  ;;  %v264_v55 = vmul.f32 0.5, %v260_v51 }
 0x11a   : > { %v265_v56 = vmul.f32 %v261_v52, %v218_v22  ;;  %v262_v57 = vmul.f32 0.5, %v258_v53 }
 0x11b   : > { %272 = vst.msk [vmem:[%s143_s22 + $0x10] sm:$0xff] %vm269_vm1, %v267_v54  ;;  %v268_v58 = vmul.f32 %v367_v24, %v264_v55 }
 0x11c   : > { %270 = vst.msk [vmem:[%s143_s22] sm:$0xff] %vm269_vm1, %v265_v56  ;;  %v266_v59 = vmul.f32 %v262_v57, %v221_v27 }
 0x11d   : > { %273 = vst.msk [vmem:[%s143_s22 + $0x18] sm:$0xff] %vm269_vm1, %v268_v58 }
 0x11e   : > { %271 = vst.msk [vmem:[%s143_s22 + $0x8] sm:$0xff] %vm269_vm1, %v266_v59 }
 0x11f PF: > { %s12_s9 = sadd.s32 1, %s393_s9  }
 0x120   : > { %p9_p4 = scmp.ge.s32.totalorder %s12_s9, 4  }
 0x122   :  { %11 = sbr.rel (!%p9_p4) target bundleno = 1 (0x1), region = 58 }

// kernel: wav2vec2_emotion_forward.12
= control target key start
LH: loop header
LB: loop body
LE: loop exit
PB: predicated region body
PF: predicated region fallthrough
CT: control target
= control target key end

     0   :  { %s410_s9 = smov 0   ;;  %s439_s0 = inlined_call_operand.vmem [shape: f32[2,96,39], index: 0, kind: input, shape index: {}]   ;;  %s440_s1 = inlined_call_operand.vmem [shape: bf16[32,96], index: 1, kind: input, shape index: {}]   ;;  %s441_s2 = inlined_call_operand.vmem [shape: f32[2,32,39], index: 2, kind: output, shape index: {}]  }
   0x1 LB: > { %s329_s10 = sadd.s32 4294967295, %s393_s9   ;;  %p333_p0 = scmp.ge.s32.totalorder %s393_s9, 1  ;;  %s393_s9 = sphi %s410_s9, %s12_s9  }
   0x2   : > { %p112_p1 = scmp.lt.s32.totalorder %s393_s9, 3 }
   0x4   : > { %p113_p2 = pnand %p333_p0, %p112_p1 }
   0x5   : > { %p134_p3 = scmp.lt.s32.totalorder (!%p113_p2), %s329_s10, 1  ;;  %v377_v0 = vld [vmem:[%s440_s1] sm:$0xff] (!%p113_p2)   ;;  %vm177_vm0 = vcmask (!%p113_p2), 785408   ;;  %v378_v19 = vld [vmem:[%s440_s1 + $0x8] sm:$0xff] (!%p113_p2)   ;;  %vm269_vm1 = vcmask (!%p113_p2), 318464  }
   0x6   : > { %116 = sbr.rel (%p113_p2) target bundleno = 287 (0x11f), region = 28  ;;  %364 = vmatprep.mubr.msk.bf16.mxu0 (!%p113_p2), %vm177_vm0, %v377_v0 }
   0xd   : > { %s443_s10 = smov (!%p134_p3, %s329_s10), 1 }
   0xe   : > { %s368_s13 = smul.u32 96, %s443_s10  ;;  %s343_s19 = sshll.u32 %s443_s10, 5 }
   0xf   : > { %s143_s22 = scalar_lea.vmem %s441_s2, %s343_s19 }
  0x10   : > { %s138_s16 = scalar_lea.vmem %s439_s0, %s368_s13 }
  0x11   : > { %v149_v1 = vld [vmem:[%s138_s16] sm:$0xff]  ;;  %v150_v2 = vld [vmem:[%s138_s16 + $0x8] sm:$0xff]  ;;  %v151_v3 = vld [vmem:[%s138_s16 + $0x10] sm:$0xff] }
  0x12   : > { %v161_v4 = vpack.c.bf16 %v150_v2, %v149_v1  ;;  %v152_v5 = vld [vmem:[%s138_s16 + $0x18] sm:$0xff]  ;;  %v153_v7 = vld [vmem:[%s138_s16 + $0x20] sm:$0xff]  ;;  %v154_v8 = vld [vmem:[%s138_s16 + $0x28] sm:$0xff] }
  0x13   : > { %v162_v6 = vpack.c.bf16 %v152_v5, %v151_v3  ;;  %v163_v9 = vpack.c.bf16 %v154_v8, %v153_v7  ;;  %v155_v10 = vld [vmem:[%s138_s16 + $0x30] sm:$0xff]  ;;  %v156_v11 = vld [vmem:[%s138_s16 + $0x38] sm:$0xff]  ;;  %v157_v13 = vld [vmem:[%s138_s16 + $0x40] sm:$0xff] }
  0x14   : > { %352 = vmatprep.subr.bf16.mxu0 %v161_v4  ;;  %v164_v12 = vpack.c.bf16 %v156_v11, %v155_v10  ;;  %v158_v14 = vld [vmem:[%s138_s16 + $0x48] sm:$0xff]  ;;  %v159_v16 = vld [vmem:[%s138_s16 + $0x50] sm:$0xff]  ;;  %v160_v17 = vld [vmem:[%s138_s16 + $0x58] sm:$0xff] }
  0x15   : > { %353 = vmatpush3.bf16.msra.mxu0 %v161_v4  ;;  %v165_v15 = vpack.c.bf16 %v158_v14, %v157_v13  ;;  %v166_v18 = vpack.c.bf16 %v160_v17, %v159_v16 }
  0x16   : > { %354 = vmatprep.subr.bf16.mxu0 %v162_v6 }
  0x19   : > { %355 = vmatpush3.bf16.msra.mxu0 %v162_v6 }
  0x1a   : > { %356 = vmatprep.subr.bf16.mxu0 %v163_v9 }
  0x1d   : > { %357 = vmatpush3.bf16.msra.mxu0 %v163_v9 }
  0x1e   : > { %358 = vmatprep.subr.bf16.mxu0 %v164_v12 }
  0x21   : > { %359 = vmatpush3.bf16.msra.mxu0 %v164_v12 }
  0x22   : > { %360 = vmatprep.subr.bf16.mxu0 %v165_v15 }
  0x25   : > { %361 = vmatpush3.bf16.msra.mxu0 %v165_v15 }
  0x26   : > { %362 = vmatprep.subr.bf16.mxu0 %v166_v18 }
  0x29   : > { %363 = vmatpush3.bf16.msra.mxu0 %v166_v18 }
  0x2c   : > { %365 = vmatmul.mubr.msk.bf16.vlgmr.msra.gmra.mrb[0].mxu0 %vm177_vm0, %v378_v19 }
  0xff   : > { %v366_v20 = vpop.f32.mrb[0].mxu0 }
 0x100   : > { %v235_v21 = vmul.f32 %v366_v20, %v366_v20  ;;  %v218_v22 = vpop.f32.mrb[1].mxu0 }
 0x101   : > { %v233_v23 = vmul.f32 %v218_v22, %v218_v22  ;;  %v367_v24 = vpop.f32.mrb[2].mxu0 }
 0x102   : > { %v239_v25 = vmul.f32 %v366_v20, %v235_v21  ;;  %v236_v26 = vmul.f32 %v367_v24, %v367_v24  ;;  %v221_v27 = vpop.f32.mrb[3].mxu0 }
 0x103   : > { %v237_v28 = vmul.f32 %v233_v23, %v218_v22  ;;  %v234_v29 = vmul.f32 %v221_v27, %v221_v27 }
 0x104   : > { %v243_v30 = vmul.f32 0.044715, %v239_v25  ;;  %v240_v31 = vmul.f32 %v367_v24, %v236_v26 }
 0x105   : > { %v241_v32 = vmul.f32 0.044715, %v237_v28  ;;  %v238_v33 = vmul.f32 %v234_v29, %v221_v27 }
 0x106   : > { %v247_v34 = vadd.f32 %v366_v20, %v243_v30  ;;  %v244_v35 = vmul.f32 0.044715, %v240_v31 }
 0x107   : > { %v245_v36 = vadd.f32 %v241_v32, %v218_v22  ;;  %v242_v37 = vmul.f32 0.044715, %v238_v33 }
 0x108   : > { %v251_v38 = vmul.f32 0.7978846, %v247_v34  ;;  %v248_v39 = vadd.f32 %v367_v24, %v244_v35 }
 0x109   : > { %v249_v40 = vmul.f32 0.7978846, %v245_v36  ;;  %v246_v41 = vadd.f32 %v242_v37, %v221_v27 }
 0x10a   : > { %379 = vtanh.f32 %v251_v38  ;;  %v252_v42 = vmul.f32 0.7978846, %v248_v39 }
 0x10b   : > { %381 = vtanh.f32 %v249_v40  ;;  %v250_v43 = vmul.f32 0.7978846, %v246_v41 }
 0x10c   : > { %383 = vtanh.f32 %v252_v42 }
 0x10d   : > { %385 = vtanh.f32 %v250_v43 }
 0x114   : > { %v380_v44 = vpop.eup %379 }
 0x115   : > { %v382_v45 = vpop.eup %381  ;;  %v259_v46 = vadd.f32 1.0, %v380_v44 }
 0x116   : > { %v384_v47 = vpop.eup %383  ;;  %v257_v48 = vadd.f32 1.0, %v382_v45 }
 0x117   : > { %v386_v49 = vpop.eup %385  ;;  %v263_v50 = vmul.f32 0.5, %v259_v46  ;;  %v260_v51 = vadd.f32 1.0, %v384_v47 }
 0x118   : > { %v261_v52 = vmul.f32 0.5, %v257_v48  ;;  %v258_v53 = vadd.f32 1.0, %v386_v49 }
 0x119   : > { %v267_v54 = vmul.f32 %v366_v20, %v263_v50  ;;  %v264_v55 = vmul.f32 0.5, %v260_v51 }
 0x11a   : > { %v265_v56 = vmul.f32 %v261_v52, %v218_v22  ;;  %v262_v57 = vmul.f32 0.5, %v258_v53 }
 0x11b   : > { %272 = vst.msk [vmem:[%s143_s22 + $0x10] sm:$0xff] %vm269_vm1, %v267_v54  ;;  %v268_v58 = vmul.f32 %v367_v24, %v264_v55 }
 0x11c   : > { %270 = vst.msk [vmem:[%s143_s22] sm:$0xff] %vm269_vm1, %v265_v56  ;;  %v266_v59 = vmul.f32 %v262_v57, %v221_v27 }
 0x11d   : > { %273 = vst.msk [vmem:[%s143_s22 + $0x18] sm:$0xff] %vm269_vm1, %v268_v58 }
 0x11e   : > { %271 = vst.msk [vmem:[%s143_s22 + $0x8] sm:$0xff] %vm269_vm1, %v266_v59 }
 0x11f PF: > { %s12_s9 = sadd.s32 1, %s393_s9  }
 0x120   : > { %p9_p4 = scmp.ge.s32.totalorder %s12_s9, 4  }
 0x122   :  { %11 = sbr.rel (!%p9_p4) target bundleno = 1 (0x1), region = 58 }

// kernel: wav2vec2_emotion_forward.13
= control target key start
LH: loop header
LB: loop body
LE: loop exit
PB: predicated region body
PF: predicated region fallthrough
CT: control target
= control target key end

     0   :  { %s399_s9 = smov 0   ;;  %s428_s0 = inlined_call_operand.vmem [shape: f32[2,64,19], index: 0, kind: input, shape index: {}]   ;;  %s429_s1 = inlined_call_operand.vmem [shape: bf16[32,64], index: 1, kind: input, shape index: {}]   ;;  %s430_s2 = inlined_call_operand.vmem [shape: f32[2,32,19], index: 2, kind: output, shape index: {}]  }
   0x1 LB: > { %s323_s10 = sadd.s32 4294967295, %s382_s9   ;;  %p327_p0 = scmp.ge.s32.totalorder %s382_s9, 1  ;;  %s382_s9 = sphi %s399_s9, %s12_s9  }
   0x2   : > { %p112_p1 = scmp.lt.s32.totalorder %s382_s9, 3 }
   0x4   : > { %p113_p2 = pnand %p327_p0, %p112_p1 }
   0x5   : > { %p134_p3 = scmp.lt.s32.totalorder (!%p113_p2), %s323_s10, 1  ;;  %v366_v0 = vld [vmem:[%s429_s1] sm:$0xff] (!%p113_p2)   ;;  %vm171_vm0 = vcmask (!%p113_p2), 523264   ;;  %v367_v13 = vld [vmem:[%s429_s1 + $0x8] sm:$0xff] (!%p113_p2)   ;;  %vm263_vm1 = vcmask (!%p113_p2), 154624  }
   0x6   : > { %116 = sbr.rel (%p113_p2) target bundleno = 278 (0x116), region = 28  ;;  %354 = vmatprep.mubr.msk.bf16.mxu0 (!%p113_p2), %vm171_vm0, %v366_v0 }
   0xd   : > { %s432_s10 = smov (!%p134_p3, %s323_s10), 1 }
   0xe   : > { %s338_s13 = sshll.u32 %s432_s10, 6  ;;  %s339_s19 = sshll.u32 %s432_s10, 5 }
   0xf   : > { %s138_s16 = scalar_lea.vmem %s428_s0, %s338_s13  ;;  %s143_s22 = scalar_lea.vmem %s430_s2, %s339_s19 }
  0x10   : > { %v149_v1 = vld [vmem:[%s138_s16] sm:$0xff]  ;;  %v150_v2 = vld [vmem:[%s138_s16 + $0x8] sm:$0xff]  ;;  %v151_v3 = vld [vmem:[%s138_s16 + $0x10] sm:$0xff] }
  0x11   : > { %v157_v4 = vpack.c.bf16 %v150_v2, %v149_v1  ;;  %v152_v5 = vld [vmem:[%s138_s16 + $0x18] sm:$0xff]  ;;  %v153_v7 = vld [vmem:[%s138_s16 + $0x20] sm:$0xff]  ;;  %v154_v8 = vld [vmem:[%s138_s16 + $0x28] sm:$0xff] }
  0x12   : > { %v158_v6 = vpack.c.bf16 %v152_v5, %v151_v3  ;;  %v159_v9 = vpack.c.bf16 %v154_v8, %v153_v7  ;;  %v155_v10 = vld [vmem:[%s138_s16 + $0x30] sm:$0xff]  ;;  %v156_v11 = vld [vmem:[%s138_s16 + $0x38] sm:$0xff] }
  0x13   : > { %346 = vmatprep.subr.bf16.mxu0 %v157_v4  ;;  %v160_v12 = vpack.c.bf16 %v156_v11, %v155_v10 }
  0x14   : > { %347 = vmatpush3.bf16.msra.mxu0 %v157_v4 }
  0x15   : > { %348 = vmatprep.subr.bf16.mxu0 %v158_v6 }
  0x18   : > { %349 = vmatpush3.bf16.msra.mxu0 %v158_v6 }
  0x19   : > { %350 = vmatprep.subr.bf16.mxu0 %v159_v9 }
  0x1c   : > { %351 = vmatpush3.bf16.msra.mxu0 %v159_v9 }
  0x1d   : > { %352 = vmatprep.subr.bf16.mxu0 %v160_v12 }
  0x20   : > { %353 = vmatpush3.bf16.msra.mxu0 %v160_v12 }
  0x23   : > { %355 = vmatmul.mubr.msk.bf16.vlgmr.msra.gmra.mrb[0].mxu0 %vm171_vm0, %v367_v13 }
  0xf6   : > { %v356_v14 = vpop.f32.mrb[0].mxu0 }
  0xf7   : > { %v229_v15 = vmul.f32 %v356_v14, %v356_v14  ;;  %v212_v16 = vpop.f32.mrb[1].mxu0 }
  0xf8   : > { %v227_v17 = vmul.f32 %v212_v16, %v212_v16  ;;  %v357_v18 = vpop.f32.mrb[2].mxu0 }
  0xf9   : > { %v233_v19 = vmul.f32 %v356_v14, %v229_v15  ;;  %v230_v20 = vmul.f32 %v357_v18, %v357_v18  ;;  %v215_v21 = vpop.f32.mrb[3].mxu0 }
  0xfa   : > { %v231_v22 = vmul.f32 %v227_v17, %v212_v16  ;;  %v228_v23 = vmul.f32 %v215_v21, %v215_v21 }
  0xfb   : > { %v237_v24 = vmul.f32 0.044715, %v233_v19  ;;  %v234_v25 = vmul.f32 %v357_v18, %v230_v20 }
  0xfc   : > { %v235_v26 = vmul.f32 0.044715, %v231_v22  ;;  %v232_v27 = vmul.f32 %v228_v23, %v215_v21 }
  0xfd   : > { %v241_v28 = vadd.f32 %v356_v14, %v237_v24  ;;  %v238_v29 = vmul.f32 0.044715, %v234_v25 }
  0xfe   : > { %v239_v30 = vadd.f32 %v235_v26, %v212_v16  ;;  %v236_v31 = vmul.f32 0.044715, %v232_v27 }
  0xff   : > { %v245_v32 = vmul.f32 0.7978846, %v241_v28  ;;  %v242_v33 = vadd.f32 %v357_v18, %v238_v29 }
 0x100   : > { %v243_v34 = vmul.f32 0.7978846, %v239_v30  ;;  %v240_v35 = vadd.f32 %v236_v31, %v215_v21 }
 0x101   : > { %368 = vtanh.f32 %v245_v32  ;;  %v246_v36 = vmul.f32 0.7978846, %v242_v33 }
 0x102   : > { %370 = vtanh.f32 %v243_v34  ;;  %v244_v37 = vmul.f32 0.7978846, %v240_v35 }
 0x103   : > { %372 = vtanh.f32 %v246_v36 }
 0x104   : > { %374 = vtanh.f32 %v244_v37 }
 0x10b   : > { %v369_v38 = vpop.eup %368 }
 0x10c   : > { %v371_v39 = vpop.eup %370  ;;  %v253_v40 = vadd.f32 1.0, %v369_v38 }
 0x10d   : > { %v373_v41 = vpop.eup %372  ;;  %v251_v42 = vadd.f32 1.0, %v371_v39 }
 0x10e   : > { %v375_v43 = vpop.eup %374  ;;  %v257_v44 = vmul.f32 0.5, %v253_v40  ;;  %v254_v45 = vadd.f32 1.0, %v373_v41 }
 0x10f   : > { %v255_v46 = vmul.f32 0.5, %v251_v42  ;;  %v252_v47 = vadd.f32 1.0, %v375_v43 }
 0x110   : > { %v261_v48 = vmul.f32 %v356_v14, %v257_v44  ;;  %v258_v49 = vmul.f32 0.5, %v254_v45 }
 0x111   : > { %v259_v50 = vmul.f32 %v255_v46, %v212_v16  ;;  %v256_v51 = vmul.f32 0.5, %v252_v47 }
 0x112   : > { %266 = vst.msk [vmem:[%s143_s22 + $0x10] sm:$0xff] %vm263_vm1, %v261_v48  ;;  %v262_v52 = vmul.f32 %v357_v18, %v258_v49 }
 0x113   : > { %264 = vst.msk [vmem:[%s143_s22] sm:$0xff] %vm263_vm1, %v259_v50  ;;  %v260_v53 = vmul.f32 %v256_v51, %v215_v21 }
 0x114   : > { %267 = vst.msk [vmem:[%s143_s22 + $0x18] sm:$0xff] %vm263_vm1, %v262_v52 }
 0x115   : > { %265 = vst.msk [vmem:[%s143_s22 + $0x8] sm:$0xff] %vm263_vm1, %v260_v53 }
 0x116 PF: > { %s12_s9 = sadd.s32 1, %s382_s9  }
 0x117   : > { %p9_p4 = scmp.ge.s32.totalorder %s12_s9, 4  }
 0x119   :  { %11 = sbr.rel (!%p9_p4) target bundleno = 1 (0x1), region = 58 }

// kernel: wav2vec2_emotion_forward.14
= control target key start
LH: loop header
LB: loop body
LE: loop exit
PB: predicated region body
PF: predicated region fallthrough
CT: control target
= control target key end

     0   :  { %s399_s9 = smov 0   ;;  %s428_s0 = inlined_call_operand.vmem [shape: f32[2,64,9], index: 0, kind: input, shape index: {}]   ;;  %s429_s1 = inlined_call_operand.vmem [shape: bf16[32,64], index: 1, kind: input, shape index: {}]   ;;  %s430_s2 = inlined_call_operand.vmem [shape: f32[2,32,9], index: 2, kind: output, shape index: {}]  }
   0x1 LB: > { %s323_s10 = sadd.s32 4294967295, %s382_s9   ;;  %p327_p0 = scmp.ge.s32.totalorder %s382_s9, 1  ;;  %s382_s9 = sphi %s399_s9, %s12_s9  }
   0x2   : > { %p112_p1 = scmp.lt.s32.totalorder %s382_s9, 3 }
   0x4   : > { %p113_p2 = pnand %p327_p0, %p112_p1 }
   0x5   : > { %p134_p3 = scmp.lt.s32.totalorder (!%p113_p2), %s323_s10, 1  ;;  %v366_v0 = vld [vmem:[%s429_s1] sm:$0xff] (!%p113_p2)   ;;  %vm171_vm0 = vcmask (!%p113_p2), 523264   ;;  %v367_v13 = vld [vmem:[%s429_s1 + $0x8] sm:$0xff] (!%p113_p2)   ;;  %vm263_vm1 = vcmask (!%p113_p2), 72704  }
   0x6   : > { %116 = sbr.rel (%p113_p2) target bundleno = 278 (0x116), region = 28  ;;  %354 = vmatprep.mubr.msk.bf16.mxu0 (!%p113_p2), %vm171_vm0, %v366_v0 }
   0xd   : > { %s432_s10 = smov (!%p134_p3, %s323_s10), 1 }
   0xe   : > { %s338_s13 = sshll.u32 %s432_s10, 6  ;;  %s339_s19 = sshll.u32 %s432_s10, 5 }
   0xf   : > { %s138_s16 = scalar_lea.vmem %s428_s0, %s338_s13  ;;  %s143_s22 = scalar_lea.vmem %s430_s2, %s339_s19 }
  0x10   : > { %v149_v1 = vld [vmem:[%s138_s16] sm:$0xff]  ;;  %v150_v2 = vld [vmem:[%s138_s16 + $0x8] sm:$0xff]  ;;  %v151_v3 = vld [vmem:[%s138_s16 + $0x10] sm:$0xff] }
  0x11   : > { %v157_v4 = vpack.c.bf16 %v150_v2, %v149_v1  ;;  %v152_v5 = vld [vmem:[%s138_s16 + $0x18] sm:$0xff]  ;;  %v153_v7 = vld [vmem:[%s138_s16 + $0x20] sm:$0xff]  ;;  %v154_v8 = vld [vmem:[%s138_s16 + $0x28] sm:$0xff] }
  0x12   : > { %v158_v6 = vpack.c.bf16 %v152_v5, %v151_v3  ;;  %v159_v9 = vpack.c.bf16 %v154_v8, %v153_v7  ;;  %v155_v10 = vld [vmem:[%s138_s16 + $0x30] sm:$0xff]  ;;  %v156_v11 = vld [vmem:[%s138_s16 + $0x38] sm:$0xff] }
  0x13   : > { %346 = vmatprep.subr.bf16.mxu0 %v157_v4  ;;  %v160_v12 = vpack.c.bf16 %v156_v11, %v155_v10 }
  0x14   : > { %347 = vmatpush3.bf16.msra.mxu0 %v157_v4 }
  0x15   : > { %348 = vmatprep.subr.bf16.mxu0 %v158_v6 }
  0x18   : > { %349 = vmatpush3.bf16.msra.mxu0 %v158_v6 }
  0x19   : > { %350 = vmatprep.subr.bf16.mxu0 %v159_v9 }
  0x1c   : > { %351 = vmatpush3.bf16.msra.mxu0 %v159_v9 }
  0x1d   : > { %352 = vmatprep.subr.bf16.mxu0 %v160_v12 }
  0x20   : > { %353 = vmatpush3.bf16.msra.mxu0 %v160_v12 }
  0x23   : > { %355 = vmatmul.mubr.msk.bf16.vlgmr.msra.gmra.mrb[0].mxu0 %vm171_vm0, %v367_v13 }
  0xf6   : > { %v356_v14 = vpop.f32.mrb[0].mxu0 }
  0xf7   : > { %v229_v15 = vmul.f32 %v356_v14, %v356_v14  ;;  %v212_v16 = vpop.f32.mrb[1].mxu0 }
  0xf8   : > { %v227_v17 = vmul.f32 %v212_v16, %v212_v16  ;;  %v357_v18 = vpop.f32.mrb[2].mxu0 }
  0xf9   : > { %v233_v19 = vmul.f32 %v356_v14, %v229_v15  ;;  %v230_v20 = vmul.f32 %v357_v18, %v357_v18  ;;  %v215_v21 = vpop.f32.mrb[3].mxu0 }
  0xfa   : > { %v231_v22 = vmul.f32 %v227_v17, %v212_v16  ;;  %v228_v23 = vmul.f32 %v215_v21, %v215_v21 }
  0xfb   : > { %v237_v24 = vmul.f32 0.044715, %v233_v19  ;;  %v234_v25 = vmul.f32 %v357_v18, %v230_v20 }
  0xfc   : > { %v235_v26 = vmul.f32 0.044715, %v231_v22  ;;  %v232_v27 = vmul.f32 %v228_v23, %v215_v21 }
  0xfd   : > { %v241_v28 = vadd.f32 %v356_v14, %v237_v24  ;;  %v238_v29 = vmul.f32 0.044715, %v234_v25 }
  0xfe   : > { %v239_v30 = vadd.f32 %v235_v26, %v212_v16  ;;  %v236_v31 = vmul.f32 0.044715, %v232_v27 }
  0xff   : > { %v245_v32 = vmul.f32 0.7978846, %v241_v28  ;;  %v242_v33 = vadd.f32 %v357_v18, %v238_v29 }
 0x100   : > { %v243_v34 = vmul.f32 0.7978846, %v239_v30  ;;  %v240_v35 = vadd.f32 %v236_v31, %v215_v21 }
 0x101   : > { %368 = vtanh.f32 %v245_v32  ;;  %v246_v36 = vmul.f32 0.7978846, %v242_v33 }
 0x102   : > { %370 = vtanh.f32 %v243_v34  ;;  %v244_v37 = vmul.f32 0.7978846, %v240_v35 }
 0x103   : > { %372 = vtanh.f32 %v246_v36 }
 0x104   : > { %374 = vtanh.f32 %v244_v37 }
 0x10b   : > { %v369_v38 = vpop.eup %368 }
 0x10c   : > { %v371_v39 = vpop.eup %370  ;;  %v253_v40 = vadd.f32 1.0, %v369_v38 }
 0x10d   : > { %v373_v41 = vpop.eup %372  ;;  %v251_v42 = vadd.f32 1.0, %v371_v39 }
 0x10e   : > { %v375_v43 = vpop.eup %374  ;;  %v257_v44 = vmul.f32 0.5, %v253_v40  ;;  %v254_v45 = vadd.f32 1.0, %v373_v41 }
 0x10f   : > { %v255_v46 = vmul.f32 0.5, %v251_v42  ;;  %v252_v47 = vadd.f32 1.0, %v375_v43 }
 0x110   : > { %v261_v48 = vmul.f32 %v356_v14, %v257_v44  ;;  %v258_v49 = vmul.f32 0.5, %v254_v45 }
 0x111   : > { %v259_v50 = vmul.f32 %v255_v46, %v212_v16  ;;  %v256_v51 = vmul.f32 0.5, %v252_v47 }
 0x112   : > { %266 = vst.msk [vmem:[%s143_s22 + $0x10] sm:$0xff] %vm263_vm1, %v261_v48  ;;  %v262_v52 = vmul.f32 %v357_v18, %v258_v49 }
 0x113   : > { %264 = vst.msk [vmem:[%s143_s22] sm:$0xff] %vm263_vm1, %v259_v50  ;;  %v260_v53 = vmul.f32 %v256_v51, %v215_v21 }
 0x114   : > { %267 = vst.msk [vmem:[%s143_s22 + $0x18] sm:$0xff] %vm263_vm1, %v262_v52 }
 0x115   : > { %265 = vst.msk [vmem:[%s143_s22 + $0x8] sm:$0xff] %vm263_vm1, %v260_v53 }
 0x116 PF: > { %s12_s9 = sadd.s32 1, %s382_s9  }
 0x117   : > { %p9_p4 = scmp.ge.s32.totalorder %s12_s9, 4  }
 0x119   :  { %11 = sbr.rel (!%p9_p4) target bundleno = 1 (0x1), region = 58 }

// kernel: wav2vec2_emotion_forward.15
= control target key start
LH: loop header
LB: loop body
LE: loop exit
PB: predicated region body
PF: predicated region fallthrough
CT: control target
= control target key end

     0   :  { %s4843_s6 = smov 1   ;;  %s4844_s10 = smov 2   ;;  %s5566_s0 = inlined_call_operand.smem [shape: u32[34], index: -1, kind: input, shape index: {}] }
   0x1   :  { %s4895_s5 = sld [smem:[%s5566_s0]]   ;;  %s4845_s14 = smov 3  }
   0x2   :  { %s4900_s9 = sld [smem:[%s5566_s0 + %s4843_s6]]   ;;  %s4846_s18 = smov 4  }
   0x3   :  { %s4905_s13 = sld [smem:[%s5566_s0 + %s4844_s10]]   ;;  %s4847_s22 = smov 5  }
   0x4   :  { %s4910_s17 = sld [smem:[%s5566_s0 + %s4845_s14]]   ;;  %s4848_s26 = smov 6  }
   0x5   :  { %s4915_s21 = sld [smem:[%s5566_s0 + %s4846_s18]]   ;;  %s4849_s30 = smov 7  }
   0x6   :  { %s4920_s25 = sld [smem:[%s5566_s0 + %s4847_s22]]   ;;  %s4850_s4 = smov 8  }
   0x7   :  { %5592 = sst [smem:[#allocation5_spill]] %s4895_s5  ;;  %s4851_s10 = smov 9  }
   0x8   :  { %5593 = sst [smem:[#allocation6_spill]] %s4900_s9  ;;  %s4852_s15 = smov 10  }
   0x9   :  { %5594 = sst [smem:[#allocation7_spill]] %s4905_s13  ;;  %s4853_s20 = smov 11  }
   0xa   :  { %s4925_s29 = sld [smem:[%s5566_s0 + %s4848_s26]]   ;;  %s4854_s26 = smov 12  }
   0xb   :  { %s4930_s3 = sld [smem:[%s5566_s0 + %s4849_s30]]   ;;  %s4855_s1 = smov 13  }
   0xc   :  { %s4935_s8 = sld [smem:[%s5566_s0 + %s4850_s4]]   ;;  %s4856_s7 = smov 14  }
   0xd   :  { %s4940_s14 = sld [smem:[%s5566_s0 + %s4851_s10]]   ;;  %s4858_s22 = smov 16  }
   0xe   :  { %s4945_s19 = sld [smem:[%s5566_s0 + %s4852_s15]]   ;;  %s4857_s15 = smov 15  }
   0xf   :  { %s4950_s24 = sld [smem:[%s5566_s0 + %s4853_s20]]   ;;  %s4859_s28 = smov 17  }
  0x10   :  { %s4955_s30 = sld [smem:[%s5566_s0 + %s4854_s26]]  }
  0x11   :  { %5595 = sst [smem:[#allocation8_spill]] %s4930_s3 }
  0x12   :  { %5596 = sst [smem:[#allocation9_spill]] %s4935_s8 }
  0x13   :  { %5597 = sst [smem:[#allocation10_spill]] %s4940_s14 }
  0x14   :  { %s4960_s6 = sld [smem:[%s5566_s0 + %s4855_s1]]  }
  0x15   :  { %s4965_s12 = sld [smem:[%s5566_s0 + %s4856_s7]]   ;;  %s4860_s7 = smov 18  }
  0x16   :  { %s4970_s20 = sld [smem:[%s5566_s0 + %s4857_s15]]   ;;  %s4861_s15 = smov 19  }
  0x17   :  { %s4975_s27 = sld [smem:[%s5566_s0 + %s4858_s22]]   ;;  %s4862_s22 = smov 20  }
  0x18   :  { %s4980_s4 = sld [smem:[%s5566_s0 + %s4859_s28]]   ;;  %s4863_s28 = smov 21  }
  0x1a   :  { %5598 = sst [smem:[#allocation11_spill]] %s4960_s6 }
  0x1b   :  { %5599 = sst [smem:[#allocation12_spill]] %s4965_s12 }
  0x1c   :  { %s4985_s12 = sld [smem:[%s5566_s0 + %s4860_s7]]   ;;  %s4864_s7 = smov 22  }
  0x1d   :  { %5600 = sst [smem:[#allocation13_spill]] %s4975_s27 }
  0x1e   :  { %5601 = sst [smem:[#allocation14_spill]] %s4980_s4 }
  0x1f   :  { %s4990_s6 = sld [smem:[%s5566_s0 + %s4861_s15]]   ;;  %s4865_s15 = smov 23  }
  0x20   :  { %s4995_s27 = sld [smem:[%s5566_s0 + %s4862_s22]]   ;;  %s4866_s22 = smov 24  }
  0x21   :  { %s5000_s4 = sld [smem:[%s5566_s0 + %s4863_s28]]   ;;  %s4867_s28 = smov 25  }
  0x22   :  { %5602 = sst [smem:[#allocation15_spill]] %s4985_s12 }
  0x23   :  { %s5005_s12 = sld [smem:[%s5566_s0 + %s4864_s7]]   ;;  %s4868_s7 = smov 26  }
  0x25   :  { %5603 = sst [smem:[#allocation16_spill]] %s4990_s6 }
  0x26   :  { %5604 = sst [smem:[#allocation17_spill]] %s4995_s27 }
  0x27   :  { %5605 = sst [smem:[#allocation18_spill]] %s5000_s4 }
  0x28   :  { %s5010_s6 = sld [smem:[%s5566_s0 + %s4865_s15]]   ;;  %s4869_s15 = smov 27  }
  0x29   :  { %5606 = sst [smem:[#allocation19_spill]] %s5005_s12 }
  0x2a   :  { %s5015_s27 = sld [smem:[%s5566_s0 + %s4866_s22]]   ;;  %s4870_s22 = smov 28  }
  0x2b   :  { %s5020_s4 = sld [smem:[%s5566_s0 + %s4867_s28]]   ;;  %s4871_s28 = smov 29  }
  0x2c   :  { %s5025_s12 = sld [smem:[%s5566_s0 + %s4868_s7]]   ;;  %s4872_s7 = smov 30  }
  0x2e   :  { %5607 = sst [smem:[#allocation20_spill]] %s5010_s6 }
  0x2f   :  { %s5030_s6 = sld [smem:[%s5566_s0 + %s4869_s15]]   ;;  %s4873_s15 = smov 31  }
  0x30   :  { %5608 = sst [smem:[#allocation21_spill]] %s5015_s27 }
  0x31   :  { %5609 = sst [smem:[#allocation22_spill]] %s5020_s4 }
  0x32   :  { %5610 = sst [smem:[#allocation23_spill]] %s5025_s12 }
  0x33   :  { %s5035_s27 = sld [smem:[%s5566_s0 + %s4870_s22]]   ;;  %s4874_s22 = smov 32  }
  0x34   :  { %s5040_s4 = sld [smem:[%s5566_s0 + %s4871_s28]]   ;;  %s4875_s28 = smov 33  }
  0x35   :  { %5611 = sst [smem:[#allocation24_spill]] %s5030_s6 }
  0x36   :  { %s5045_s12 = sld [smem:[%s5566_s0 + %s4872_s7]]  }
  0x37   :  { %s5050_s6 = sld [smem:[%s5566_s0 + %s4873_s15]]  }
  0x39   :  { %5612 = sst [smem:[#allocation25_spill]] %s5035_s27 }
  0x3a   :  { %5613 = sst [smem:[#allocation26_spill]] %s5040_s4 }
  0x3b   :  { %s5055_s27 = sld [smem:[%s5566_s0 + %s4874_s22]]  }
  0x3c   :  { %5614 = sst [smem:[#allocation27_spill]] %s5045_s12 }
  0x3d   :  { %5615 = sst [smem:[#allocation28_spill]] %s5050_s6 }
  0x3e   :  { %s5060_s4 = sld [smem:[%s5566_s0 + %s4875_s28]]  }
  0x3f   :  { %72 = vsyncpa [#allocation3], 0 }
  0x40   :  { %74 = vsyncpa [#allocation3 + $0x1], 0  ;;  %s5062_s7 = smov 0   ;;  %s5064_s10 = smov 0  }
  0x41   :  { %s5066_s11 = smov 0   ;;  %s5068_s15 = smov 0  }
  0x42 LB: > { %s5616_s6 = sld [smem:[#allocation28_spill]]  ;;  %s5617_s14 = sld [smem:[#allocation10_spill]]  ;;  %s4833_s10 = sphi %s5064_s10, %s5649_s10   ;;  %s4829_s7 = sphi %s5062_s7, %s5648_s7   ;;  %s4841_s15 = sphi %s5068_s15, %s5651_s15   ;;  %s4837_s11 = sphi %s5066_s11, %s5650_s11  }
  0x43   : > { %s5083_s0 = sadd.s32 4294967295, %s4841_s15   ;;  %s3942_s16 = sadd.s32 4294967294, %s4841_s15  }
  0x44   : > { %s5087_s18 = sadd.s32 1, %s4841_s15   ;;  %s785_s22 = sadd.s32 1, %s4837_s11 }
  0x45   : > { %s782_s23 = ssub.s32 %s4841_s15, %s5087_s18  ;;  %p795_p0 = scmp.ne.s32.totalorder %s4837_s11, %s4833_s10 }
  0x46   : > { %p783_p1 = scmp.eq.s32.totalorder %s782_s23, 0  ;;  %p796_p2 = scmp.eq.s32.totalorder %s5083_s0, 1 }
  0x47   : > { %p801_p3 = scmp.ne.s32.totalorder %s4833_s10, %s4829_s7  ;;  %p802_p4 = scmp.eq.s32.totalorder %s3942_s16, 1 }
  0x48   : > { %s5098_s26 = scalar_select %p783_p1, %s4837_s11, %s785_s22  }
  0x49   : > { %p5100_p5 = por %p796_p2, %p795_p0  ;;  %p5104_p6 = por %p802_p4, %p801_p3 }
  0x4a   : > { %p3945_p7 = scmp.ge.s32.totalorder %s4841_s15, 1  ;;  %p924_p8 = scmp.lt.s32.totalorder %s4841_s15, 3 }
  0x4c   : > { %p925_p9 = pnand %p3945_p7, %p924_p8 }
  0x4d   : > { %s5620_s5 = sld [smem:[#allocation5_spill]] (!%p925_p9)  ;;  %p1007_p10 = scmp.lt.s32.totalorder (!%p925_p9), %s5083_s0, 1  ;;  %vm1017_vm0 = vcmask (!%p925_p9), 261120   ;;  %vm1021_vm1 = vcmask (!%p925_p9), 253952   ;;  %v4547_v14 = vld [vmem:[%s4910_s17] sm:$0xff] (!%p925_p9)   ;;  %v4876_v15 = vmov (!%p925_p9), 0.0  }
  0x4e   : > { %928 = sbr.rel (%p925_p9) target bundleno = 7783 (0x1e67), region = 152  ;;  %4265 = vmatprep.subr.bf16.mxu1 (!%p925_p9), %v4876_v15  ;;  %4297 = vmatprep.subr.bf16.mxu0 (!%p925_p9), %v4876_v15  ;;  %v4548_v16 = vld [vmem:[%s4910_s17 + $0x8] sm:$0xff] (!%p925_p9)   ;;  %vm4877_vm2 = vmmov (!%p925_p9), 0   ;;  %s5621_s9 = sld [smem:[#allocation6_spill]] (!%p925_p9)  ;;  %v4549_v34 = vld [vmem:[%s4920_s25 + $0x10] sm:$0xff] (!%p925_p9)   ;;  %v4551_v36 = vld [vmem:[%s4920_s25 + $0x18] sm:$0xff] (!%p925_p9)  }
  0x4f   : > { %4266 = vmatpush3.bf16.msra.mxu1 (!%p925_p9), %v4547_v14  ;;  %4269 = vmatprep.mubr.msk.bf16.mxu1 (!%p925_p9), %vm4877_vm2, %v4876_v15  ;;  %s5622_s13 = sld [smem:[#allocation7_spill]] (!%p925_p9)  ;;  %v4550_v35 = vld [vmem:[%s4920_s25 + $0x30] sm:$0xff] (!%p925_p9)   ;;  %v4552_v37 = vld [vmem:[%s4920_s25 + $0x38] sm:$0xff] (!%p925_p9)   ;;  %v3950_v38 = vld [vmem:[%s4915_s21] ss:$0 sm:$0xff] (!%p925_p9)  ;;  %vm1132_vm3 = vcmask (!%p925_p9), 1041408  }
  0x50   : > { %4267 = vmatprep.subr.bf16.mxu1 (!%p925_p9), %v4876_v15  ;;  %4301 = vmatprep.mubr.msk.bf16.mxu0 (!%p925_p9), %vm4877_vm2, %v4876_v15  ;;  %vm1139_vm4 = vcmask (!%p925_p9), 1042432   ;;  %v4553_v56 = vld [vmem:[%s4920_s25] sm:$0xff] (!%p925_p9)   ;;  %v4554_v59 = vld [vmem:[%s4920_s25 + $0x8] sm:$0xff] (!%p925_p9)   ;;  %s5623_s3 = sld [smem:[#allocation8_spill]] (!%p925_p9)  ;;  %s5624_s8 = sld [smem:[#allocation9_spill]] (!%p925_p9)  ;;  %vm1548_vm5 = vcmask (!%p925_p9), 130048  }
  0x51   : > { %4298 = vmatpush3.bf16.msra.mxu0 (!%p925_p9), %v4550_v35  ;;  %v4555_v60 = vld [vmem:[%s4920_s25 + $0x20] sm:$0xff] (!%p925_p9)   ;;  %v4556_v61 = vld [vmem:[%s4920_s25 + $0x28] sm:$0xff] (!%p925_p9)   ;;  %s5581_s23 = smov (!%p925_p9), 80   ;;  %vm1596_vm6 = vcmask (!%p925_p9), 72704   ;;  %vm1600_vm7 = vcmask (!%p925_p9), 65536   ;;  %vm1626_vm8 = vcmask (!%p925_p9), 1043456  }
  0x52   : > { %4299 = vmatprep.subr.bf16.mxu0 (!%p925_p9), %v4876_v15  ;;  %vm1627_vm9 = vcmask (!%p925_p9), 1044480   ;;  %s5647_s12 = sld [smem:[#allocation27_spill]] (!%p925_p9)  ;;  %vm3839_vm10 = vcmask (!%p925_p9), 57344  }
  0x53   : > { %4268 = vmatpush3.bf16.msra.mxu1 (!%p925_p9), %v4548_v16 }
  0x54   : > { %4273 = vmatprep.subr.bf16.mxu1 (!%p925_p9), %v4876_v15  ;;  %v3948_v25 = vld [vmem:[%s5621_s9] ss:$0 sm:$0xff] (!%p925_p9)  ;;  %s5632_s9 = smov (!%p925_p9), 96  }
  0x55   : > { %s1008_s2 = scalar_select %p1007_p10, %s5083_s0, 1  ;;  %v3949_v29 = vld [vmem:[%s5622_s13] ss:$0 sm:$0xff]  ;;  %4300 = vmatpush3.bf16.msra.mxu0 %v4552_v37 }
  0x56   : > { %4313 = vmatprep.subr.bf16.mxu0 %v4876_v15  ;;  %s5633_s13 = smov 80  }
  0x57   : > { %s4172_s16 = sshll.u32 %s1008_s2, 4  ;;  %s5582_s2 = smov 96  }
  0x58   : > { %s1011_s22 = scalar_lea.vmem %s5620_s5, %s4172_s16  ;;  %s5577_s16 = smov 112  }
  0x59   : > { %v1013_v0 = vld [vmem:[%s1011_s22] sm:$0xff]  ;;  %v1014_v1 = vld [vmem:[%s1011_s22 + $0x8] sm:$0x1]  ;;  %s5580_s22 = smov 64   ;;  %s5630_s5 = sld [smem:[#allocation16_spill]] }
  0x5a   : > { %v1018_v2 = vsel %vm1017_vm0, %v1013_v0, 0.0  ;;  %v1022_v3 = vsel %vm1021_vm1, %v1014_v1, 0.0 }
  0x5b   : > { %1019 = vadd.xlane.f32.xlu0 %v1018_v2 }
  0x5f   : > { %1023 = vadd.xlane.f32.xlu0 %v1022_v3 }
  0xe8   : > { %v1020_v4 = vpop.xlane.xlu0 %1019 }
  0xe9   : > { %v1026_v5 = vmul.f32 0.03125, %v1020_v4 }
  0xeb   : > { %v1028_v6 = vsub.f32 %v1013_v0, %v1026_v5 }
  0xec   : > { %v1024_v7 = vpop.xlane.xlu0 %1023 }
  0xed   : > { %v1027_v8 = vmul.f32 0.03125, %v1024_v7  ;;  %v1030_v9 = vmul.f32 %v1028_v6, %v1028_v6 }
  0xef   : > { %v1029_v10 = vsub.f32 %v1014_v1, %v1027_v8  ;;  %v1032_v11 = vsel %vm1017_vm0, %v1030_v9, 0.0 }
  0xf0   : > { %1033 = vadd.xlane.f32.xlu1 %v1032_v11 }
  0xf1   : > { %v1031_v12 = vmul.f32 %v1029_v10, %v1029_v10 }
  0xf3   : > { %v1035_v13 = vsel %vm1021_vm1, %v1031_v12, 0.0 }
  0xf4   : > { %1036 = vadd.xlane.f32.xlu1 %v1035_v13 }
 0x17d   : > { %v1034_v17 = vpop.xlane.xlu1 %1033 }
 0x17e   : > { %v1038_v18 = vmul.f32 0.03125, %v1034_v17  ;;  %v3978_v17 = vld [vmem:[%s4925_s29] ss:$0 sm:$0xff] }
 0x180   : > { %v1040_v19 = vadd.f32 1e-05, %v1038_v18 }
 0x181   : > { %v1037_v20 = vpop.xlane.xlu1 %1036 }
 0x182   : > { %4711 = vrsqrt.f32 %v1040_v19  ;;  %v1039_v21 = vmul.f32 0.03125, %v1037_v20 }
 0x184   : > { %v1041_v22 = vadd.f32 1e-05, %v1039_v21 }
 0x186   : > { %4713 = vrsqrt.f32 %v1041_v22 }
 0x18c   : > { %v4712_v23 = vpop.eup %4711 }
 0x18d   : > { %v1044_v24 = vmul.f32 %v4712_v23, %v1028_v6 }
 0x18f   : > { %v1052_v28 = vmul.f32 %v3948_v25, %v1044_v24 }
 0x190   : > { %v4714_v26 = vpop.eup %4713 }
 0x191   : > { %v1045_v27 = vmul.f32 %v4714_v26, %v1029_v10  ;;  %v1060_v31 = vadd.f32 %v3949_v29, %v1052_v28 }
 0x193   : > { %v1053_v30 = vmul.f32 %v3948_v25, %v1045_v27 }
 0x195   : > { %v1061_v32 = vadd.f32 %v3949_v29, %v1053_v30 }
 0x197   : > { %v1066_v33 = vpack.c.bf16 %v1061_v32, %v1060_v31 }
 0x199   : > { %4270 = vmatmul.mubr.msk.bf16.vlgmr.msra.gmra.mrb[0].mxu1 %vm1017_vm0, %v1066_v33 }
 0x19a   : > { %4277 = vmatprep.mubr.msk.bf16.mxu1 %vm4877_vm2, %v4876_v15  ;;  %4274 = vmatpush3.bf16.msra.mxu1 %v4549_v34 }
 0x19b   : > { %4275 = vmatprep.subr.bf16.mxu1 %v4876_v15 }
 0x19e   : > { %4276 = vmatpush3.bf16.msra.mxu1 %v4551_v36 }
 0x19f   : > { %4281 = vmatprep.subr.bf16.mxu1 %v4876_v15 }
 0x26c   : > { %v1123_v39 = vpop.f32.mrb[0].mxu1 }
 0x26d   : > { %v5141_v40 = vadd.f32 %v3950_v38, %v1123_v39  ;;  %v4271_v41 = vpop.f32.mrb[1].mxu1 }
 0x26e   : > { %v1126_v42 = vpop.f32.mrb[2].mxu1 }
 0x26f   : > { %v5143_v43 = vadd.f32 %v3950_v38, %v1126_v42  ;;  %v4272_v44 = vpop.f32.mrb[3].mxu1  ;;  %v1133_v45 = vrot.slane %v5141_v40, 6 }
 0x271   : > { %v1134_v46 = vrot.slane %v5143_v43, 6  ;;  %v1138_v48 = vsel %vm1132_vm3, 0.0, %v1133_v45 }
 0x273   : > { %v1135_v47 = vsel %vm1132_vm3, %v1133_v45, %v1134_v46 }
 0x274   : > { %v1140_v49 = vsel %vm1139_vm4, %v1135_v47, 0.0 }
 0x275   : > { %v1145_v50 = vpack.c.bf16 %v1140_v49, %v1138_v48 }
 0x277   : > { %v1152_v51 = vshrl.u32 %v1145_v50, 16  ;;  %v1154_v52 = vshll.u32 %v1145_v50, 16  ;;  %v1275_v62 = vrot.slane %v1145_v50, 1 }
 0x279   : > { %v1156_v53 = vrot.slane %v1154_v52, 1  ;;  %v1339_v54 = vrot.slane %v1152_v51, 1  ;;  %v1340_v55 = vrot.slane %v1154_v52, 2 }
 0x27b   : > { %v1157_v57 = vor.u32 %v1156_v53, %v1152_v51  ;;  %v1341_v58 = vor.u32 %v1340_v55, %v1339_v54 }
 0x27d   : > { %4278 = vmatmul.mubr.msk.bf16.vlgmr.msra.gmra.mrb[4].mxu1 %vm1017_vm0, %v1157_v57  ;;  %4302 = vmatmul.mubr.msk.bf16.vlgmr.msra.gmra.mrb[0].mxu0 %vm1017_vm0, %v1341_v58  ;;  %v4558_v58 = vld [vmem:[%s5617_s14 + $0x8] sm:$0xff]  }
 0x27e   : > { %4282 = vmatpush3.bf16.msra.mxu1 %v4553_v56  ;;  %4285 = vmatprep.mubr.msk.bf16.mxu1 %vm4877_vm2, %v4876_v15 }
 0x27f   : > { %4283 = vmatprep.subr.bf16.mxu1 %v4876_v15  ;;  %4315 = vmatprep.mubr.msk.bf16.mxu0 %vm4877_vm2, %v4876_v15 }
 0x282   : > { %4284 = vmatpush3.bf16.msra.mxu1 %v4554_v59 }
 0x283   : > { %4289 = vmatprep.subr.bf16.mxu1 %v4876_v15 }
 0x285   : > { %4286 = vmatmul.mubr.msk.bf16.vlgmr.msra.gmra.mrb[8].mxu1 %vm1017_vm0, %v1145_v50 }
 0x286   : > { %4290 = vmatpush3.bf16.msra.mxu1 %v4555_v60  ;;  %4293 = vmatprep.mubr.msk.bf16.mxu1 %vm4877_vm2, %v4876_v15 }
 0x287   : > { %4291 = vmatprep.subr.bf16.mxu1 %v4876_v15 }
 0x28a   : > { %4292 = vmatpush3.bf16.msra.mxu1 %v4556_v61 }
 0x28b   : > { %4305 = vmatprep.subr.bf16.mxu1 %v4876_v15 }
 0x28d   : > { %4294 = vmatmul.mubr.msk.bf16.vlgmr.msra.gmra.mrb[12].mxu1 %vm1017_vm0, %v1275_v62 }
 0x28e   : > { %4309 = vmatprep.mubr.msk.bf16.mxu1 %vm4877_vm2, %v4876_v15 }
 0x350   : > { %v1207_v63 = vpop.f32.mrb[4].mxu1  ;;  %v1391_v0 = vpop.f32.mrb[0].mxu0 }
 0x351   : > { %v4279_v1 = vpop.f32.mrb[5].mxu1  ;;  %v4303_v2 = vpop.f32.mrb[1].mxu0 }
 0x352   : > { %v1210_v3 = vpop.f32.mrb[6].mxu1  ;;  %v1394_v4 = vpop.f32.mrb[2].mxu0  ;;  %v3979_v2 = vld [vmem:[%s5623_s3] ss:$0 sm:$0xff]  ;;  %s5629_s3 = sld [smem:[#allocation15_spill]] }
 0x353   : > { %v4280_v5 = vpop.f32.mrb[7].mxu1  ;;  %v4304_v6 = vpop.f32.mrb[3].mxu0 }
 0x358   : > { %v1262_v7 = vpop.f32.mrb[8].mxu1 }
 0x359   : > { %v1263_v8 = vadd.f32 %v1262_v7, %v1207_v63  ;;  %v4287_v9 = vpop.f32.mrb[9].mxu1  ;;  %v3980_v7 = vld [vmem:[%s5624_s8] ss:$0 sm:$0xff]  ;;  %s5631_s8 = sld [smem:[#allocation17_spill]] }
 0x35a   : > { %v1265_v10 = vpop.f32.mrb[10].mxu1 }
 0x35b   : > { %v1266_v11 = vadd.f32 %v1265_v10, %v1210_v3  ;;  %v4288_v12 = vpop.f32.mrb[11].mxu1 }
 0x35c   : > { %v3981_v12 = vld [vmem:[%s4945_s19] ss:$0 sm:$0xff] }
 0x360   : > { %v1325_v13 = vpop.f32.mrb[12].mxu1 }
 0x361   : > { %v1332_v14 = vadd.f32 %v1325_v13, %v1263_v8  ;;  %v4295_v16 = vpop.f32.mrb[13].mxu1 }
 0x362   : > { %v1328_v18 = vpop.f32.mrb[14].mxu1 }
 0x363   : > { %v1398_v19 = vadd.f32 %v1391_v0, %v1332_v14  ;;  %v1333_v20 = vadd.f32 %v1328_v18, %v1266_v11  ;;  %v4296_v21 = vpop.f32.mrb[15].mxu1 }
 0x365   : > { %v1407_v22 = vadd.f32 %v3978_v17, %v1398_v19  ;;  %v1399_v23 = vadd.f32 %v1394_v4, %v1333_v20 }
 0x367   : > { %v1409_v24 = vmul.f32 %v1407_v22, %v1407_v22  ;;  %v1408_v25 = vadd.f32 %v3978_v17, %v1399_v23 }
 0x369   : > { %v1411_v26 = vmul.f32 %v1409_v24, %v1407_v22  ;;  %v1410_v27 = vmul.f32 %v1408_v25, %v1408_v25 }
 0x36b   : > { %v1412_v28 = vmul.f32 %v1410_v27, %v1408_v25  ;;  %v1413_v29 = vmul.f32 0.044715, %v1411_v26 }
 0x36d   : > { %v1415_v30 = vadd.f32 %v1413_v29, %v1407_v22  ;;  %v1414_v31 = vmul.f32 0.044715, %v1412_v28 }
 0x36f   : > { %v1417_v32 = vmul.f32 0.7978846, %v1415_v30  ;;  %v1416_v33 = vadd.f32 %v1414_v31, %v1408_v25 }
 0x371   : > { %4715 = vtanh.f32 %v1417_v32  ;;  %v1418_v34 = vmul.f32 0.7978846, %v1416_v33 }
 0x373   : > { %4717 = vtanh.f32 %v1418_v34 }
 0x37b   : > { %v4716_v35 = vpop.eup %4715 }
 0x37c   : > { %v1421_v36 = vadd.f32 1.0, %v4716_v35 }
 0x37d   : > { %v4718_v37 = vpop.eup %4717 }
 0x37e   : > { %v1423_v38 = vmul.f32 0.5, %v1421_v36  ;;  %v1422_v39 = vadd.f32 1.0, %v4718_v37 }
 0x380   : > { %v1425_v41 = vmul.f32 %v1423_v38, %v1407_v22  ;;  %v1424_v42 = vmul.f32 0.5, %v1422_v39 }
 0x382   : > { %v1427_v44 = vadd.f32 %v1425_v41, %v5141_v40  ;;  %v1426_v45 = vmul.f32 %v1424_v42, %v1408_v25 }
 0x384   : > { %v1431_v46 = vsel %vm1017_vm0, %v1427_v44, 0.0  ;;  %v1428_v47 = vadd.f32 %v1426_v45, %v5143_v43  ;;  %v4557_v43 = vld [vmem:[%s5617_s14] sm:$0xff]  }
 0x385   : > { %1432 = vadd.xlane.f32.xlu0 %v1431_v46  ;;  %4306 = vmatpush3.bf16.msra.mxu1 %v4557_v43 }
 0x386   : > { %v1434_v48 = vsel %vm1021_vm1, %v1428_v47, 0.0  ;;  %4307 = vmatprep.subr.bf16.mxu1 %v4876_v15 }
 0x387   : > { %1435 = vadd.xlane.f32.xlu1 %v1434_v48 }
 0x389   : > { %4308 = vmatpush3.bf16.msra.mxu1 %v4558_v58 }
 0x38a   : > { %4319 = vmatprep.subr.bf16.mxu1 %v4876_v15 }
 0x412   : > { %v1433_v49 = vpop.xlane.xlu0 %1432 }
 0x413   : > { %v1437_v50 = vmul.f32 0.03125, %v1433_v49 }
 0x414   : > { %v1436_v51 = vpop.xlane.xlu1 %1435 }
 0x415   : > { %v1439_v52 = vsub.f32 %v1427_v44, %v1437_v50  ;;  %v1438_v53 = vmul.f32 0.03125, %v1436_v51 }
 0x417   : > { %v1440_v54 = vsub.f32 %v1428_v47, %v1438_v53  ;;  %v1441_v55 = vmul.f32 %v1439_v52, %v1439_v52 }
 0x419   : > { %v1443_v40 = vsel %vm1017_vm0, %v1441_v55, 0.0  ;;  %v1442_v56 = vmul.f32 %v1440_v54, %v1440_v54 }
 0x41a   : > { %1444 = vadd.xlane.f32.xlu0 %v1443_v40 }
 0x41b   : > { %v1446_v57 = vsel %vm1021_vm1, %v1442_v56, 0.0 }
 0x41c   : > { %1447 = vadd.xlane.f32.xlu1 %v1446_v57 }
 0x4a7   : > { %v1445_v59 = vpop.xlane.xlu0 %1444 }
 0x4a8   : > { %v1449_v60 = vmul.f32 0.03125, %v1445_v59 }
 0x4a9   : > { %v1448_v61 = vpop.xlane.xlu1 %1447 }
 0x4aa   : > { %v1451_v62 = vadd.f32 1e-05, %v1449_v60  ;;  %v1450_v63 = vmul.f32 0.03125, %v1448_v61 }
 0x4ac   : > { %4719 = vrsqrt.f32 %v1451_v62  ;;  %v1452_v0 = vadd.f32 1e-05, %v1450_v63  ;;  %v4883_v63 = vmov 65535  }
 0x4ae   : > { %4721 = vrsqrt.f32 %v1452_v0  ;;  %v1628_v0 = vsel %vm1626_vm8, 4294967295, %v4883_v63 }
 0x4b6   : > { %v4720_v1 = vpop.eup %4719 }
 0x4b7   : > { %v1455_v3 = vmul.f32 %v4720_v1, %v1439_v52 }
 0x4b8   : > { %v4722_v4 = vpop.eup %4721 }
 0x4b9   : > { %v1463_v5 = vmul.f32 %v3979_v2, %v1455_v3  ;;  %v1456_v6 = vmul.f32 %v4722_v4, %v1440_v54 }
 0x4bb   : > { %v1464_v8 = vmul.f32 %v3979_v2, %v1456_v6  ;;  %v5180_v9 = vadd.f32 %v3980_v7, %v1463_v5  ;;  %v5219_v2 = vsel %vm1627_vm9, %v1628_v0, 0 }
 0x4bd   : > { %v5182_v10 = vadd.f32 %v3980_v7, %v1464_v8 }
 0x4bf   : > { %v1477_v11 = vpack.c.bf16 %v5182_v10, %v5180_v9 }
 0x4c1   : > { %4310 = vmatmul.mubr.msk.bf16.vlgmr.msra.gmra.mrb[16].mxu1 %vm1017_vm0, %v1477_v11 }
 0x4c2   : > { %4321 = vmatprep.mubr.msk.bf16.mxu1 %vm4877_vm2, %v4876_v15 }
 0x594   : > { %v1534_v13 = vpop.f32.mrb[16].mxu1 }
 0x595   : > { %v1535_v14 = vadd.f32 %v3981_v12, %v1534_v13  ;;  %v4311_v16 = vpop.f32.mrb[17].mxu1 }
 0x596   : > { %v1537_v17 = vpop.f32.mrb[18].mxu1 }
 0x597   : > { %v1538_v18 = vadd.f32 %v3981_v12, %v1537_v17  ;;  %v4312_v19 = vpop.f32.mrb[19].mxu1  ;;  %v1541_v20 = vmul.f32 0.25, %v1535_v14 }
 0x599   : > { %v1542_v21 = vmul.f32 0.25, %v1538_v18  ;;  %v5190_v22 = vpack.c.bf16 %v1538_v18, %v1535_v14 }
 0x59b   : > { %1677 = vrot.lane.b32.xlu1 %v5190_v22, %s5581_s23  ;;  %1546 = vrot.lane.b32.xlu0 %v5190_v22, %s5582_s2  ;;  %v1543_v23 = vpack.c.bf16 %v1542_v21, %v1541_v20  ;;  %v4559_v21 = vld [vmem:[%s4950_s24] sm:$0xff]   ;;  %s5627_s23 = sld [smem:[#allocation14_spill]]  ;;  %s5628_s2 = sld [smem:[#allocation13_spill]] }
 0x59f   : > { %1675 = vrot.lane.b32.xlu1 %v1543_v23, %s5577_s16  ;;  %s5578_s16 = smov 48  }
 0x60d   : > { %v1547_v24 = vpop.permute.xlu0 %1546  ;;  %v1678_v26 = vpop.permute.xlu1 %1677 }
 0x60e   : > { %v1553_v25 = vsel %vm1548_vm5, %v1547_v24, 0  ;;  %v1683_v27 = vsel %vm1548_vm5, %v1678_v26, 0 }
 0x60f   : > { %4314 = vmatpush3.bf16.xpose.msra.mxu0 %v1553_v25  ;;  %v4560_v25 = vld [vmem:[%s4950_s24 + $0x8] sm:$0xff]  }
 0x610   : > { %4325 = vmatprep.subr.bf16.mxu0 %v4876_v15 }
 0x611   : > { %v1676_v28 = vpop.permute.xlu1 %1675 }
 0x616   : > { %4316 = vmatmul.mubr.msk.bf16.vlgmr.msra.gmra.mrb[4].mxu0 %vm1548_vm5, %v1543_v23 }
 0x617   : > { %4326 = vmatpush3.bf16.xpose.msra.mxu0 %v1683_v27  ;;  %4327 = vmatprep.mubr.msk.bf16.mxu0 %vm4877_vm2, %v4876_v15 }
 0x618   : > { %4337 = vmatprep.subr.bf16.mxu0 %v4876_v15 }
 0x61e   : > { %4328 = vmatmul.mubr.msk.bf16.vlgmr.msra.gmra.mrb[8].mxu0 %vm1548_vm5, %v1676_v28 }
 0x61f   : > { %4341 = vmatprep.mubr.msk.bf16.mxu0 %vm4877_vm2, %v4876_v15  ;;  %4338 = vmatpush3.bf16.msra.mxu0 %v4559_v21  ;;  %v4568_v21 = vld [vmem:[%s5627_s23 + $0x28] sm:$0xff]  }
 0x620   : > { %4339 = vmatprep.subr.bf16.mxu0 %v4876_v15 }
 0x623   : > { %4340 = vmatpush3.bf16.msra.mxu0 %v4560_v25 }
 0x624   : > { %4399 = vmatprep.subr.bf16.mxu0 %v4876_v15 }
 0x6e9   : > { %v1589_v29 = vpop.f32.mrb[4].mxu0 }
 0x6ea   : > { %v4317_v30 = vpop.f32.mrb[5].mxu0  ;;  %v1597_v31 = vsel %vm1596_vm6, %v1589_v29, -inf }
 0x6eb   : > { %1598 = vmax.xlane.f32.xlu1 %v1597_v31  ;;  %v1592_v32 = vpop.f32.mrb[6].mxu0 }
 0x6ec   : > { %v4318_v33 = vpop.f32.mrb[7].mxu0  ;;  %v1601_v34 = vsel %vm1600_vm7, %v1592_v32, -inf }
 0x6ed   : > { %1602 = vmax.xlane.f32.xlu0 %v1601_v34 }
 0x6f1   : > { %v1719_v35 = vpop.f32.mrb[8].mxu0 }
 0x6f2   : > { %v4329_v36 = vpop.f32.mrb[9].mxu0  ;;  %v1726_v37 = vsel %vm1596_vm6, %v1719_v35, -inf }
 0x6f3   : > { %1727 = vmax.xlane.f32.xlu0 %v1726_v37  ;;  %v1722_v38 = vpop.f32.mrb[10].mxu0 }
 0x6f4   : > { %v4330_v39 = vpop.f32.mrb[11].mxu0  ;;  %v1729_v41 = vsel %vm1600_vm7, %v1722_v38, -inf }
 0x6f7   : > { %1730 = vmax.xlane.f32.xlu0 %v1729_v41 }
 0x778   : > { %v1599_v42 = vpop.xlane.xlu1 %1598 }
 0x779   : > { %v1604_v44 = vsub.f32 %v1589_v29, %v1599_v42 }
 0x77a   : > { %v1603_v45 = vpop.xlane.xlu0 %1602 }
 0x77b   : > { %v1606_v46 = vmul.f32 1.442695, %v1604_v44  ;;  %v1605_v47 = vsub.f32 %v1592_v32, %v1603_v45 }
 0x77d   : > { %4723 = vpow2.f32 %v1606_v46  ;;  %v1608_v48 = vmul.f32 1.442695, %v1605_v47 }
 0x77f   : > { %4725 = vpow2.f32 %v1608_v48 }
 0x780   : > { %v1728_v49 = vpop.xlane.xlu0 %1727 }
 0x781   : > { %v1732_v50 = vsub.f32 %v1719_v35, %v1728_v49 }
 0x783   : > { %v1734_v51 = vmul.f32 1.442695, %v1732_v50 }
 0x784   : > { %v1731_v52 = vpop.xlane.xlu0 %1730 }
 0x785   : > { %4727 = vpow2.f32 %v1734_v51  ;;  %v1733_v53 = vsub.f32 %v1722_v38, %v1731_v52  ;;  %v3989_v38 = vld [vmem:[%s4955_s30] ss:$0 sm:$0xff] }
 0x787   : > { %v4724_v54 = vpop.eup %4723  ;;  %v1736_v55 = vmul.f32 1.442695, %v1733_v53 }
 0x788   : > { %v1610_v40 = vsel %vm1596_vm6, %v4724_v54, 0.0 }
 0x789   : > { %v4726_v56 = vpop.eup %4725  ;;  %4729 = vpow2.f32 %v1736_v55  ;;  %1611 = vadd.xlane.f32.xlu1 %v1610_v40 }
 0x78a   : > { %v1613_v57 = vsel %vm1600_vm7, %v4726_v56, 0.0 }
 0x78b   : > { %1614 = vadd.xlane.f32.xlu0 %v1613_v57 }
 0x78f   : > { %v4728_v43 = vpop.eup %4727 }
 0x790   : > { %v1738_v58 = vsel %vm1596_vm6, %v4728_v43, 0.0 }
 0x791   : > { %1739 = vadd.xlane.f32.xlu1 %v1738_v58  ;;  %v4562_v58 = vld [vmem:[%s4970_s20 + $0x8] sm:$0xff]  }
 0x793   : > { %v4730_v59 = vpop.eup %4729 }
 0x794   : > { %v1741_v60 = vsel %vm1600_vm7, %v4730_v59, 0.0 }
 0x795   : > { %1742 = vadd.xlane.f32.xlu0 %v1741_v60 }
 0x7a2   : > { %1621 = vrot.lane.b32.xlu1 %v5190_v22, %s5580_s22  ;;  %s5626_s22 = sld [smem:[#allocation12_spill]] }
 0x7ab   : > { %1749 = vrot.lane.b32.xlu0 %v5190_v22, %s5578_s16  ;;  %s5579_s16 = smov 16  }
 0x816   : > { %v1612_v61 = vpop.xlane.xlu1 %1611 }
 0x817   : > { %4731 = vrcp.f32 %v1612_v61 }
 0x818   : > { %v1615_v62 = vpop.xlane.xlu0 %1614 }
 0x819   : > { %4733 = vrcp.f32 %v1615_v62 }
 0x81e   : > { %v1740_v1 = vpop.xlane.xlu1 %1739 }
 0x81f   : > { %4735 = vrcp.f32 %v1740_v1 }
 0x821   : > { %v4732_v3 = vpop.eup %4731 }
 0x822   : > { %v1622_v4 = vpop.permute.xlu1 %1621  ;;  %v1743_v5 = vpop.xlane.xlu0 %1742  ;;  %v1618_v8 = vmul.f32 %v4732_v3, %v4724_v54 }
 0x823   : > { %v4734_v6 = vpop.eup %4733  ;;  %v1631_v7 = vand.u32 %v5219_v2, %v1622_v4  ;;  %4737 = vrcp.f32 %v1743_v5 }
 0x824   : > { %v1619_v11 = vmul.f32 %v4734_v6, %v4726_v56 }
 0x825   : > { %4320 = vmatpush3.bf16.msra.mxu1 %v1631_v7 }
 0x826   : > { %v1750_v12 = vpop.permute.xlu0 %1749  ;;  %v1620_v13 = vpack.c.bf16 %v1619_v11, %v1618_v8  ;;  %4331 = vmatprep.subr.bf16.mxu1 %v4876_v15  ;;  %v3994_v8 = vld [vmem:[%s5626_s22] ss:$0 sm:$0xff] }
 0x827   : > { %v1755_v14 = vand.u32 %v1750_v12, %v5219_v2 }
 0x828   : > { %4322 = vmatmul.mubr.msk.bf16.vlgmr.msra.gmra.mrb[20].mxu1 %vm1596_vm6, %v1620_v13 }
 0x829   : > { %4332 = vmatpush3.bf16.msra.mxu1 %v1755_v14  ;;  %4333 = vmatprep.mubr.msk.bf16.mxu1 %vm4877_vm2, %v4876_v15  ;;  %v4736_v16 = vpop.eup %4735 }
 0x82a   : > { %4345 = vmatprep.subr.bf16.mxu1 %v4876_v15  ;;  %v1746_v18 = vmul.f32 %v4736_v16, %v4728_v43  ;;  %v4563_v16 = vld [vmem:[%s5627_s23] sm:$0xff]  }
 0x82d   : > { %v4738_v17 = vpop.eup %4737 }
 0x82e   : > { %v1747_v19 = vmul.f32 %v4738_v17, %v4730_v59  ;;  %v4564_v17 = vld [vmem:[%s5627_s23 + $0x8] sm:$0xff]  }
 0x830   : > { %v1748_v20 = vpack.c.bf16 %v1747_v19, %v1746_v18  ;;  %v4565_v18 = vld [vmem:[%s5627_s23 + $0x10] sm:$0xff]   ;;  %v4566_v19 = vld [vmem:[%s5627_s23 + $0x18] sm:$0xff]  }
 0x832   : > { %4334 = vmatmul.mubr.msk.bf16.vlgmr.msra.gmra.mrb[24].mxu1 %vm1596_vm6, %v1748_v20  ;;  %v4567_v20 = vld [vmem:[%s5627_s23 + $0x20] sm:$0xff]  }
 0x833   : > { %4349 = vmatprep.mubr.msk.bf16.mxu1 %vm4877_vm2, %v4876_v15 }
 0x8fb   : > { %v1667_v22 = vpop.f32.mrb[20].mxu1 }
 0x8fc   : > { %v4323_v23 = vpop.f32.mrb[21].mxu1 }
 0x8fd   : > { %v1670_v24 = vpop.f32.mrb[22].mxu1  ;;  %v4570_v23 = vld [vmem:[%s5627_s23 + $0x38] sm:$0xff]  }
 0x8fe   : > { %v4324_v26 = vpop.f32.mrb[23].mxu1 }
 0x905   : > { %v1791_v27 = vpop.f32.mrb[24].mxu1 }
 0x906   : > { %v4335_v28 = vpop.f32.mrb[25].mxu1 }
 0x907   : > { %v1794_v29 = vpop.f32.mrb[26].mxu1 }
 0x908   : > { %v4537_v30 = vpack.i.bf16 %v1794_v29, %v1791_v27  ;;  %v4336_v31 = vpop.f32.mrb[27].mxu1 }
 0x90a   : > { %4538 = vrot.lane.b32.xlu1 %v4537_v30, %s5579_s16  ;;  %s5625_s16 = sld [smem:[#allocation11_spill]] }
 0x910   : > { %v3993_v3 = vld [vmem:[%s5625_s16] ss:$0 sm:$0xff] }
 0x97c   : > { %v4539_v32 = vpop.permute.xlu1 %4538 }
 0x97d   : > { %v4541_v33 = vunpack.i.h.bf16 %v4539_v32  ;;  %v4540_v34 = vunpack.i.l.bf16 %v4539_v32 }
 0x97f   : > { %v1807_v35 = vsel %vm1548_vm5, %v1670_v24, %v4541_v33  ;;  %v1806_v36 = vsel %vm1548_vm5, %v1667_v22, %v4540_v34  ;;  %v4569_v22 = vld [vmem:[%s5627_s23 + $0x30] sm:$0xff]   ;;  %v3995_v24 = vld [vmem:[%s5628_s2] ss:$0 sm:$0xff] }
 0x980   : > { %v1812_v37 = vpack.c.bf16 %v1807_v35, %v1806_v36 }
 0x982   : > { %4342 = vmatmul.mubr.msk.bf16.vlgmr.msra.gmra.mrb[12].mxu0 %vm1017_vm0, %v1812_v37 }
 0x983   : > { %4401 = vmatprep.mubr.msk.bf16.mxu0 %vm4877_vm2, %v4876_v15 }
 0xa55   : > { %v1869_v39 = vpop.f32.mrb[12].mxu0 }
 0xa56   : > { %v1870_v41 = vadd.f32 %v3989_v38, %v1869_v39  ;;  %v4343_v42 = vpop.f32.mrb[13].mxu0 }
 0xa57   : > { %v1872_v44 = vpop.f32.mrb[14].mxu0 }
 0xa58   : > { %v1873_v45 = vadd.f32 %v3989_v38, %v1872_v44  ;;  %v4344_v46 = vpop.f32.mrb[15].mxu0  ;;  %v1876_v47 = vadd.f32 %v1870_v41, %v5180_v9 }
 0xa5a   : > { %v1880_v48 = vsel %vm1017_vm0, %v1876_v47, 0.0  ;;  %v1877_v49 = vadd.f32 %v1873_v45, %v5182_v10  ;;  %v4561_v10 = vld [vmem:[%s4970_s20] sm:$0xff]  }
 0xa5b   : > { %1881 = vadd.xlane.f32.xlu1 %v1880_v48  ;;  %4346 = vmatpush3.bf16.msra.mxu1 %v4561_v10 }
 0xa5c   : > { %v1883_v50 = vsel %vm1021_vm1, %v1877_v49, 0.0  ;;  %4347 = vmatprep.subr.bf16.mxu1 %v4876_v15 }
 0xa5d   : > { %1884 = vadd.xlane.f32.xlu0 %v1883_v50 }
 0xa5f   : > { %4348 = vmatpush3.bf16.msra.mxu1 %v4562_v58 }
 0xa60   : > { %4353 = vmatprep.subr.bf16.mxu1 %v4876_v15 }
 0xae8   : > { %v1882_v51 = vpop.xlane.xlu1 %1881 }
 0xae9   : > { %v1886_v52 = vmul.f32 0.03125, %v1882_v51 }
 0xaea   : > { %v1885_v53 = vpop.xlane.xlu0 %1884 }
 0xaeb   : > { %v1888_v54 = vsub.f32 %v1876_v47, %v1886_v52  ;;  %v1887_v55 = vmul.f32 0.03125, %v1885_v53  ;;  %v3999_v52 = vld [vmem:[%s5629_s3] ss:$0 sm:$0xff] }
 0xaed   : > { %v1889_v40 = vsub.f32 %v1877_v49, %v1887_v55  ;;  %v1890_v56 = vmul.f32 %v1888_v54, %v1888_v54 }
 0xaef   : > { %v1892_v57 = vsel %vm1017_vm0, %v1890_v56, 0.0  ;;  %v1891_v9 = vmul.f32 %v1889_v40, %v1889_v40 }
 0xaf0   : > { %1893 = vadd.xlane.f32.xlu0 %v1892_v57 }
 0xaf1   : > { %v1895_v43 = vsel %vm1021_vm1, %v1891_v9, 0.0 }
 0xaf2   : > { %1896 = vadd.xlane.f32.xlu1 %v1895_v43 }
 0xb7d   : > { %v1894_v59 = vpop.xlane.xlu0 %1893 }
 0xb7e   : > { %v1898_v60 = vmul.f32 0.03125, %v1894_v59 }
 0xb7f   : > { %v1897_v61 = vpop.xlane.xlu1 %1896 }
 0xb80   : > { %v1900_v62 = vadd.f32 1e-05, %v1898_v60  ;;  %v1899_v63 = vmul.f32 0.03125, %v1897_v61 }
 0xb82   : > { %4739 = vrsqrt.f32 %v1900_v62  ;;  %v1901_v0 = vadd.f32 1e-05, %v1899_v63 }
 0xb84   : > { %4741 = vrsqrt.f32 %v1901_v0 }
 0xb8c   : > { %v4740_v1 = vpop.eup %4739 }
 0xb8d   : > { %v1904_v4 = vmul.f32 %v4740_v1, %v1888_v54 }
 0xb8e   : > { %v4742_v5 = vpop.eup %4741 }
 0xb8f   : > { %v1912_v6 = vmul.f32 %v3993_v3, %v1904_v4  ;;  %v1905_v7 = vmul.f32 %v4742_v5, %v1889_v40 }
 0xb91   : > { %v1913_v11 = vmul.f32 %v3993_v3, %v1905_v7  ;;  %v5254_v12 = vadd.f32 %v3994_v8, %v1912_v6  ;;  %v4571_v6 = vld [vmem:[%s5617_s14 + $0x10] sm:$0xff]   ;;  %v4572_v7 = vld [vmem:[%s5617_s14 + $0x18] sm:$0xff]   ;;  %s5634_s14 = smov 112  }
 0xb93   : > { %v5256_v13 = vadd.f32 %v3994_v8, %v1913_v11 }
 0xb95   : > { %v1926_v14 = vpack.c.bf16 %v5256_v13, %v5254_v12 }
 0xb97   : > { %4350 = vmatmul.mubr.msk.bf16.vlgmr.msra.gmra.mrb[28].mxu1 %vm1017_vm0, %v1926_v14 }
 0xb98   : > { %4369 = vmatprep.mubr.msk.bf16.mxu1 %vm4877_vm2, %v4876_v15  ;;  %4354 = vmatpush3.bf16.msra.mxu1 %v4563_v16 }
 0xb99   : > { %4355 = vmatprep.subr.bf16.mxu1 %v4876_v15 }
 0xb9c   : > { %4356 = vmatpush3.bf16.msra.mxu1 %v4564_v17 }
 0xb9d   : > { %4357 = vmatprep.subr.bf16.mxu1 %v4876_v15 }
 0xba0   : > { %4358 = vmatpush3.bf16.msra.mxu1 %v4565_v18  ;;  %v4008_v18 = vld [vmem:[%s5630_s5] ss:$0 sm:$0xff] }
 0xba1   : > { %4359 = vmatprep.subr.bf16.mxu1 %v4876_v15 }
 0xba4   : > { %4360 = vmatpush3.bf16.msra.mxu1 %v4566_v19 }
 0xba5   : > { %4361 = vmatprep.subr.bf16.mxu1 %v4876_v15 }
 0xba8   : > { %4362 = vmatpush3.bf16.msra.mxu1 %v4567_v20 }
 0xba9   : > { %4363 = vmatprep.subr.bf16.mxu1 %v4876_v15 }
 0xbac   : > { %4364 = vmatpush3.bf16.msra.mxu1 %v4568_v21 }
 0xbad   : > { %4365 = vmatprep.subr.bf16.mxu1 %v4876_v15 }
 0xbb0   : > { %4366 = vmatpush3.bf16.msra.mxu1 %v4569_v22 }
 0xbb1   : > { %4367 = vmatprep.subr.bf16.mxu1 %v4876_v15 }
 0xbb4   : > { %4368 = vmatpush3.bf16.msra.mxu1 %v4570_v23  ;;  %v4009_v23 = vld [vmem:[%s5631_s8] ss:$0 sm:$0xff] }
 0xbb5   : > { %4373 = vmatprep.subr.bf16.mxu1 %v4876_v15 }
 0xc6a   : > { %v1983_v25 = vpop.f32.mrb[28].mxu1 }
 0xc6b   : > { %v1984_v26 = vadd.f32 %v3995_v24, %v1983_v25  ;;  %v4351_v27 = vpop.f32.mrb[29].mxu1 }
 0xc6c   : > { %v1986_v28 = vpop.f32.mrb[30].mxu1 }
 0xc6d   : > { %v1990_v29 = vmul.f32 %v1984_v26, %v1984_v26  ;;  %v1987_v30 = vadd.f32 %v3995_v24, %v1986_v28  ;;  %v4352_v31 = vpop.f32.mrb[31].mxu1  ;;  %v4015_v28 = vld [vmem:[%s4945_s19 + $0x1] ss:$0 sm:$0xff] }
 0xc6f   : > { %v1992_v32 = vmul.f32 %v1990_v29, %v1984_v26  ;;  %v1991_v33 = vmul.f32 %v1987_v30, %v1987_v30 }
 0xc71   : > { %v1994_v34 = vmul.f32 0.044715, %v1992_v32  ;;  %v1993_v35 = vmul.f32 %v1991_v33, %v1987_v30 }
 0xc73   : > { %v1996_v36 = vadd.f32 %v1994_v34, %v1984_v26  ;;  %v1995_v37 = vmul.f32 0.044715, %v1993_v35 }
 0xc75   : > { %v1998_v38 = vmul.f32 0.7978846, %v1996_v36  ;;  %v1997_v39 = vadd.f32 %v1995_v37, %v1987_v30 }
 0xc77   : > { %4743 = vtanh.f32 %v1998_v38  ;;  %v1999_v41 = vmul.f32 0.7978846, %v1997_v39 }
 0xc79   : > { %4745 = vtanh.f32 %v1999_v41 }
 0xc81   : > { %v4744_v42 = vpop.eup %4743 }
 0xc82   : > { %v2002_v44 = vadd.f32 1.0, %v4744_v42 }
 0xc83   : > { %v4746_v45 = vpop.eup %4745 }
 0xc84   : > { %v2004_v46 = vmul.f32 0.5, %v2002_v44  ;;  %v2003_v47 = vadd.f32 1.0, %v4746_v45 }
 0xc86   : > { %v2005_v48 = vmul.f32 0.5, %v2003_v47  ;;  %v2006_v49 = vmul.f32 %v2004_v46, %v1984_v26 }
 0xc88   : > { %v2007_v50 = vmul.f32 %v2005_v48, %v1987_v30 }
 0xc8a   : > { %v2024_v51 = vpack.c.bf16 %v2007_v50, %v2006_v49 }
 0xc8c   : > { %4370 = vmatmul.mubr.bf16.vlgmr.msra.gmra.mrb[32].mxu1 %v2024_v51 }
 0xc8d   : > { %4377 = vmatprep.mubr.msk.bf16.mxu1 %vm4877_vm2, %v4876_v15  ;;  %4374 = vmatpush3.bf16.msra.mxu1 %v4571_v6 }
 0xc8e   : > { %4375 = vmatprep.subr.bf16.mxu1 %v4876_v15 }
 0xc91   : > { %4376 = vmatpush3.bf16.msra.mxu1 %v4572_v7 }
 0xc92   : > { %4381 = vmatprep.subr.bf16.mxu1 %v4876_v15 }
 0xd5f   : > { %v2114_v53 = vpop.f32.mrb[32].mxu1 }
 0xd60   : > { %v2115_v54 = vadd.f32 %v3999_v52, %v2114_v53  ;;  %v4371_v55 = vpop.f32.mrb[33].mxu1 }
 0xd61   : > { %v2117_v40 = vpop.f32.mrb[34].mxu1 }
 0xd62   : > { %v2118_v56 = vadd.f32 %v3999_v52, %v2117_v40  ;;  %v4372_v57 = vpop.f32.mrb[35].mxu1  ;;  %v2121_v9 = vadd.f32 %v2115_v54, %v5254_v12 }
 0xd64   : > { %v2125_v43 = vsel %vm1017_vm0, %v2121_v9, 0.0  ;;  %v2122_v10 = vadd.f32 %v2118_v56, %v5256_v13 }
 0xd65   : > { %2126 = vadd.xlane.f32.xlu0 %v2125_v43 }
 0xd66   : > { %v2128_v58 = vsel %vm1021_vm1, %v2122_v10, 0.0 }
 0xd67   : > { %2129 = vadd.xlane.f32.xlu1 %v2128_v58 }
 0xdf2   : > { %v2127_v59 = vpop.xlane.xlu0 %2126 }
 0xdf3   : > { %v2131_v60 = vmul.f32 0.03125, %v2127_v59 }
 0xdf4   : > { %v2130_v61 = vpop.xlane.xlu1 %2129 }
 0xdf5   : > { %v2133_v62 = vsub.f32 %v2121_v9, %v2131_v60  ;;  %v2132_v63 = vmul.f32 0.03125, %v2130_v61 }
 0xdf7   : > { %v2134_v0 = vsub.f32 %v2122_v10, %v2132_v63  ;;  %v2135_v1 = vmul.f32 %v2133_v62, %v2133_v62 }
 0xdf9   : > { %v2137_v3 = vsel %vm1017_vm0, %v2135_v1, 0.0  ;;  %v2136_v4 = vmul.f32 %v2134_v0, %v2134_v0 }
 0xdfa   : > { %2138 = vadd.xlane.f32.xlu0 %v2137_v3 }
 0xdfb   : > { %v2140_v5 = vsel %vm1021_vm1, %v2136_v4, 0.0 }
 0xdfc   : > { %2141 = vadd.xlane.f32.xlu1 %v2140_v5 }
 0xe87   : > { %v2139_v8 = vpop.xlane.xlu0 %2138 }
 0xe88   : > { %v2143_v11 = vmul.f32 0.03125, %v2139_v8 }
 0xe89   : > { %v2142_v12 = vpop.xlane.xlu1 %2141 }
 0xe8a   : > { %v2145_v13 = vadd.f32 1e-05, %v2143_v11  ;;  %v2144_v14 = vmul.f32 0.03125, %v2142_v12 }
 0xe8c   : > { %4747 = vrsqrt.f32 %v2145_v13  ;;  %v2146_v16 = vadd.f32 1e-05, %v2144_v14 }
 0xe8e   : > { %4749 = vrsqrt.f32 %v2146_v16 }
 0xe96   : > { %v4748_v17 = vpop.eup %4747 }
 0xe97   : > { %v2149_v19 = vmul.f32 %v4748_v17, %v2133_v62 }
 0xe98   : > { %v4750_v20 = vpop.eup %4749 }
 0xe99   : > { %v2157_v21 = vmul.f32 %v4008_v18, %v2149_v19  ;;  %v2150_v22 = vmul.f32 %v4750_v20, %v2134_v0 }
 0xe9b   : > { %v2158_v24 = vmul.f32 %v4008_v18, %v2150_v22  ;;  %v5295_v25 = vadd.f32 %v4009_v23, %v2157_v21 }
 0xe9d   : > { %v5297_v26 = vadd.f32 %v4009_v23, %v2158_v24 }
 0xe9f   : > { %v2172_v27 = vpack.c.bf16 %v5297_v26, %v5295_v25 }
 0xea1   : > { %4378 = vmatmul.mubr.msk.bf16.vlgmr.msra.gmra.mrb[36].mxu1 %vm1017_vm0, %v2172_v27 }
 0xea2   : > { %4383 = vmatprep.mubr.msk.bf16.mxu1 %vm4877_vm2, %v4876_v15 }
 0xf74   : > { %v2230_v29 = vpop.f32.mrb[36].mxu1 }
 0xf75   : > { %v2231_v30 = vadd.f32 %v4015_v28, %v2230_v29  ;;  %v4379_v31 = vpop.f32.mrb[37].mxu1 }
 0xf76   : > { %v2233_v32 = vpop.f32.mrb[38].mxu1 }
 0xf77   : > { %v2234_v33 = vadd.f32 %v4015_v28, %v2233_v32  ;;  %v4380_v34 = vpop.f32.mrb[39].mxu1  ;;  %v2237_v35 = vmul.f32 0.25, %v2231_v30 }
 0xf79   : > { %v2238_v36 = vmul.f32 0.25, %v2234_v33  ;;  %v5305_v37 = vpack.c.bf16 %v2234_v33, %v2231_v30 }
 0xf7b   : > { %2242 = vrot.lane.b32.xlu0 %v5305_v37, %s5632_s9  ;;  %v2239_v38 = vpack.c.bf16 %v2238_v36, %v2237_v35  ;;  %s5635_s9 = smov 64  }
 0xf7f   : > { %2366 = vrot.lane.b32.xlu0 %v5305_v37, %s5633_s13  ;;  %s5636_s13 = smov 48  }
 0xf83   : > { %2364 = vrot.lane.b32.xlu0 %v2239_v38, %s5634_s14  ;;  %s5637_s14 = smov 16  }
 0xfed   : > { %v2243_v39 = vpop.permute.xlu0 %2242 }
 0xfee   : > { %v2248_v41 = vsel %vm1548_vm5, %v2243_v39, 0  ;;  %v4574_v39 = vld [vmem:[%s4950_s24 + $0x18] sm:$0xff]  }
 0xfef   : > { %4382 = vmatpush3.bf16.xpose.msra.mxu1 %v2248_v41 }
 0xff0   : > { %4387 = vmatprep.subr.bf16.mxu1 %v4876_v15 }
 0xff1   : > { %v2367_v63 = vpop.permute.xlu0 %2366 }
 0xff2   : > { %v2372_v1 = vsel %vm1548_vm5, %v2367_v63, 0 }
 0xff5   : > { %v2365_v3 = vpop.permute.xlu0 %2364 }
 0xff6   : > { %4384 = vmatmul.mubr.msk.bf16.vlgmr.msra.gmra.mrb[40].mxu1 %vm1548_vm5, %v2239_v38 }
 0xff7   : > { %4389 = vmatprep.mubr.msk.bf16.mxu1 %vm4877_vm2, %v4876_v15 }
0x10c9   : > { %v2284_v42 = vpop.f32.mrb[40].mxu1 }
0x10ca   : > { %v4385_v44 = vpop.f32.mrb[41].mxu1  ;;  %v2291_v45 = vsel %vm1596_vm6, %v2284_v42, -inf }
0x10cb   : > { %2292 = vmax.xlane.f32.xlu1 %v2291_v45  ;;  %v2287_v46 = vpop.f32.mrb[42].mxu1 }
0x10cc   : > { %v4386_v47 = vpop.f32.mrb[43].mxu1  ;;  %v2294_v48 = vsel %vm1600_vm7, %v2287_v46, -inf }
0x10cf   : > { %2295 = vmax.xlane.f32.xlu1 %v2294_v48 }
0x1158   : > { %v2293_v49 = vpop.xlane.xlu1 %2292 }
0x1159   : > { %v2297_v50 = vsub.f32 %v2284_v42, %v2293_v49 }
0x115b   : > { %v2299_v51 = vmul.f32 1.442695, %v2297_v50 }
0x115c   : > { %v2296_v52 = vpop.xlane.xlu1 %2295 }
0x115d   : > { %4751 = vpow2.f32 %v2299_v51  ;;  %v2298_v53 = vsub.f32 %v2287_v46, %v2296_v52  ;;  %v4028_v52 = vld [vmem:[%s4955_s30 + $0x1] ss:$0 sm:$0xff] }
0x115f   : > { %v2301_v54 = vmul.f32 1.442695, %v2298_v53 }
0x1161   : > { %4753 = vpow2.f32 %v2301_v54 }
0x1167   : > { %v4752_v55 = vpop.eup %4751 }
0x1168   : > { %v2303_v40 = vsel %vm1596_vm6, %v4752_v55, 0.0 }
0x1169   : > { %2304 = vadd.xlane.f32.xlu1 %v2303_v40 }
0x116b   : > { %v4754_v56 = vpop.eup %4753 }
0x116c   : > { %v2306_v57 = vsel %vm1600_vm7, %v4754_v56, 0.0 }
0x116d   : > { %2307 = vadd.xlane.f32.xlu1 %v2306_v57 }
0x117e   : > { %2314 = vrot.lane.b32.xlu1 %v5305_v37, %s5635_s9  ;;  %s5638_s9 = sld [smem:[#allocation18_spill]] }
0x11f6   : > { %v2305_v9 = vpop.xlane.xlu1 %2304 }
0x11f7   : > { %4755 = vrcp.f32 %v2305_v9 }
0x11fa   : > { %v2308_v43 = vpop.xlane.xlu1 %2307 }
0x11fb   : > { %4757 = vrcp.f32 %v2308_v43 }
0x11fe   : > { %v2315_v10 = vpop.permute.xlu1 %2314 }
0x11ff   : > { %v2320_v58 = vand.u32 %v2315_v10, %v5219_v2 }
0x1201   : > { %4388 = vmatpush3.bf16.msra.mxu1 %v2320_v58  ;;  %v4756_v59 = vpop.eup %4755 }
0x1202   : > { %4393 = vmatprep.subr.bf16.mxu1 %v4876_v15  ;;  %v2311_v61 = vmul.f32 %v4756_v59, %v4752_v55 }
0x1205   : > { %v4758_v60 = vpop.eup %4757 }
0x1206   : > { %v2312_v62 = vmul.f32 %v4758_v60, %v4754_v56 }
0x1208   : > { %v2313_v0 = vpack.c.bf16 %v2312_v62, %v2311_v61 }
0x120a   : > { %4390 = vmatmul.mubr.msk.bf16.vlgmr.msra.gmra.mrb[44].mxu1 %vm1596_vm6, %v2313_v0 }
0x120b   : > { %4394 = vmatpush3.bf16.xpose.msra.mxu1 %v2372_v1  ;;  %4395 = vmatprep.mubr.msk.bf16.mxu1 %vm4877_vm2, %v4876_v15 }
0x120c   : > { %4405 = vmatprep.subr.bf16.mxu1 %v4876_v15 }
0x1212   : > { %4396 = vmatmul.mubr.msk.bf16.vlgmr.msra.gmra.mrb[48].mxu1 %vm1548_vm5, %v2365_v3 }
0x1213   : > { %4409 = vmatprep.mubr.msk.bf16.mxu1 %vm4877_vm2, %v4876_v15 }
0x12dd   : > { %v2356_v4 = vpop.f32.mrb[44].mxu1 }
0x12de   : > { %v4391_v5 = vpop.f32.mrb[45].mxu1 }
0x12df   : > { %v2359_v6 = vpop.f32.mrb[46].mxu1  ;;  %v4576_v5 = vld [vmem:[%s4970_s20 + $0x18] sm:$0xff]  }
0x12e0   : > { %v4392_v7 = vpop.f32.mrb[47].mxu1 }
0x12e5   : > { %v2408_v8 = vpop.f32.mrb[48].mxu1 }
0x12e6   : > { %v4397_v11 = vpop.f32.mrb[49].mxu1  ;;  %v2415_v12 = vsel %vm1596_vm6, %v2408_v8, -inf }
0x12e7   : > { %2416 = vmax.xlane.f32.xlu0 %v2415_v12  ;;  %v2411_v13 = vpop.f32.mrb[50].mxu1 }
0x12e8   : > { %v4398_v14 = vpop.f32.mrb[51].mxu1  ;;  %v2418_v16 = vsel %vm1600_vm7, %v2411_v13, -inf }
0x12e9   : > { %2419 = vmax.xlane.f32.xlu1 %v2418_v16  ;;  %v4034_v16 = vld [vmem:[%s5625_s16 + $0x1] ss:$0 sm:$0xff] }
0x1374   : > { %v2417_v17 = vpop.xlane.xlu0 %2416 }
0x1375   : > { %v2421_v18 = vsub.f32 %v2408_v8, %v2417_v17 }
0x1376   : > { %v2420_v19 = vpop.xlane.xlu1 %2419 }
0x1377   : > { %v2423_v20 = vmul.f32 1.442695, %v2421_v18  ;;  %v2422_v21 = vsub.f32 %v2411_v13, %v2420_v19 }
0x1379   : > { %4759 = vpow2.f32 %v2423_v20  ;;  %v2425_v22 = vmul.f32 1.442695, %v2422_v21  ;;  %v4035_v21 = vld [vmem:[%s5626_s22 + $0x1] ss:$0 sm:$0xff] }
0x137b   : > { %4761 = vpow2.f32 %v2425_v22 }
0x1383   : > { %v4760_v23 = vpop.eup %4759 }
0x1384   : > { %v2427_v24 = vsel %vm1596_vm6, %v4760_v23, 0.0 }
0x1385   : > { %v4762_v27 = vpop.eup %4761  ;;  %2428 = vadd.xlane.f32.xlu0 %v2427_v24 }
0x1386   : > { %v2430_v28 = vsel %vm1600_vm7, %v4762_v27, 0.0 }
0x1389   : > { %2431 = vadd.xlane.f32.xlu0 %v2430_v28  ;;  %v4577_v28 = vld [vmem:[%s5627_s23 + $0x40] sm:$0xff]  }
0x139f   : > { %2438 = vrot.lane.b32.xlu0 %v5305_v37, %s5636_s13  ;;  %v4573_v37 = vld [vmem:[%s4950_s24 + $0x10] sm:$0xff]   ;;  %s5639_s13 = sld [smem:[#allocation20_spill]] }
0x13a0   : > { %4406 = vmatpush3.bf16.msra.mxu1 %v4573_v37 }
0x13a1   : > { %4407 = vmatprep.subr.bf16.mxu1 %v4876_v15 }
0x13a4   : > { %4408 = vmatpush3.bf16.msra.mxu1 %v4574_v39 }
0x13a5   : > { %4421 = vmatprep.subr.bf16.mxu1 %v4876_v15 }
0x1412   : > { %v2429_v29 = vpop.xlane.xlu0 %2428 }
0x1413   : > { %4763 = vrcp.f32 %v2429_v29  ;;  %v4578_v29 = vld [vmem:[%s5627_s23 + $0x48] sm:$0xff]  }
0x1416   : > { %v2432_v30 = vpop.xlane.xlu0 %2431 }
0x1417   : > { %4765 = vrcp.f32 %v2432_v30  ;;  %v4579_v30 = vld [vmem:[%s5627_s23 + $0x50] sm:$0xff]  }
0x141a   : > { %v2439_v31 = vpop.permute.xlu0 %2438 }
0x141b   : > { %v2444_v32 = vand.u32 %v2439_v31, %v5219_v2  ;;  %v4580_v31 = vld [vmem:[%s5627_s23 + $0x58] sm:$0xff]  }
0x141d   : > { %4400 = vmatpush3.bf16.msra.mxu0 %v2444_v32  ;;  %v4764_v33 = vpop.eup %4763  ;;  %v4581_v32 = vld [vmem:[%s5627_s23 + $0x60] sm:$0xff]  }
0x141e   : > { %4413 = vmatprep.subr.bf16.mxu0 %v4876_v15  ;;  %v2435_v35 = vmul.f32 %v4764_v33, %v4760_v23  ;;  %v4582_v33 = vld [vmem:[%s5627_s23 + $0x68] sm:$0xff]  }
0x1421   : > { %v4766_v34 = vpop.eup %4765 }
0x1422   : > { %v2436_v36 = vmul.f32 %v4766_v34, %v4762_v27  ;;  %v4583_v34 = vld [vmem:[%s5627_s23 + $0x70] sm:$0xff]  }
0x1424   : > { %v2437_v38 = vpack.c.bf16 %v2436_v36, %v2435_v35  ;;  %v4584_v35 = vld [vmem:[%s5627_s23 + $0x78] sm:$0xff]   ;;  %v4041_v36 = vld [vmem:[%s5628_s2 + $0x1] ss:$0 sm:$0xff]  ;;  %s5641_s2 = sld [smem:[#allocation24_spill]] }
0x1426   : > { %4402 = vmatmul.mubr.msk.bf16.vlgmr.msra.gmra.mrb[16].mxu0 %vm1596_vm6, %v2437_v38 }
0x1427   : > { %4417 = vmatprep.mubr.msk.bf16.mxu0 %vm4877_vm2, %v4876_v15 }
0x14f9   : > { %v2480_v2 = vpop.f32.mrb[16].mxu0 }
0x14fa   : > { %v4403_v41 = vpop.f32.mrb[17].mxu0 }
0x14fb   : > { %v2483_v42 = vpop.f32.mrb[18].mxu0 }
0x14fc   : > { %v4542_v44 = vpack.i.bf16 %v2483_v42, %v2480_v2  ;;  %v4404_v45 = vpop.f32.mrb[19].mxu0 }
0x14fe   : > { %4543 = vrot.lane.b32.xlu1 %v4542_v44, %s5637_s14  ;;  %s5640_s14 = sld [smem:[#allocation19_spill]] }
0x1570   : > { %v4544_v46 = vpop.permute.xlu1 %4543 }
0x1571   : > { %v4546_v47 = vunpack.i.h.bf16 %v4544_v46  ;;  %v4545_v48 = vunpack.i.l.bf16 %v4544_v46 }
0x1573   : > { %v2496_v49 = vsel %vm1548_vm5, %v2359_v6, %v4546_v47  ;;  %v2495_v50 = vsel %vm1548_vm5, %v2356_v4, %v4545_v48 }
0x1574   : > { %v2502_v51 = vpack.c.bf16 %v2496_v49, %v2495_v50 }
0x1576   : > { %4410 = vmatmul.mubr.msk.bf16.vlgmr.msra.gmra.mrb[52].mxu1 %vm1017_vm0, %v2502_v51 }
0x1577   : > { %4437 = vmatprep.mubr.msk.bf16.mxu1 %vm4877_vm2, %v4876_v15  ;;  %4422 = vmatpush3.bf16.msra.mxu1 %v4577_v28 }
0x1578   : > { %4423 = vmatprep.subr.bf16.mxu1 %v4876_v15 }
0x157b   : > { %4424 = vmatpush3.bf16.msra.mxu1 %v4578_v29  ;;  %v4073_v29 = vld [vmem:[%s5630_s5 + $0x1] ss:$0 sm:$0xff]  ;;  %s5644_s5 = sld [smem:[#allocation23_spill]] }
0x157c   : > { %4425 = vmatprep.subr.bf16.mxu1 %v4876_v15 }
0x157f   : > { %4426 = vmatpush3.bf16.msra.mxu1 %v4579_v30 }
0x1580   : > { %4427 = vmatprep.subr.bf16.mxu1 %v4876_v15 }
0x1583   : > { %4428 = vmatpush3.bf16.msra.mxu1 %v4580_v31 }
0x1584   : > { %4429 = vmatprep.subr.bf16.mxu1 %v4876_v15 }
0x1587   : > { %4430 = vmatpush3.bf16.msra.mxu1 %v4581_v32 }
0x1588   : > { %4431 = vmatprep.subr.bf16.mxu1 %v4876_v15 }
0x158b   : > { %4432 = vmatpush3.bf16.msra.mxu1 %v4582_v33  ;;  %v4074_v33 = vld [vmem:[%s5631_s8 + $0x1] ss:$0 sm:$0xff] }
0x158c   : > { %4433 = vmatprep.subr.bf16.mxu1 %v4876_v15 }
0x158f   : > { %4434 = vmatpush3.bf16.msra.mxu1 %v4583_v34 }
0x1590   : > { %4435 = vmatprep.subr.bf16.mxu1 %v4876_v15 }
0x1593   : > { %4436 = vmatpush3.bf16.msra.mxu1 %v4584_v35 }
0x1649   : > { %v2560_v53 = vpop.f32.mrb[52].mxu1 }
0x164a   : > { %v2561_v54 = vadd.f32 %v4028_v52, %v2560_v53  ;;  %v4411_v55 = vpop.f32.mrb[53].mxu1 }
0x164b   : > { %v2563_v40 = vpop.f32.mrb[54].mxu1 }
0x164c   : > { %v2564_v56 = vadd.f32 %v4028_v52, %v2563_v40  ;;  %v4412_v57 = vpop.f32.mrb[55].mxu1  ;;  %v2567_v9 = vadd.f32 %v2561_v54, %v5295_v25 }
0x164e   : > { %v2573_v43 = vsel %vm1017_vm0, %v2567_v9, 0.0  ;;  %v2568_v10 = vadd.f32 %v2564_v56, %v5297_v26  ;;  %v4575_v26 = vld [vmem:[%s4970_s20 + $0x10] sm:$0xff]  }
0x164f   : > { %2574 = vadd.xlane.f32.xlu1 %v2573_v43  ;;  %4414 = vmatpush3.bf16.msra.mxu0 %v4575_v26 }
0x1650   : > { %v2576_v58 = vsel %vm1021_vm1, %v2568_v10, 0.0  ;;  %4415 = vmatprep.subr.bf16.mxu0 %v4876_v15 }
0x1651   : > { %2577 = vadd.xlane.f32.xlu0 %v2576_v58 }
0x1653   : > { %4416 = vmatpush3.bf16.msra.mxu0 %v4576_v5 }
0x1654   : > { %4441 = vmatprep.subr.bf16.mxu0 %v4876_v15 }
0x16dc   : > { %v2575_v59 = vpop.xlane.xlu1 %2574 }
0x16dd   : > { %v2579_v60 = vmul.f32 0.03125, %v2575_v59  ;;  %v4062_v59 = vld [vmem:[%s5629_s3 + $0x1] ss:$0 sm:$0xff]  ;;  %s5643_s3 = sld [smem:[#allocation22_spill]] }
0x16de   : > { %v2578_v61 = vpop.xlane.xlu0 %2577 }
0x16df   : > { %v2581_v62 = vsub.f32 %v2567_v9, %v2579_v60  ;;  %v2580_v63 = vmul.f32 0.03125, %v2578_v61 }
0x16e1   : > { %v2582_v0 = vsub.f32 %v2568_v10, %v2580_v63  ;;  %v2583_v1 = vmul.f32 %v2581_v62, %v2581_v62 }
0x16e3   : > { %v2585_v3 = vsel %vm1017_vm0, %v2583_v1, 0.0  ;;  %v2584_v25 = vmul.f32 %v2582_v0, %v2582_v0 }
0x16e4   : > { %2586 = vadd.xlane.f32.xlu0 %v2585_v3 }
0x16e5   : > { %v2588_v4 = vsel %vm1021_vm1, %v2584_v25, 0.0 }
0x16e6   : > { %2589 = vadd.xlane.f32.xlu1 %v2588_v4 }
0x1771   : > { %v2587_v6 = vpop.xlane.xlu0 %2586 }
0x1772   : > { %v2591_v7 = vmul.f32 0.03125, %v2587_v6 }
0x1773   : > { %v2590_v8 = vpop.xlane.xlu1 %2589 }
0x1774   : > { %v2593_v11 = vadd.f32 1e-05, %v2591_v7  ;;  %v2592_v12 = vmul.f32 0.03125, %v2590_v8 }
0x1776   : > { %4767 = vrsqrt.f32 %v2593_v11  ;;  %v2594_v13 = vadd.f32 1e-05, %v2592_v12 }
0x1778   : > { %4769 = vrsqrt.f32 %v2594_v13 }
0x1780   : > { %v4768_v14 = vpop.eup %4767 }
0x1781   : > { %v2597_v17 = vmul.f32 %v4768_v14, %v2581_v62 }
0x1782   : > { %v4770_v18 = vpop.eup %4769 }
0x1783   : > { %v2605_v19 = vmul.f32 %v4034_v16, %v2597_v17  ;;  %v2598_v20 = vmul.f32 %v4770_v18, %v2582_v0  ;;  %v4585_v18 = vld [vmem:[%s5638_s9] sm:$0xff]  }
0x1785   : > { %v2606_v22 = vmul.f32 %v4034_v16, %v2598_v20  ;;  %v5367_v23 = vadd.f32 %v4035_v21, %v2605_v19  ;;  %v4586_v19 = vld [vmem:[%s5638_s9 + $0x8] sm:$0xff]  }
0x1787   : > { %v5369_v24 = vadd.f32 %v4035_v21, %v2606_v22 }
0x1789   : > { %v2620_v27 = vpack.c.bf16 %v5369_v24, %v5367_v23 }
0x178b   : > { %4418 = vmatmul.mubr.msk.bf16.vlgmr.msra.gmra.mrb[20].mxu0 %vm1017_vm0, %v2620_v27 }
0x178c   : > { %4445 = vmatprep.mubr.msk.bf16.mxu0 %vm4877_vm2, %v4876_v15  ;;  %4442 = vmatpush3.bf16.msra.mxu0 %v4585_v18  ;;  %v4628_v18 = vld [vmem:[%s5641_s2 + $0x94] ss:$8 sps:$4 sm:$0xff]  }
0x178d   : > { %4443 = vmatprep.subr.bf16.mxu0 %v4876_v15 }
0x1790   : > { %4444 = vmatpush3.bf16.msra.mxu0 %v4586_v19  ;;  %v4626_v19 = vld [vmem:[%s5641_s2 + $0x90] ss:$8 sps:$4 sm:$0xff]  }
0x185e   : > { %v2678_v38 = vpop.f32.mrb[20].mxu0 }
0x185f   : > { %v2679_v37 = vadd.f32 %v4041_v36, %v2678_v38  ;;  %v4419_v39 = vpop.f32.mrb[21].mxu0 }
0x1860   : > { %v2681_v2 = vpop.f32.mrb[22].mxu0  ;;  %v4587_v39 = vld [vmem:[%s5639_s13] ss:$16 sps:$4 sm:$0xff]  }
0x1861   : > { %v2685_v41 = vmul.f32 %v2679_v37, %v2679_v37  ;;  %v2682_v42 = vadd.f32 %v4041_v36, %v2681_v2  ;;  %v4420_v44 = vpop.f32.mrb[23].mxu0  ;;  %v4592_v2 = vld [vmem:[%s5639_s13 + $0x24] ss:$16 sps:$4 sm:$0xff]  }
0x1862   : > { %v4595_v44 = vld [vmem:[%s5639_s13 + $0xc] ss:$16 sps:$4 sm:$0xff]  }
0x1863   : > { %v2687_v45 = vmul.f32 %v2685_v41, %v2679_v37  ;;  %v2686_v46 = vmul.f32 %v2682_v42, %v2682_v42  ;;  %v4590_v41 = vld [vmem:[%s5639_s13 + $0x20] ss:$16 sps:$4 sm:$0xff]  }
0x1865   : > { %v2689_v47 = vmul.f32 0.044715, %v2687_v45  ;;  %v2688_v48 = vmul.f32 %v2686_v46, %v2682_v42  ;;  %v4075_v45 = vld [vmem:[%s5640_s14] ss:$0 sm:$0xff]  ;;  %s5642_s14 = sld [smem:[#allocation21_spill]] }
0x1867   : > { %v2691_v49 = vadd.f32 %v2689_v47, %v2679_v37  ;;  %v2690_v50 = vmul.f32 0.044715, %v2688_v48 }
0x1869   : > { %v2693_v51 = vmul.f32 0.7978846, %v2691_v49  ;;  %v2692_v52 = vadd.f32 %v2690_v50, %v2682_v42 }
0x186b   : > { %4771 = vtanh.f32 %v2693_v51  ;;  %v2694_v53 = vmul.f32 0.7978846, %v2692_v52 }
0x186d   : > { %4773 = vtanh.f32 %v2694_v53 }
0x1875   : > { %v4772_v54 = vpop.eup %4771 }
0x1876   : > { %v2697_v55 = vadd.f32 1.0, %v4772_v54 }
0x1877   : > { %v4774_v40 = vpop.eup %4773 }
0x1878   : > { %v2699_v56 = vmul.f32 0.5, %v2697_v55  ;;  %v2698_v57 = vadd.f32 1.0, %v4774_v40 }
0x187a   : > { %v2700_v9 = vmul.f32 0.5, %v2698_v57  ;;  %v2701_v43 = vmul.f32 %v2699_v56, %v2679_v37  ;;  %v4589_v37 = vld [vmem:[%s5639_s13 + $0x4] ss:$16 sps:$4 sm:$0xff]  }
0x187b   : > { %3018 = vmatprep.subr.bf16.mxu0 %v4589_v37  ;;  %v4699_v37 = vld [vmem:[%s5616_s6 + $0x50] sm:$0xff]  }
0x187c   : > { %v2702_v10 = vmul.f32 %v2700_v9, %v2682_v42  ;;  %v4885_v42 = vmov 0  }
0x187e   : > { %v2720_v58 = vpack.c.bf16 %v2702_v10, %v2701_v43 }
0x1880   : > { %4438 = vmatmul.mubr.bf16.vlgmr.msra.gmra.mrb[56].mxu1 %v2720_v58  ;;  %v4593_v58 = vld [vmem:[%s5639_s13 + $0x8] ss:$16 sps:$4 sm:$0xff]  }
0x1953   : > { %v2811_v60 = vpop.f32.mrb[56].mxu1 }
0x1954   : > { %v2812_v61 = vadd.f32 %v4062_v59, %v2811_v60  ;;  %v4439_v62 = vpop.f32.mrb[57].mxu1  ;;  %v4598_v60 = vld [vmem:[%s5639_s13 + $0x2c] ss:$16 sps:$4 sm:$0xff]  }
0x1955   : > { %v2814_v63 = vpop.f32.mrb[58].mxu1  ;;  %v4601_v62 = vld [vmem:[%s5641_s2 + $0x4] ss:$8 sps:$4 sm:$0xff]  }
0x1956   : > { %v2815_v0 = vadd.f32 %v4062_v59, %v2814_v63  ;;  %v4440_v1 = vpop.f32.mrb[59].mxu1  ;;  %v2818_v3 = vadd.f32 %v2812_v61, %v5367_v23  ;;  %v4596_v61 = vld [vmem:[%s5639_s13 + $0x28] ss:$16 sps:$4 sm:$0xff]  }
0x1957   : > { %v4599_v63 = vld [vmem:[%s5641_s2] ss:$8 sps:$4 sm:$0xff]   ;;  %v4602_v1 = vld [vmem:[%s5641_s2 + $0x10] ss:$8 sps:$4 sm:$0xff]  }
0x1958   : > { %v2824_v25 = vsel %vm1017_vm0, %v2818_v3, 0.0  ;;  %v2819_v4 = vadd.f32 %v2815_v0, %v5369_v24  ;;  %v4604_v0 = vld [vmem:[%s5641_s2 + $0x14] ss:$8 sps:$4 sm:$0xff]  }
0x1959   : > { %2825 = vadd.xlane.f32.xlu0 %v2824_v25  ;;  %v4605_v25 = vld [vmem:[%s5641_s2 + $0x20] ss:$8 sps:$4 sm:$0xff]  }
0x195a   : > { %v2827_v26 = vsel %vm1021_vm1, %v2819_v4, 0.0 }
0x195b   : > { %2828 = vadd.xlane.f32.xlu1 %v2827_v26  ;;  %v4608_v26 = vld [vmem:[%s5641_s2 + $0x30] ss:$8 sps:$4 sm:$0xff]  }
0x19e6   : > { %v2826_v5 = vpop.xlane.xlu0 %2825 }
0x19e7   : > { %v2830_v6 = vmul.f32 0.03125, %v2826_v5  ;;  %v4613_v5 = vld [vmem:[%s5641_s2 + $0x44] ss:$8 sps:$4 sm:$0xff]  }
0x19e8   : > { %v2829_v7 = vpop.xlane.xlu1 %2828 }
0x19e9   : > { %v2832_v8 = vsub.f32 %v2818_v3, %v2830_v6  ;;  %v2831_v11 = vmul.f32 0.03125, %v2829_v7  ;;  %v4607_v3 = vld [vmem:[%s5641_s2 + $0x24] ss:$8 sps:$4 sm:$0xff]   ;;  %v4611_v6 = vld [vmem:[%s5641_s2 + $0x40] ss:$8 sps:$4 sm:$0xff]  }
0x19ea   : > { %v4616_v7 = vld [vmem:[%s5641_s2 + $0x54] ss:$8 sps:$4 sm:$0xff]  }
0x19eb   : > { %v2833_v12 = vsub.f32 %v2819_v4, %v2831_v11  ;;  %v2834_v13 = vmul.f32 %v2832_v8, %v2832_v8  ;;  %v4610_v4 = vld [vmem:[%s5641_s2 + $0x34] ss:$8 sps:$4 sm:$0xff]   ;;  %v4619_v11 = vld [vmem:[%s5641_s2 + $0x64] ss:$8 sps:$4 sm:$0xff]  }
0x19ed   : > { %v2836_v14 = vsel %vm1017_vm0, %v2834_v13, 0.0  ;;  %v2835_v16 = vmul.f32 %v2833_v12, %v2833_v12  ;;  %v4622_v13 = vld [vmem:[%s5641_s2 + $0x74] ss:$8 sps:$4 sm:$0xff]  }
0x19ee   : > { %2837 = vadd.xlane.f32.xlu0 %v2836_v14  ;;  %v4620_v14 = vld [vmem:[%s5641_s2 + $0x70] ss:$8 sps:$4 sm:$0xff]  }
0x19ef   : > { %v2839_v17 = vsel %vm1021_vm1, %v2835_v16, 0.0  ;;  %v4625_v16 = vld [vmem:[%s5641_s2 + $0x84] ss:$8 sps:$4 sm:$0xff]  }
0x19f0   : > { %2840 = vadd.xlane.f32.xlu1 %v2839_v17  ;;  %v4623_v17 = vld [vmem:[%s5641_s2 + $0x80] ss:$8 sps:$4 sm:$0xff]  }
0x1a7b   : > { %v2838_v20 = vpop.xlane.xlu0 %2837 }
0x1a7c   : > { %v2842_v21 = vmul.f32 0.03125, %v2838_v20  ;;  %v4631_v20 = vld [vmem:[%s5641_s2 + $0xa4] ss:$8 sps:$4 sm:$0xff]  }
0x1a7d   : > { %v2841_v22 = vpop.xlane.xlu1 %2840 }
0x1a7e   : > { %v2844_v23 = vadd.f32 1e-05, %v2842_v21  ;;  %v2843_v24 = vmul.f32 0.03125, %v2841_v22  ;;  %v4629_v21 = vld [vmem:[%s5641_s2 + $0xa0] ss:$8 sps:$4 sm:$0xff]  }
0x1a7f   : > { %v4634_v22 = vld [vmem:[%s5641_s2 + $0xb4] ss:$8 sps:$4 sm:$0xff]  }
0x1a80   : > { %4775 = vrsqrt.f32 %v2844_v23  ;;  %v2845_v27 = vadd.f32 1e-05, %v2843_v24  ;;  %v4632_v23 = vld [vmem:[%s5641_s2 + $0xb0] ss:$8 sps:$4 sm:$0xff]   ;;  %v4637_v24 = vld [vmem:[%s5641_s2 + $0xc4] ss:$8 sps:$4 sm:$0xff]  }
0x1a82   : > { %4777 = vrsqrt.f32 %v2845_v27  ;;  %v4635_v27 = vld [vmem:[%s5641_s2 + $0xc0] ss:$8 sps:$4 sm:$0xff]  }
0x1a8a   : > { %v4776_v28 = vpop.eup %4775 }
0x1a8b   : > { %v2848_v30 = vmul.f32 %v4776_v28, %v2832_v8  ;;  %v4614_v8 = vld [vmem:[%s5641_s2 + $0x50] ss:$8 sps:$4 sm:$0xff]   ;;  %v4640_v28 = vld [vmem:[%s5641_s2 + $0xd4] ss:$8 sps:$4 sm:$0xff]  }
0x1a8c   : > { %v4778_v31 = vpop.eup %4777 }
0x1a8d   : > { %v2856_v32 = vmul.f32 %v4073_v29, %v2848_v30  ;;  %v2849_v15 = vmul.f32 %v4778_v31, %v2833_v12  ;;  %v4617_v12 = vld [vmem:[%s5641_s2 + $0x60] ss:$8 sps:$4 sm:$0xff]   ;;  %v4643_v30 = vld [vmem:[%s5641_s2 + $0xe4] ss:$8 sps:$4 sm:$0xff]  }
0x1a8e   : > { %v4641_v31 = vld [vmem:[%s5641_s2 + $0xe0] ss:$8 sps:$4 sm:$0xff]  }
0x1a8f   : > { %v2857_v34 = vmul.f32 %v4073_v29, %v2849_v15  ;;  %v2864_v35 = vadd.f32 %v4074_v33, %v2856_v32  ;;  %v4638_v29 = vld [vmem:[%s5641_s2 + $0xd0] ss:$8 sps:$4 sm:$0xff]   ;;  %v4646_v32 = vld [vmem:[%s5641_s2 + $0xf4] ss:$8 sps:$4 sm:$0xff]  }
0x1a90   : > { %v4644_v15 = vld [vmem:[%s5641_s2 + $0xf0] ss:$8 sps:$4 sm:$0xff]  }
0x1a91   : > { %v2865_v36 = vadd.f32 %v4074_v33, %v2857_v34  ;;  %v4649_v33 = vld [vmem:[%s5641_s2 + $0x104] ss:$8 sps:$4 sm:$0xff]  }
0x1a92   : > { %v4695_v34 = vld [vmem:[%s5616_s6 + $0x40] sm:$0xff]  }
0x1a93   : > { %v2870_v38 = vpack.c.bf16 %v2865_v36, %v2864_v35  ;;  %v4696_v35 = vld [vmem:[%s5616_s6] sm:$0xff]   ;;  %v4697_v36 = vld [vmem:[%s5616_s6 + $0x48] sm:$0xff]   ;;  %4243 = vmatprep.subr.bf16.mxu1 %v4695_v34  ;;  %v4656_v34 = vld [vmem:[%s5641_s2 + $0x130] ss:$8 sps:$4 sm:$0xff]  }
0x1a94   : > { %4244 = vmatpush3.bf16.msra.mxu1 %v4696_v35  ;;  %v4661_v35 = vld [vmem:[%s5641_s2 + $0x144] ss:$8 sps:$4 sm:$0xff]  }
0x1a95   : > { %4446 = vmatmul.mubr.msk.bf16.vlgmr.msra.gmra.mrb[24].mxu0 %vm1017_vm0, %v2870_v38  ;;  %v4698_v38 = vld [vmem:[%s5616_s6 + $0x8] sm:$0xff]   ;;  %4245 = vmatprep.subr.bf16.mxu1 %v4697_v36 }
0x1a96   : > { %3019 = vmatpush1.bf16.msra.mxu0 %v4587_v39  ;;  %3050 = vmatprep.mubr.bf16.mxu0 %v4885_v42  ;;  %v4700_v39 = vld [vmem:[%s5616_s6 + $0x10] sm:$0xff]   ;;  %v4659_v36 = vld [vmem:[%s5641_s2 + $0x140] ss:$8 sps:$4 sm:$0xff]  }
0x1a97   : > { %3020 = vmatprep.subr.bf16.mxu0 %v4592_v2  ;;  %v4701_v2 = vld [vmem:[%s5616_s6 + $0x58] sm:$0xff]  }
0x1a98   : > { %4246 = vmatpush3.bf16.msra.mxu1 %v4698_v38  ;;  %v4664_v38 = vld [vmem:[%s5641_s2 + $0x154] ss:$8 sps:$4 sm:$0xff]  }
0x1a99   : > { %4247 = vmatprep.subr.bf16.mxu1 %v4699_v37  ;;  %v4662_v37 = vld [vmem:[%s5641_s2 + $0x150] ss:$8 sps:$4 sm:$0xff]  }
0x1a9a   : > { %3021 = vmatpush1.bf16.msra.mxu0 %v4590_v41  ;;  %v4702_v41 = vld [vmem:[%s5616_s6 + $0x18] sm:$0xff]  }
0x1a9b   : > { %3059 = vmatprep.subr.bf16.mxu0 %v4595_v44  ;;  %v4704_v44 = vld [vmem:[%s5616_s6 + $0x20] sm:$0xff]  }
0x1a9c   : > { %4248 = vmatpush3.bf16.msra.mxu1 %v4700_v39  ;;  %v4667_v39 = vld [vmem:[%s5641_s2 + $0x164] ss:$8 sps:$4 sm:$0xff]  }
0x1a9d   : > { %4249 = vmatprep.subr.bf16.mxu1 %v4701_v2  ;;  %v4665_v2 = vld [vmem:[%s5641_s2 + $0x160] ss:$8 sps:$4 sm:$0xff]  }
0x1aa0   : > { %4250 = vmatpush3.bf16.msra.mxu1 %v4702_v41  ;;  %v4670_v41 = vld [vmem:[%s5641_s2 + $0x174] ss:$8 sps:$4 sm:$0xff]  }
0x1b68   : > { %v2927_v46 = vpop.f32.mrb[24].mxu0 }
0x1b69   : > { %v2928_v47 = vadd.f32 %v4075_v45, %v2927_v46  ;;  %v4447_v48 = vpop.f32.mrb[25].mxu0 }
0x1b6a   : > { %v2930_v49 = vpop.f32.mrb[26].mxu0  ;;  %v2953_v48 = vld [vmem:[%s5642_s14] sm:$0xf]  ;;  %s1005_s14 = sand.u32 1, %s4833_s10  }
0x1b6b   : > { %v2931_v50 = vadd.f32 %v4075_v45, %v2930_v49  ;;  %v4448_v51 = vpop.f32.mrb[27].mxu0  ;;  %v2934_v52 = vsel %vm1017_vm0, %v2928_v47, 0.0  ;;  %v2995_v45 = vlaneseq  ;;  %s3842_s8 = scalar_lea.sflag [#allocation3], %s1005_s14 }
0x1b6c   : > { %v3104_v51 = vld [vmem:[%s5643_s3] sm:$0xf]  ;;  %s5646_s3 = sld [smem:[#allocation26_spill]] }
0x1b6d   : > { %v2935_v53 = vsel %vm1021_vm1, %v2931_v50, 0.0  ;;  %v2996_v46 = vshrl.u32 %v2995_v45, 7  ;;  %v4671_v45 = vld [vmem:[%s5641_s2 + $0x180] ss:$8 sps:$4 sm:$0xff]  }
0x1b6e   : > { %v2936_v54 = vadd.f32 %v2935_v53, %v2934_v52 }
0x1b6f   : > { %v5461_v47 = vsub.s32 0, %v2996_v46  ;;  %v5464_v49 = vsub.s32 1, %v2996_v46 }
0x1b70   : > { %v2937_v55 = vrot.slane %v2936_v54, 4 }
0x1b71   : > { %v2998_v50 = vrot.slane %v2953_v48, %v5461_v47  ;;  %v3002_v52 = vrot.slane %v2953_v48, %v5464_v49 }
0x1b72   : > { %v2938_v40 = vadd.f32 %v2937_v55, %v2936_v54  ;;  %v3130_v54 = vld [vmem:[%s5644_s5] sm:$0xf]  ;;  %s5645_s5 = sld [smem:[#allocation25_spill]] }
0x1b74   : > { %v2939_v56 = vrot.slane %v2938_v40, 2 }
0x1b76   : > { %v2940_v57 = vadd.f32 %v2939_v56, %v2938_v40  ;;  %v3109_v40 = vrot.slane %v3104_v51, %v5461_v47 }
0x1b78   : > { %v2941_v9 = vrot.slane %v2940_v57, 1 }
0x1b7a   : > { %v2942_v43 = vadd.f32 %v2941_v9, %v2940_v57  ;;  %v3005_v57 = vsub.s32 2, %v2996_v46 }
0x1b7c   : > { %v2943_v10 = vmul.f32 0.11111111, %v2942_v43  ;;  %v3113_v43 = vrot.slane %v3104_v51, %v5464_v49 }
0x1b7e   : > { %v2952_v59 = vpack.c.bf16 %v2943_v10, %v2943_v10 }
0x1b80   : > { %4087 = vmatmul.mubr.msk.bf16.vlgmr.msra.gmra.mrb[28].mxu0 %vm1017_vm0, %v2952_v59 }
0x1b81   : > { %3060 = vmatpush1.bf16.msra.mxu0 %v4593_v58  ;;  %3091 = vmatprep.mubr.bf16.mxu0 %v4885_v42  ;;  %v4703_v42 = vld [vmem:[%s5616_s6 + $0x60] sm:$0xff]   ;;  %v3009_v58 = vsub.s32 3, %v2996_v46  ;;  %v4676_v46 = vld [vmem:[%s5641_s2 + $0x194] ss:$8 sps:$4 sm:$0xff]  }
0x1b82   : > { %3061 = vmatprep.subr.bf16.mxu0 %v4598_v60  ;;  %4251 = vmatprep.subr.bf16.mxu1 %v4703_v42  ;;  %v3135_v60 = vrot.slane %v3130_v54, %v5461_v47  ;;  %v4668_v42 = vld [vmem:[%s5641_s2 + $0x170] ss:$8 sps:$4 sm:$0xff]  }
0x1b83   : > { %4252 = vmatpush3.bf16.msra.mxu1 %v4704_v44  ;;  %v4673_v44 = vld [vmem:[%s5641_s2 + $0x184] ss:$8 sps:$4 sm:$0xff]  }
0x1b85   : > { %3062 = vmatpush1.bf16.msra.mxu0 %v4596_v61 }
0x1b86   : > { %3556 = vmatprep.subr.bf16.mxu0 %v4601_v62 }
0x1b88   : > { %4088 = vmatmul.mubr.msk.bf16.vlgmr.msra.gmra.mrb[32].mxu0 %vm1017_vm0, %v2952_v59 }
0x1b89   : > { %3557 = vmatpush1.bf16.msra.mxu0 %v4599_v63  ;;  %v3139_v63 = vrot.slane %v3130_v54, %v5464_v49 }
0x1b8a   : > { %3558 = vmatprep.subr.bf16.mxu0 %v4604_v0 }
0x1b8d   : > { %3559 = vmatpush1.bf16.msra.mxu0 %v4602_v1  ;;  %v3006_v1 = vrot.slane %v2953_v48, %v3005_v57 }
0x1b8e   : > { %3560 = vmatprep.subr.bf16.mxu0 %v4607_v3 }
0x1b91   : > { %3561 = vmatpush1.bf16.msra.mxu0 %v4605_v25  ;;  %v3010_v25 = vrot.slane %v2953_v48, %v3009_v58  ;;  %v4674_v48 = vld [vmem:[%s5641_s2 + $0x190] ss:$8 sps:$4 sm:$0xff]  }
0x1b92   : > { %3562 = vmatprep.subr.bf16.mxu0 %v4610_v4 }
0x1b95   : > { %3563 = vmatpush1.bf16.msra.mxu0 %v4608_v26 }
0x1b96   : > { %3564 = vmatprep.subr.bf16.mxu0 %v4613_v5 }
0x1b99   : > { %3565 = vmatpush1.bf16.msra.mxu0 %v4611_v6 }
0x1b9a   : > { %3566 = vmatprep.subr.bf16.mxu0 %v4616_v7  ;;  %v3117_v7 = vrot.slane %v3104_v51, %v3005_v57 }
0x1b9d   : > { %3567 = vmatpush1.bf16.msra.mxu0 %v4614_v8 }
0x1b9e   : > { %3568 = vmatprep.subr.bf16.mxu0 %v4619_v11 }
0x1ba1   : > { %3569 = vmatpush1.bf16.msra.mxu0 %v4617_v12  ;;  %v3121_v12 = vrot.slane %v3104_v51, %v3009_v58  ;;  %v4677_v51 = vld [vmem:[%s5641_s2 + $0x1a0] ss:$8 sps:$4 sm:$0xff]  }
0x1ba2   : > { %3570 = vmatprep.subr.bf16.mxu0 %v4622_v13 }
0x1ba5   : > { %3571 = vmatpush1.bf16.msra.mxu0 %v4620_v14 }
0x1ba6   : > { %3572 = vmatprep.subr.bf16.mxu0 %v4625_v16  ;;  %v4647_v16 = vld [vmem:[%s5641_s2 + $0x100] ss:$8 sps:$4 sm:$0xff]  }
0x1ba9   : > { %3573 = vmatpush1.bf16.msra.mxu0 %v4623_v17 }
0x1baa   : > { %3574 = vmatprep.subr.bf16.mxu0 %v4628_v18 }
0x1bad   : > { %3575 = vmatpush1.bf16.msra.mxu0 %v4626_v19  ;;  %v3143_v19 = vrot.slane %v3130_v54, %v3005_v57  ;;  %v4691_v57 = vld [vmem:[%s5641_s2 + $0x1e4] ss:$8 sps:$4 sm:$0xff]  }
0x1bae   : > { %3576 = vmatprep.subr.bf16.mxu0 %v4631_v20 }
0x1bb1   : > { %3577 = vmatpush1.bf16.msra.mxu0 %v4629_v21  ;;  %v4652_v21 = vld [vmem:[%s5641_s2 + $0x114] ss:$8 sps:$4 sm:$0xff]  }
0x1bb2   : > { %3578 = vmatprep.subr.bf16.mxu0 %v4634_v22 }
0x1bb5   : > { %3579 = vmatpush1.bf16.msra.mxu0 %v4632_v23  ;;  %v3147_v23 = vrot.slane %v3130_v54, %v3009_v58  ;;  %v4685_v54 = vld [vmem:[%s5641_s2 + $0x1c4] ss:$8 sps:$4 sm:$0xff]  }
0x1bb6   : > { %3580 = vmatprep.subr.bf16.mxu0 %v4637_v24 }
0x1bb9   : > { %3581 = vmatpush1.bf16.msra.mxu0 %v4635_v27 }
0x1bba   : > { %3582 = vmatprep.subr.bf16.mxu0 %v4640_v28  ;;  %v4650_v28 = vld [vmem:[%s5641_s2 + $0x110] ss:$8 sps:$4 sm:$0xff]  }
0x1bbd   : > { %3583 = vmatpush1.bf16.msra.mxu0 %v4638_v29 }
0x1bbe   : > { %3584 = vmatprep.subr.bf16.mxu0 %v4643_v30  ;;  %v4655_v30 = vld [vmem:[%s5641_s2 + $0x124] ss:$8 sps:$4 sm:$0xff]  }
0x1bc1   : > { %3585 = vmatpush1.bf16.msra.mxu0 %v4641_v31 }
0x1bc2   : > { %3586 = vmatprep.subr.bf16.mxu0 %v4646_v32  ;;  %v4653_v32 = vld [vmem:[%s5641_s2 + $0x120] ss:$8 sps:$4 sm:$0xff]  }
0x1bc5   : > { %3587 = vmatpush1.bf16.msra.mxu0 %v4644_v15 }
0x1bc6   : > { %3597 = vmatprep.subr.bf16.mxu0 %v4649_v33  ;;  %v4658_v33 = vld [vmem:[%s5641_s2 + $0x134] ss:$8 sps:$4 sm:$0xff]  }
0x1c53   : > { %v3052_v53 = vpop.f32.mrb[28].mxu0 }
0x1c54   : > { %v3053_v55 = vadd.f32 %v3052_v53, %v2998_v50  ;;  %v3054_v56 = vpop.f32.mrb[29].mxu0  ;;  %v4679_v50 = vld [vmem:[%s5641_s2 + $0x1a4] ss:$8 sps:$4 sm:$0xff]   ;;  %v4680_v53 = vld [vmem:[%s5641_s2 + $0x1b0] ss:$8 sps:$4 sm:$0xff]  }
0x1c55   : > { %v3055_v9 = vadd.f32 %v3054_v56, %v3002_v52  ;;  %v3056_v10 = vpop.f32.mrb[30].mxu0  ;;  %v4682_v52 = vld [vmem:[%s5641_s2 + $0x1b4] ss:$8 sps:$4 sm:$0xff]   ;;  %v4686_v56 = vld [vmem:[%s5641_s2 + $0x1d0] ss:$8 sps:$4 sm:$0xff]  }
0x1c56   : > { %v3100_v59 = vmax.f32 %v3053_v55, 0.0  ;;  %v3057_v61 = vpop.f32.mrb[31].mxu0  ;;  %v4683_v55 = vld [vmem:[%s5641_s2 + $0x1c0] ss:$8 sps:$4 sm:$0xff]   ;;  %v4692_v10 = vld [vmem:[%s5641_s2 + $0x1f0] ss:$8 sps:$4 sm:$0xff]  }
0x1c57   : > { %v3101_v62 = vmax.f32 %v3055_v9, 0.0  ;;  %v4689_v9 = vld [vmem:[%s5641_s2 + $0x1e0] ss:$8 sps:$4 sm:$0xff]   ;;  %v4707_v61 = vld [vmem:[%s5616_s6 + $0x70] sm:$0xff]  }
0x1c58   : > { %v3126_v0 = vmul.f32 %v3109_v40, %v3100_v59  ;;  %v4688_v40 = vld [vmem:[%s5641_s2 + $0x1d4] ss:$8 sps:$4 sm:$0xff]   ;;  %v4705_v59 = vld [vmem:[%s5616_s6 + $0x68] sm:$0xff]  }
0x1c59   : > { %v3127_v3 = vmul.f32 %v3113_v43, %v3101_v62  ;;  %v4694_v43 = vld [vmem:[%s5641_s2 + $0x1f4] ss:$8 sps:$4 sm:$0xff]   ;;  %4253 = vmatprep.subr.bf16.mxu1 %v4705_v59 }
0x1c5a   : > { %v3152_v4 = vadd.f32 %v3135_v60, %v3126_v0  ;;  %v4706_v60 = vld [vmem:[%s5616_s6 + $0x28] sm:$0xff]   ;;  %v4708_v62 = vld [vmem:[%s5616_s6 + $0x30] sm:$0xff]   ;;  %v4710_v0 = vld [vmem:[%s5616_s6 + $0x38] sm:$0xff]  }
0x1c5b   : > { %v3093_v26 = vpop.f32.mrb[32].mxu0  ;;  %v3153_v5 = vadd.f32 %v3139_v63, %v3127_v3  ;;  %4254 = vmatpush3.bf16.msra.mxu1 %v4706_v60  ;;  %v4709_v63 = vld [vmem:[%s5616_s6 + $0x78] sm:$0xff]  }
0x1c5c   : > { %v3094_v6 = vadd.f32 %v3093_v26, %v3006_v1  ;;  %v3095_v8 = vpop.f32.mrb[33].mxu0  ;;  %v3220_v17 = vpack.c.bf16 %v3152_v4, %v3152_v4  ;;  %4255 = vmatprep.subr.bf16.mxu1 %v4707_v61  ;;  %v3224_v1 = vld [vmem:[%s5645_s5] sm:$0x3]  ;;  %s4169_s5 = sshll.u32 %s5083_s0, 4  ;;  %s4886_s0 = smov [#allocation2]  }
0x1c5d   : > { %v3096_v11 = vadd.f32 %v3095_v8, %v3010_v25  ;;  %v3097_v13 = vpop.f32.mrb[34].mxu0  ;;  %v3221_v14 = vpack.c.bf16 %v3153_v5, %v3153_v5  ;;  %v3549_v3 = vrot.slane %v3224_v1, %v5461_v47  ;;  %v3640_v25 = vld [vmem:[%s5646_s3] sm:$0x3]  ;;  %v3553_v4 = vrot.slane %v3224_v1, %v5464_v49  ;;  %s1006_s3 = scalar_lea.vmem [#allocation2], %s1005_s14  ;;  %s5528_s6 = scalar_lea.hbm %s5060_s4, %s4169_s5 }
0x1c5e   : > { %v3102_v18 = vmax.f32 %v3094_v6, 0.0  ;;  %v3098_v20 = vpop.f32.mrb[35].mxu0  ;;  %v3654_v5 = vld [vmem:[%s5647_s12] sm:$0x3]  ;;  %s3854_s2 = sshll.u32 %s1006_s3, 4  ;;  %s4783_s12 = sshll.u32 %s4886_s0, 4  ;;  %s5530_s2 = int_to_ptr.vmem [resolvable:$true] %s3854_s2  ;;  %s4784_s12 = int_to_ptr.vmem [resolvable:$false] %s4783_s12 }
0x1c5f   : > { %v3103_v22 = vmax.f32 %v3096_v11, 0.0  ;;  %3588 = vmatprep.mubr.bf16.mxu0 %v3221_v14  ;;  %4256 = vmatpush3.bf16.msra.mxu1 %v4708_v62  ;;  %s4779_s9 = scalar_lea.vmem %s5530_s2, 16  ;;  %s4785_s13 = scalar_lea.vmem %s4784_s12, 32 }
0x1c60   : > { %v3128_v24 = vmul.f32 %v3117_v7, %v3102_v18  ;;  %3589 = vmatmul.mubr.bf16.vlgmr.msra.gmra.mrb[36].mxu0 %v3220_v17  ;;  %4257 = vmatprep.subr.bf16.mxu1 %v4709_v63  ;;  %v3645_v7 = vrot.slane %v3640_v25, %v5461_v47  ;;  %p4780_p11 = scmp.ne.s32.totalorder %s5530_s2, %s4779_s9  ;;  %p4786_p0 = scmp.lt.s32.totalorder %s5530_s2, %s4784_s12 }
0x1c61   : > { %v3129_v27 = vmul.f32 %v3121_v12, %v3103_v22  ;;  %3598 = vmatpush1.bf16.msra.mxu0 %v4647_v16  ;;  %v3649_v12 = vrot.slane %v3640_v25, %v5464_v49  ;;  %v3659_v16 = vrot.slane %v3654_v5, %v5461_v47  ;;  %p4787_p1 = scmp.lt.s32.totalorder %s4785_s13, %s4779_s9 }
0x1c62   : > { %v5477_v29 = vadd.f32 %v3143_v19, %v3128_v24  ;;  %3599 = vmatprep.subr.bf16.mxu0 %v4652_v21  ;;  %v3663_v19 = vrot.slane %v3654_v5, %v5464_v49  ;;  %p4781_p12 = pnand %p4780_p11, %p5100_p5 }
0x1c63   : > { %v3155_v31 = vadd.f32 %v3147_v23, %v3129_v27  ;;  %4258 = vmatpush3.bf16.msra.mxu1 %v4710_v0  ;;  %p4788_p2 = por %p4787_p1, %p4786_p0 }
0x1c64   : > { %v3222_v58 = vpack.c.bf16 %v5477_v29, %v5477_v29  ;;  %v3702_v29 = vld [vmem:[%s5055_s27] sm:$0x1]  ;;  %p4782_p13 = pneg %p4781_p12 }
0x1c65   : > { %3600 = vmatpush1.bf16.msra.mxu0 %v4650_v28  ;;  %v3223_v15 = vpack.c.bf16 %v3155_v31, %v3155_v31 }
0x1c66   : > { %3601 = vmatprep.subr.bf16.mxu0 %v4655_v30  ;;  %p4789_p3 = pnand %p4788_p2, %p4782_p13 }
0x1c67   : > { %3629 = vmatprep.mubr.bf16.mxu0 %v3223_v15 }
0x1c69   : > { %3602 = vmatpush1.bf16.msra.mxu0 %v4653_v32 }
0x1c6a   : > { %3603 = vmatprep.subr.bf16.mxu0 %v4658_v33 }
0x1c6d   : > { %3604 = vmatpush1.bf16.msra.mxu0 %v4656_v34 }
0x1c6e   : > { %3605 = vmatprep.subr.bf16.mxu0 %v4661_v35 }
0x1c71   : > { %3606 = vmatpush1.bf16.msra.mxu0 %v4659_v36 }
0x1c72   : > { %3607 = vmatprep.subr.bf16.mxu0 %v4664_v38 }
0x1c75   : > { %3608 = vmatpush1.bf16.msra.mxu0 %v4662_v37 }
0x1c76   : > { %3609 = vmatprep.subr.bf16.mxu0 %v4667_v39 }
0x1c79   : > { %3610 = vmatpush1.bf16.msra.mxu0 %v4665_v2 }
0x1c7a   : > { %3611 = vmatprep.subr.bf16.mxu0 %v4670_v41 }
0x1c7d   : > { %3612 = vmatpush1.bf16.msra.mxu0 %v4668_v42 }
0x1c7e   : > { %3613 = vmatprep.subr.bf16.mxu0 %v4673_v44 }
0x1c81   : > { %3614 = vmatpush1.bf16.msra.mxu0 %v4671_v45 }
0x1c82   : > { %3615 = vmatprep.subr.bf16.mxu0 %v4676_v46 }
0x1c85   : > { %3616 = vmatpush1.bf16.msra.mxu0 %v4674_v48 }
0x1c86   : > { %3617 = vmatprep.subr.bf16.mxu0 %v4679_v50 }
0x1c89   : > { %3618 = vmatpush1.bf16.msra.mxu0 %v4677_v51 }
0x1c8a   : > { %3619 = vmatprep.subr.bf16.mxu0 %v4682_v52 }
0x1c8d   : > { %3620 = vmatpush1.bf16.msra.mxu0 %v4680_v53 }
0x1c8e   : > { %3621 = vmatprep.subr.bf16.mxu0 %v4685_v54 }
0x1c91   : > { %3622 = vmatpush1.bf16.msra.mxu0 %v4683_v55 }
0x1c92   : > { %3623 = vmatprep.subr.bf16.mxu0 %v4688_v40 }
0x1c95   : > { %3624 = vmatpush1.bf16.msra.mxu0 %v4686_v56 }
0x1c96   : > { %3625 = vmatprep.subr.bf16.mxu0 %v4691_v57 }
0x1c99   : > { %3626 = vmatpush1.bf16.msra.mxu0 %v4689_v9 }
0x1c9a   : > { %3627 = vmatprep.subr.bf16.mxu0 %v4694_v43 }
0x1c9d   : > { %3628 = vmatpush1.bf16.msra.mxu0 %v4692_v10 }
0x1ca0   : > { %3630 = vmatmul.mubr.bf16.vlgmr.msra.gmra.mrb[36].mxu0 %v3222_v58 }
0x1d73   : > { %v3631_v26 = vpop.f32.mrb[36].mxu0 }
0x1d74   : > { %v4449_v6 = vadd.f32 %v3631_v26, %v3549_v3  ;;  %v3633_v8 = vpop.f32.mrb[37].mxu0 }
0x1d75   : > { %v4450_v11 = vadd.f32 %v3633_v8, %v3553_v4  ;;  %v3635_v13 = vpop.f32.mrb[38].mxu0 }
0x1d76   : > { %v3638_v14 = vmax.f32 %v4449_v6, 0.0  ;;  %v3636_v17 = vpop.f32.mrb[39].mxu0 }
0x1d77   : > { %v3639_v18 = vmax.f32 %v4450_v11, 0.0 }
0x1d78   : > { %v3652_v20 = vmul.f32 %v3645_v7, %v3638_v14 }
0x1d79   : > { %v3653_v21 = vmul.f32 %v3649_v12, %v3639_v18 }
0x1d7a   : > { %v3666_v22 = vadd.f32 %v3659_v16, %v3652_v20 }
0x1d7b   : > { %v3667_v23 = vadd.f32 %v3663_v19, %v3653_v21 }
0x1d7c   : > { %v3700_v27 = vpack.c.bf16 %v3666_v22, %v3666_v22 }
0x1d7d   : > { %v3701_v24 = vpack.c.bf16 %v3667_v23, %v3667_v23 }
0x1d7f   : > { %3831 = vmatprep.mubr.bf16.mxu1 %v3701_v24 }
0x1d80   : > { %3832 = vmatmul.mubr.bf16.vlgmr.msra.gmra.mrb[60].mxu1 %v3700_v27 }
0x1e53   : > { %v4259_v28 = vpop.f32.mrb[60].mxu1 }
0x1e54   : > { %v4260_v30 = vpop.f32.mrb[61].mxu1 }
0x1e55   : > { %v4261_v47 = vadd.f32 %v4260_v30, %v4259_v28  ;;  %v4262_v31 = vpop.f32.mrb[62].mxu1 }
0x1e56   : > { %v4263_v49 = vpop.f32.mrb[63].mxu1 }
0x1e57   : > { %v3834_v32 = vadd.f32 %v4261_v47, %v3702_v29 }
0x1e59   : > { %3840 = vst.msk [vmem:[%s1006_s3] sm:$0x1] %vm3839_vm10, %v3834_v32 }
0x1e5a   : > { %4792 = shalt.err (!%p4789_p3)
}
0x1e5b   : > { %s4793_s14 = scalar_lea.hbm %s5528_s6, 16  ;;  %s4797_s5 = scalar_lea.hbm %s5060_s4, 32 }
0x1e5c   : > { %p4794_p4 = scmp.ne.s32.totalorder %s5528_s6, %s4793_s14  ;;  %p4798_p9 = scmp.lt.u32.totalorder %s5528_s6, %s5060_s4 }
0x1e5d   : > { %p4799_p10 = scmp.lt.u32.totalorder %s4797_s5, %s4793_s14  ;;  %p4801_p12 = scmp.lt.u32.totalorder %s4793_s14, %s5528_s6 }
0x1e5e   : > { %p4795_p7 = pnand %p4794_p4, %p5100_p5 }
0x1e5f   : > { %p4800_p11 = por %p4799_p10, %p4798_p9 }
0x1e60   : > { %p4796_p8 = pneg %p4795_p7 }
0x1e61   : > { %p4802_p0 = por %p4801_p12, %p4800_p11 }
0x1e63   : > { %p4803_p13 = pnand %p4802_p0, %p4796_p8 }
0x1e65   : > { %4806 = shalt.err (!%p4803_p13)
}
0x1e66   : > { %4455 = dma.vmem_to_hbm [thread:$0]  (%p5100_p5), %s5530_s2, 16, %s5528_s6, %s3842_s8  }
0x1e67 PF: > { %p4461_p1 = scmp.ge.s32.totalorder %s4841_s15, 2  ;;  %s3866_s12 = sand.u32 1, %s4829_s7  }
0x1e68   : > { %s3867_s9 = scalar_lea.sflag [#allocation3], %s3866_s12 }
0x1e69   : > { %p4458_p2 = pnand %p4461_p1, %p5104_p6 }
0x1e6b   : > { %4824 = dma.done.wait (!%p4458_p2), %s3867_s9, 16  }
0x1e6c   : > { %4826 = vsyncadd (!%p4458_p2), %s3867_s9, 4294967280  ;;  %p77_p3 = scmp.ge.s32.totalorder %s5087_s18, 4   ;;  %s5648_s7 = smov %s4833_s10 }
0x1e6d   : > { %s5649_s10 = smov %s4837_s11  ;;  %s5650_s11 = smov %s5098_s26 }
0x1e6e   : > { %s5651_s15 = smov %s5087_s18  ;;  %79 = sbr.rel (!%p77_p3) target bundleno = 66 (0x42), region = 235 }
0x1e75   :  { %3871 = vsyncpa [#allocation3], 1 }
0x1e76   :  { %3873 = vsyncpa [#allocation3 + $0x1], 1 }

</bundles_post_ra>
